<compile_context>
chip_gen: v7x
topology: tpu7x:2x2x1
jax: 0.10.0
libtpu: 0.0.40
codegen_flags: <defaults>
</compile_context>

<pallas_src>
import functools

import numpy as np
import jax
import jax.numpy as jnp
from jax.experimental import pallas as pl
from jax.experimental.pallas import tpu as pltpu

NEG_SLOPE = -0.2  # nn.LeakyReLU(-0.2)
_DY_DX = tuple((dy, dx) for dy in (-1, 0, 1) for dx in (-1, 0, 1))


# --------------------------------------------------------------------------
# Tiny constant tables built in numpy at trace time.
# --------------------------------------------------------------------------
@functools.lru_cache(maxsize=None)
def _tap_masks(res):
    """(9, HW) 0/1 masks: mask[t, h*res+w] = 1 iff (h+dy, w+dx) is in bounds."""
    hw = res * res
    m = np.zeros((9, hw), np.float32)
    for t, (dy, dx) in enumerate(_DY_DX):
        for h in range(res):
            if not 0 <= h + dy < res:
                continue
            for w in range(res):
                if 0 <= w + dx < res:
                    m[t, h * res + w] = 1.0
    return m


@functools.lru_cache(maxsize=None)
def _down_operator_t(res):
    """Nearest res -> res//2 (== x[::2, ::2]) as an (HW, HW/4) right-mul matrix."""
    out = res // 2
    m = np.zeros((res * res, out * out), np.float32)
    for h in range(out):
        for w in range(out):
            m[(2 * h) * res + 2 * w, h * out + w] = 1.0
    return m


@functools.lru_cache(maxsize=None)
def _up_operator_t(res):
    """Nearest res -> 2*res (2x repeat) as an (HW, 4*HW) right-mul matrix."""
    out = res * 2
    m = np.zeros((res * res, out * out), np.float32)
    for h in range(out):
        for w in range(out):
            m[(h // 2) * res + w // 2, h * out + w] = 1.0
    return m


# --------------------------------------------------------------------------
# Fused Pallas kernel: one grid step == one image, whole net stays in VMEM.
# Activations are channels-first (C, HW) with HW on the lane axis.
# --------------------------------------------------------------------------
def _make_kernel(plan, n_masks, n_ops, n_w, n_b):
    def kernel(*refs):
        x_ref, b0_ref = refs[0], refs[1]
        p = 2
        mask_refs = refs[p:p + n_masks]; p += n_masks
        op_refs = refs[p:p + n_ops]; p += n_ops
        w_refs = refs[p:p + n_w]; p += n_w
        b_refs = refs[p:p + n_b]; p += n_b
        o_ref = refs[p]

        x = x_ref[0]                                   # (Cin0, HW0) f32
        for step in plan:                              # static trace-time unroll
            if step[0] == "conv":
                _, mi, wi, res, use_b0, bi, act = step
                m = mask_refs[mi][...]                 # (9, HW)
                taps = []
                for t, (dy, dx) in enumerate(_DY_DX):
                    if dy == 0 and dx == 0:
                        taps.append(x)                 # center tap: no shift/mask
                    else:
                        shifted = jnp.roll(x, -(dy * res + dx), axis=-1)
                        taps.append(shifted * m[t:t + 1, :])
                xcat = jnp.concatenate(taps, axis=0)   # (9*Cin, HW) in VMEM
                # ONE K = 9*Cin matmul; N (lane) dim = HW -> lane-dense output.
                y = jnp.dot(w_refs[wi][...], xcat,
                            preferred_element_type=jnp.float32)   # (Cout, HW)
                y = y + (b0_ref[0] if use_b0 else b_refs[bi][...])
                if act:
                    y = jnp.where(y >= 0, y, NEG_SLOPE * y)
                x = y
            else:                                      # ("resample", op_idx)
                _, oi = step
                x = jnp.dot(x, op_refs[oi][...],
                            preferred_element_type=jnp.float32)
        # x is already (Cout, HW) == NCHW-flat; lane-dense store, no transpose.
        o_ref[0] = x.astype(o_ref.dtype)

    return kernel


# --------------------------------------------------------------------------
# Deterministic parameter init (matches nn.Conv2d / nn.Embedding defaults)
# --------------------------------------------------------------------------
def _init_conv(key, cin, cout):
    kw, kb = jax.random.split(key)
    bound = 1.0 / float(np.sqrt(cin * 9.0))
    w = jax.random.uniform(kw, (3, 3, cin, cout), jnp.float32, -bound, bound)
    b = jax.random.uniform(kb, (cout,), jnp.float32, -bound, bound)
    return w, b


def init_params(key, num_steps, base, blocks_num):
    keys = jax.random.split(key, 2 + 4 * blocks_num)
    params = {
        "time_embed": jax.random.normal(keys[0], (num_steps, base), jnp.float32),
    }
    params["in_w"], params["in_b"] = _init_conv(keys[1], 3, base)
    params["down"], params["up"] = [], []
    idx = 2
    for i in range(blocks_num):
        lo = base * 2 ** i
        hi = lo * 2
        d1 = _init_conv(keys[idx], lo, hi); idx += 1
        d2 = _init_conv(keys[idx], hi, hi); idx += 1
        u1 = _init_conv(keys[idx], hi, lo); idx += 1
        u2 = _init_conv(keys[idx], lo, lo); idx += 1
        params["down"].append((d1, d2))
        params["up"].append((u1, u2))
    return params


# --------------------------------------------------------------------------
# Full VerySimpleUnet forward (NCHW in / NCHW out, like the PyTorch module)
# --------------------------------------------------------------------------
def unet_forward(params, x_nchw, t, blocks_num):
    n, cin, h, w = x_nchw.shape
    assert h == w, "square images only (matches F.interpolate(size=int) usage)"
    base = params["time_embed"].shape[1]
    hw0 = h * w

    # JAX-side glue: NCHW -> channels-first flat, embedding lookup, and fold
    # the per-image time embedding into the input-conv bias.
    x_in = x_nchw.reshape(n, cin, hw0)                       # (N, Cin, HW)
    temb = jnp.take(params["time_embed"], t, axis=0)         # (N, base)
    b0 = (temb + params["in_b"][None, :])[..., None]         # (N, base, 1)

    # ---- static execution plan + small constant tables ---------------------
    masks, mask_idx = [], {}
    ops, conv_w, conv_b, plan = [], [], [], []

    def _mask(res):
        if res not in mask_idx:
            mask_idx[res] = len(masks)
            masks.append(jnp.asarray(_tap_masks(res)))
        return mask_idx[res]

    def _conv(wb, res, use_b0=False, act=True):
        w4, b1 = wb                                          # (3,3,Cin,Cout), (Cout,)
        ci, co = w4.shape[2], w4.shape[3]
        w2 = jnp.asarray(w4, jnp.float32).reshape(9, ci, co)
        w2 = jnp.transpose(w2, (2, 0, 1)).reshape(co, 9 * ci)  # (Cout, 9*Cin)
        wi = len(conv_w); conv_w.append(w2)
        bi = None
        if not use_b0:
            bi = len(conv_b)
            conv_b.append(jnp.asarray(b1, jnp.float32).reshape(-1, 1))
        plan.append(("conv", _mask(res), wi, res, use_b0, bi, act))

    def _resample(mat):
        plan.append(("resample", len(ops)))
        ops.append(jnp.asarray(mat))

    res = h
    _conv((params["in_w"], params["in_b"]), res, use_b0=True, act=False)
    for i in range(blocks_num):
        c1, c2 = params["down"][i]
        _conv(c1, res); _conv(c2, res)
        _resample(_down_operator_t(res)); res //= 2
    for i in reversed(range(blocks_num)):
        c1, c2 = params["up"][i]
        _conv(c1, res); _conv(c2, res)
        _resample(_up_operator_t(res)); res *= 2

    # ---- single fused pallas_call ------------------------------------------
    consts = masks + ops + conv_w + conv_b
    in_specs = [
        pl.BlockSpec((1, cin, hw0), lambda i: (i, 0, 0)),
        pl.BlockSpec((1, base, 1), lambda i: (i, 0, 0)),
    ]
    for arr in consts:                                       # grid-invariant blocks
        in_specs.append(pl.BlockSpec(arr.shape, lambda i, nd=arr.ndim: (0,) * nd))

    out = pl.pallas_call(
        _make_kernel(plan, len(masks), len(ops), len(conv_w), len(conv_b)),
        out_shape=jax.ShapeDtypeStruct((n, base, hw0), jnp.float32),
        grid=(n,),
        in_specs=in_specs,
        out_specs=pl.BlockSpec((1, base, hw0), lambda i: (i, 0, 0)),
        compiler_params=pltpu.CompilerParams(
            dimension_semantics=("parallel",)),
    )(x_in, b0, *consts)
    return out.reshape(n, base, h, w)                        # already NCHW


# --------------------------------------------------------------------------
# Pure-JAX f32 reference (correctness check only)
# --------------------------------------------------------------------------
def _ref_conv(x, w, b):
    y = jax.lax.conv_general_dilated(
        x, w, window_strides=(1, 1), padding="SAME",
        dimension_numbers=("NHWC", "HWIO", "NHWC"),
        precision=jax.lax.Precision.HIGHEST)
    return y + b[None, None, None, :]


def ref_forward(params, x_nchw, t, blocks_num):
    act = lambda v: jnp.where(v >= 0, v, NEG_SLOPE * v)
    x = jnp.transpose(x_nchw, (0, 2, 3, 1))
    temb = jnp.take(params["time_embed"], t, axis=0)
    x = _ref_conv(x, params["in_w"], params["in_b"]) + temb[:, None, None, :]
    for i in range(blocks_num):
        (w1, b1), (w2, b2) = params["down"][i]
        x = act(_ref_conv(x, w1, b1))
        x = act(_ref_conv(x, w2, b2))
        x = x[:, ::2, ::2, :]
    for i in reversed(range(blocks_num)):
        (w1, b1), (w2, b2) = params["up"][i]
        x = act(_ref_conv(x, w1, b1))
        x = act(_ref_conv(x, w2, b2))
        x = jnp.repeat(jnp.repeat(x, 2, axis=1), 2, axis=2)
    return jnp.transpose(x, (0, 3, 1, 2))


if __name__ == "__main__":
    model_config = {"num_steps": 10, "base_hidden_dim": 8, "blocks_num": 2}
    num_steps = model_config["num_steps"]
    base = model_config["base_hidden_dim"]
    blocks_num = model_config["blocks_num"]

    key = jax.random.PRNGKey(0)
    kp, kx, kt = jax.random.split(key, 3)
    params = init_params(kp, num_steps, base, blocks_num)

    x = jax.random.normal(kx, (2, 3, 16, 16), jnp.float32)   # NCHW like torch
    t = jax.random.randint(kt, (2,), 0, num_steps)

    out = jax.block_until_ready(unet_forward(params, x, t, blocks_num))
    assert out.shape == (2, base, 16, 16), out.shape

    ref = jax.block_until_ready(ref_forward(params, x, t, blocks_num))
    max_err = float(jnp.max(jnp.abs(out - ref)))
    # All-f32 math -> only summation-order differences remain.
    assert jnp.allclose(out, ref, rtol=1e-3, atol=1e-3), max_err

    print("KERNEL_OK")
</pallas_src>

<mosaic_0001>
module attributes {stable_mosaic.version = 11 : i64} {
  func.func @kernel(%arg0: i32, %arg1: memref<1x3x256xf32, #tpu.memory_space<vmem>>, %arg2: memref<1x8x1xf32, #tpu.memory_space<vmem>>, %arg3: memref<9x256xf32, #tpu.memory_space<vmem>>, %arg4: memref<9x64xf32, #tpu.memory_space<vmem>>, %arg5: memref<9x16xf32, #tpu.memory_space<vmem>>, %arg6: memref<256x64xf32, #tpu.memory_space<vmem>>, %arg7: memref<64x16xf32, #tpu.memory_space<vmem>>, %arg8: memref<16x64xf32, #tpu.memory_space<vmem>>, %arg9: memref<64x256xf32, #tpu.memory_space<vmem>>, %arg10: memref<8x27xf32, #tpu.memory_space<vmem>>, %arg11: memref<16x72xf32, #tpu.memory_space<vmem>>, %arg12: memref<16x144xf32, #tpu.memory_space<vmem>>, %arg13: memref<32x144xf32, #tpu.memory_space<vmem>>, %arg14: memref<32x288xf32, #tpu.memory_space<vmem>>, %arg15: memref<16x288xf32, #tpu.memory_space<vmem>>, %arg16: memref<16x144xf32, #tpu.memory_space<vmem>>, %arg17: memref<8x144xf32, #tpu.memory_space<vmem>>, %arg18: memref<8x72xf32, #tpu.memory_space<vmem>>, %arg19: memref<16x1xf32, #tpu.memory_space<vmem>>, %arg20: memref<16x1xf32, #tpu.memory_space<vmem>>, %arg21: memref<32x1xf32, #tpu.memory_space<vmem>>, %arg22: memref<32x1xf32, #tpu.memory_space<vmem>>, %arg23: memref<16x1xf32, #tpu.memory_space<vmem>>, %arg24: memref<16x1xf32, #tpu.memory_space<vmem>>, %arg25: memref<8x1xf32, #tpu.memory_space<vmem>>, %arg26: memref<8x1xf32, #tpu.memory_space<vmem>>, %arg27: memref<1x8x256xf32, #tpu.memory_space<vmem>>) attributes {dimension_semantics = [#tpu.dimension_semantics<parallel>], iteration_bounds = array<i64: 2>, scalar_prefetch = 0 : i64, scratch_operands = 0 : i64, tpu.core_type = #tpu.core_type<tc>, window_params = [{transform_indices = @transform_0, window_bounds = array<i64: 1, 3, 256>}, {transform_indices = @transform_1, window_bounds = array<i64: 1, 8, 1>}, {pipeline_mode = #tpu.pipeline_mode<synchronous>, transform_indices = @transform_2, window_bounds = array<i64: 9, 256>}, {pipeline_mode = #tpu.pipeline_mode<synchronous>, transform_indices = @transform_3, window_bounds = array<i64: 9, 64>}, {pipeline_mode = #tpu.pipeline_mode<synchronous>, transform_indices = @transform_4, window_bounds = array<i64: 9, 16>}, {pipeline_mode = #tpu.pipeline_mode<synchronous>, transform_indices = @transform_5, window_bounds = array<i64: 256, 64>}, {pipeline_mode = #tpu.pipeline_mode<synchronous>, transform_indices = @transform_6, window_bounds = array<i64: 64, 16>}, {pipeline_mode = #tpu.pipeline_mode<synchronous>, transform_indices = @transform_7, window_bounds = array<i64: 16, 64>}, {pipeline_mode = #tpu.pipeline_mode<synchronous>, transform_indices = @transform_8, window_bounds = array<i64: 64, 256>}, {pipeline_mode = #tpu.pipeline_mode<synchronous>, transform_indices = @transform_9, window_bounds = array<i64: 8, 27>}, {pipeline_mode = #tpu.pipeline_mode<synchronous>, transform_indices = @transform_10, window_bounds = array<i64: 16, 72>}, {pipeline_mode = #tpu.pipeline_mode<synchronous>, transform_indices = @transform_11, window_bounds = array<i64: 16, 144>}, {pipeline_mode = #tpu.pipeline_mode<synchronous>, transform_indices = @transform_12, window_bounds = array<i64: 32, 144>}, {pipeline_mode = #tpu.pipeline_mode<synchronous>, transform_indices = @transform_13, window_bounds = array<i64: 32, 288>}, {pipeline_mode = #tpu.pipeline_mode<synchronous>, transform_indices = @transform_14, window_bounds = array<i64: 16, 288>}, {pipeline_mode = #tpu.pipeline_mode<synchronous>, transform_indices = @transform_15, window_bounds = array<i64: 16, 144>}, {pipeline_mode = #tpu.pipeline_mode<synchronous>, transform_indices = @transform_16, window_bounds = array<i64: 8, 144>}, {pipeline_mode = #tpu.pipeline_mode<synchronous>, transform_indices = @transform_17, window_bounds = array<i64: 8, 72>}, {pipeline_mode = #tpu.pipeline_mode<synchronous>, transform_indices = @transform_18, window_bounds = array<i64: 16, 1>}, {pipeline_mode = #tpu.pipeline_mode<synchronous>, transform_indices = @transform_19, window_bounds = array<i64: 16, 1>}, {pipeline_mode = #tpu.pipeline_mode<synchronous>, transform_indices = @transform_20, window_bounds = array<i64: 32, 1>}, {pipeline_mode = #tpu.pipeline_mode<synchronous>, transform_indices = @transform_21, window_bounds = array<i64: 32, 1>}, {pipeline_mode = #tpu.pipeline_mode<synchronous>, transform_indices = @transform_22, window_bounds = array<i64: 16, 1>}, {pipeline_mode = #tpu.pipeline_mode<synchronous>, transform_indices = @transform_23, window_bounds = array<i64: 16, 1>}, {pipeline_mode = #tpu.pipeline_mode<synchronous>, transform_indices = @transform_24, window_bounds = array<i64: 8, 1>}, {pipeline_mode = #tpu.pipeline_mode<synchronous>, transform_indices = @transform_25, window_bounds = array<i64: 8, 1>}, {transform_indices = @transform_26, window_bounds = array<i64: 1, 8, 256>}]} {
    %c0 = arith.constant 0 : index
    %c0_0 = arith.constant 0 : index
    %c0_1 = arith.constant 0 : index
    %0 = vector.load %arg1[%c0, %c0_0, %c0_1] : memref<1x3x256xf32, #tpu.memory_space<vmem>>, vector<1x3x256xf32>
    %1 = vector.shape_cast %0 : vector<1x3x256xf32> to vector<3x256xf32>
    %c0_2 = arith.constant 0 : index
    %c0_3 = arith.constant 0 : index
    %2 = vector.load %arg3[%c0_2, %c0_3] : memref<9x256xf32, #tpu.memory_space<vmem>>, vector<9x256xf32>
    %3 = vector.extract_strided_slice %1 {offsets = [0, 239], sizes = [3, 17], strides = [1, 1]} : vector<3x256xf32> to vector<3x17xf32>
    %4 = vector.extract_strided_slice %1 {offsets = [0, 0], sizes = [3, 239], strides = [1, 1]} : vector<3x256xf32> to vector<3x239xf32>
    %5 = tpu.concatenate %3, %4 in 1 : vector<3x17xf32>, vector<3x239xf32> -> vector<3x256xf32>
    %6 = vector.extract_strided_slice %2 {offsets = [0, 0], sizes = [1, 256], strides = [1, 1]} : vector<9x256xf32> to vector<1x256xf32>
    %7 = vector.broadcast %6 : vector<1x256xf32> to vector<3x256xf32>
    %8 = arith.mulf %5, %7 : vector<3x256xf32>
    %9 = vector.extract_strided_slice %1 {offsets = [0, 240], sizes = [3, 16], strides = [1, 1]} : vector<3x256xf32> to vector<3x16xf32>
    %10 = vector.extract_strided_slice %1 {offsets = [0, 0], sizes = [3, 240], strides = [1, 1]} : vector<3x256xf32> to vector<3x240xf32>
    %11 = tpu.concatenate %9, %10 in 1 : vector<3x16xf32>, vector<3x240xf32> -> vector<3x256xf32>
    %12 = vector.extract_strided_slice %2 {offsets = [1, 0], sizes = [1, 256], strides = [1, 1]} : vector<9x256xf32> to vector<1x256xf32>
    %13 = vector.broadcast %12 : vector<1x256xf32> to vector<3x256xf32>
    %14 = arith.mulf %11, %13 : vector<3x256xf32>
    %15 = vector.extract_strided_slice %1 {offsets = [0, 241], sizes = [3, 15], strides = [1, 1]} : vector<3x256xf32> to vector<3x15xf32>
    %16 = vector.extract_strided_slice %1 {offsets = [0, 0], sizes = [3, 241], strides = [1, 1]} : vector<3x256xf32> to vector<3x241xf32>
    %17 = tpu.concatenate %15, %16 in 1 : vector<3x15xf32>, vector<3x241xf32> -> vector<3x256xf32>
    %18 = vector.extract_strided_slice %2 {offsets = [2, 0], sizes = [1, 256], strides = [1, 1]} : vector<9x256xf32> to vector<1x256xf32>
    %19 = vector.broadcast %18 : vector<1x256xf32> to vector<3x256xf32>
    %20 = arith.mulf %17, %19 : vector<3x256xf32>
    %21 = vector.extract_strided_slice %1 {offsets = [0, 255], sizes = [3, 1], strides = [1, 1]} : vector<3x256xf32> to vector<3x1xf32>
    %22 = vector.extract_strided_slice %1 {offsets = [0, 0], sizes = [3, 255], strides = [1, 1]} : vector<3x256xf32> to vector<3x255xf32>
    %23 = tpu.concatenate %21, %22 in 1 : vector<3x1xf32>, vector<3x255xf32> -> vector<3x256xf32>
    %24 = vector.extract_strided_slice %2 {offsets = [3, 0], sizes = [1, 256], strides = [1, 1]} : vector<9x256xf32> to vector<1x256xf32>
    %25 = vector.broadcast %24 : vector<1x256xf32> to vector<3x256xf32>
    %26 = arith.mulf %23, %25 : vector<3x256xf32>
    %27 = vector.extract_strided_slice %1 {offsets = [0, 1], sizes = [3, 255], strides = [1, 1]} : vector<3x256xf32> to vector<3x255xf32>
    %28 = vector.extract_strided_slice %1 {offsets = [0, 0], sizes = [3, 1], strides = [1, 1]} : vector<3x256xf32> to vector<3x1xf32>
    %29 = tpu.concatenate %27, %28 in 1 : vector<3x255xf32>, vector<3x1xf32> -> vector<3x256xf32>
    %30 = vector.extract_strided_slice %2 {offsets = [5, 0], sizes = [1, 256], strides = [1, 1]} : vector<9x256xf32> to vector<1x256xf32>
    %31 = vector.broadcast %30 : vector<1x256xf32> to vector<3x256xf32>
    %32 = arith.mulf %29, %31 : vector<3x256xf32>
    %33 = vector.extract_strided_slice %1 {offsets = [0, 15], sizes = [3, 241], strides = [1, 1]} : vector<3x256xf32> to vector<3x241xf32>
    %34 = vector.extract_strided_slice %1 {offsets = [0, 0], sizes = [3, 15], strides = [1, 1]} : vector<3x256xf32> to vector<3x15xf32>
    %35 = tpu.concatenate %33, %34 in 1 : vector<3x241xf32>, vector<3x15xf32> -> vector<3x256xf32>
    %36 = vector.extract_strided_slice %2 {offsets = [6, 0], sizes = [1, 256], strides = [1, 1]} : vector<9x256xf32> to vector<1x256xf32>
    %37 = vector.broadcast %36 : vector<1x256xf32> to vector<3x256xf32>
    %38 = arith.mulf %35, %37 : vector<3x256xf32>
    %39 = vector.extract_strided_slice %1 {offsets = [0, 16], sizes = [3, 240], strides = [1, 1]} : vector<3x256xf32> to vector<3x240xf32>
    %40 = vector.extract_strided_slice %1 {offsets = [0, 0], sizes = [3, 16], strides = [1, 1]} : vector<3x256xf32> to vector<3x16xf32>
    %41 = tpu.concatenate %39, %40 in 1 : vector<3x240xf32>, vector<3x16xf32> -> vector<3x256xf32>
    %42 = vector.extract_strided_slice %2 {offsets = [7, 0], sizes = [1, 256], strides = [1, 1]} : vector<9x256xf32> to vector<1x256xf32>
    %43 = vector.broadcast %42 : vector<1x256xf32> to vector<3x256xf32>
    %44 = arith.mulf %41, %43 : vector<3x256xf32>
    %45 = vector.extract_strided_slice %1 {offsets = [0, 17], sizes = [3, 239], strides = [1, 1]} : vector<3x256xf32> to vector<3x239xf32>
    %46 = vector.extract_strided_slice %1 {offsets = [0, 0], sizes = [3, 17], strides = [1, 1]} : vector<3x256xf32> to vector<3x17xf32>
    %47 = tpu.concatenate %45, %46 in 1 : vector<3x239xf32>, vector<3x17xf32> -> vector<3x256xf32>
    %48 = vector.extract_strided_slice %2 {offsets = [8, 0], sizes = [1, 256], strides = [1, 1]} : vector<9x256xf32> to vector<1x256xf32>
    %49 = vector.broadcast %48 : vector<1x256xf32> to vector<3x256xf32>
    %50 = arith.mulf %47, %49 : vector<3x256xf32>
    %51 = tpu.concatenate %8, %14, %20, %26, %1, %32, %38, %44, %50 in 0 : vector<3x256xf32>, vector<3x256xf32>, vector<3x256xf32>, vector<3x256xf32>, vector<3x256xf32>, vector<3x256xf32>, vector<3x256xf32>, vector<3x256xf32>, vector<3x256xf32> -> vector<27x256xf32>
    %c0_4 = arith.constant 0 : index
    %c0_5 = arith.constant 0 : index
    %52 = vector.load %arg10[%c0_4, %c0_5] : memref<8x27xf32, #tpu.memory_space<vmem>>, vector<8x27xf32>
    %cst = arith.constant dense<0.000000e+00> : vector<8x256xf32>
    %53 = tpu.matmul %52, %51, %cst {dimension_numbers = #tpu.dot_dimension_numbers<[1], [0], [0], [1], [0, 0, 1, 1], [], []>} : vector<8x27xf32>, vector<27x256xf32>, vector<8x256xf32> -> vector<8x256xf32>
    %c0_6 = arith.constant 0 : index
    %c0_7 = arith.constant 0 : index
    %c0_8 = arith.constant 0 : index
    %54 = vector.load %arg2[%c0_6, %c0_7, %c0_8] : memref<1x8x1xf32, #tpu.memory_space<vmem>>, vector<1x8x1xf32>
    %55 = vector.shape_cast %54 : vector<1x8x1xf32> to vector<8x1xf32>
    %56 = vector.broadcast %55 : vector<8x1xf32> to vector<8x256xf32>
    %57 = arith.addf %53, %56 : vector<8x256xf32>
    %c0_9 = arith.constant 0 : index
    %c0_10 = arith.constant 0 : index
    %58 = vector.load %arg3[%c0_9, %c0_10] : memref<9x256xf32, #tpu.memory_space<vmem>>, vector<9x256xf32>
    %59 = vector.extract_strided_slice %57 {offsets = [0, 239], sizes = [8, 17], strides = [1, 1]} : vector<8x256xf32> to vector<8x17xf32>
    %60 = vector.extract_strided_slice %57 {offsets = [0, 0], sizes = [8, 239], strides = [1, 1]} : vector<8x256xf32> to vector<8x239xf32>
    %61 = tpu.concatenate %59, %60 in 1 : vector<8x17xf32>, vector<8x239xf32> -> vector<8x256xf32>
    %62 = vector.extract_strided_slice %58 {offsets = [0, 0], sizes = [1, 256], strides = [1, 1]} : vector<9x256xf32> to vector<1x256xf32>
    %63 = vector.broadcast %62 : vector<1x256xf32> to vector<8x256xf32>
    %64 = arith.mulf %61, %63 : vector<8x256xf32>
    %65 = vector.extract_strided_slice %57 {offsets = [0, 240], sizes = [8, 16], strides = [1, 1]} : vector<8x256xf32> to vector<8x16xf32>
    %66 = vector.extract_strided_slice %57 {offsets = [0, 0], sizes = [8, 240], strides = [1, 1]} : vector<8x256xf32> to vector<8x240xf32>
    %67 = tpu.concatenate %65, %66 in 1 : vector<8x16xf32>, vector<8x240xf32> -> vector<8x256xf32>
    %68 = vector.extract_strided_slice %58 {offsets = [1, 0], sizes = [1, 256], strides = [1, 1]} : vector<9x256xf32> to vector<1x256xf32>
    %69 = vector.broadcast %68 : vector<1x256xf32> to vector<8x256xf32>
    %70 = arith.mulf %67, %69 : vector<8x256xf32>
    %71 = vector.extract_strided_slice %57 {offsets = [0, 241], sizes = [8, 15], strides = [1, 1]} : vector<8x256xf32> to vector<8x15xf32>
    %72 = vector.extract_strided_slice %57 {offsets = [0, 0], sizes = [8, 241], strides = [1, 1]} : vector<8x256xf32> to vector<8x241xf32>
    %73 = tpu.concatenate %71, %72 in 1 : vector<8x15xf32>, vector<8x241xf32> -> vector<8x256xf32>
    %74 = vector.extract_strided_slice %58 {offsets = [2, 0], sizes = [1, 256], strides = [1, 1]} : vector<9x256xf32> to vector<1x256xf32>
    %75 = vector.broadcast %74 : vector<1x256xf32> to vector<8x256xf32>
    %76 = arith.mulf %73, %75 : vector<8x256xf32>
    %77 = vector.extract_strided_slice %57 {offsets = [0, 255], sizes = [8, 1], strides = [1, 1]} : vector<8x256xf32> to vector<8x1xf32>
    %78 = vector.extract_strided_slice %57 {offsets = [0, 0], sizes = [8, 255], strides = [1, 1]} : vector<8x256xf32> to vector<8x255xf32>
    %79 = tpu.concatenate %77, %78 in 1 : vector<8x1xf32>, vector<8x255xf32> -> vector<8x256xf32>
    %80 = vector.extract_strided_slice %58 {offsets = [3, 0], sizes = [1, 256], strides = [1, 1]} : vector<9x256xf32> to vector<1x256xf32>
    %81 = vector.broadcast %80 : vector<1x256xf32> to vector<8x256xf32>
    %82 = arith.mulf %79, %81 : vector<8x256xf32>
    %83 = vector.extract_strided_slice %57 {offsets = [0, 1], sizes = [8, 255], strides = [1, 1]} : vector<8x256xf32> to vector<8x255xf32>
    %84 = vector.extract_strided_slice %57 {offsets = [0, 0], sizes = [8, 1], strides = [1, 1]} : vector<8x256xf32> to vector<8x1xf32>
    %85 = tpu.concatenate %83, %84 in 1 : vector<8x255xf32>, vector<8x1xf32> -> vector<8x256xf32>
    %86 = vector.extract_strided_slice %58 {offsets = [5, 0], sizes = [1, 256], strides = [1, 1]} : vector<9x256xf32> to vector<1x256xf32>
    %87 = vector.broadcast %86 : vector<1x256xf32> to vector<8x256xf32>
    %88 = arith.mulf %85, %87 : vector<8x256xf32>
    %89 = vector.extract_strided_slice %57 {offsets = [0, 15], sizes = [8, 241], strides = [1, 1]} : vector<8x256xf32> to vector<8x241xf32>
    %90 = vector.extract_strided_slice %57 {offsets = [0, 0], sizes = [8, 15], strides = [1, 1]} : vector<8x256xf32> to vector<8x15xf32>
    %91 = tpu.concatenate %89, %90 in 1 : vector<8x241xf32>, vector<8x15xf32> -> vector<8x256xf32>
    %92 = vector.extract_strided_slice %58 {offsets = [6, 0], sizes = [1, 256], strides = [1, 1]} : vector<9x256xf32> to vector<1x256xf32>
    %93 = vector.broadcast %92 : vector<1x256xf32> to vector<8x256xf32>
    %94 = arith.mulf %91, %93 : vector<8x256xf32>
    %95 = vector.extract_strided_slice %57 {offsets = [0, 16], sizes = [8, 240], strides = [1, 1]} : vector<8x256xf32> to vector<8x240xf32>
    %96 = vector.extract_strided_slice %57 {offsets = [0, 0], sizes = [8, 16], strides = [1, 1]} : vector<8x256xf32> to vector<8x16xf32>
    %97 = tpu.concatenate %95, %96 in 1 : vector<8x240xf32>, vector<8x16xf32> -> vector<8x256xf32>
    %98 = vector.extract_strided_slice %58 {offsets = [7, 0], sizes = [1, 256], strides = [1, 1]} : vector<9x256xf32> to vector<1x256xf32>
    %99 = vector.broadcast %98 : vector<1x256xf32> to vector<8x256xf32>
    %100 = arith.mulf %97, %99 : vector<8x256xf32>
    %101 = vector.extract_strided_slice %57 {offsets = [0, 17], sizes = [8, 239], strides = [1, 1]} : vector<8x256xf32> to vector<8x239xf32>
    %102 = vector.extract_strided_slice %57 {offsets = [0, 0], sizes = [8, 17], strides = [1, 1]} : vector<8x256xf32> to vector<8x17xf32>
    %103 = tpu.concatenate %101, %102 in 1 : vector<8x239xf32>, vector<8x17xf32> -> vector<8x256xf32>
    %104 = vector.extract_strided_slice %58 {offsets = [8, 0], sizes = [1, 256], strides = [1, 1]} : vector<9x256xf32> to vector<1x256xf32>
    %105 = vector.broadcast %104 : vector<1x256xf32> to vector<8x256xf32>
    %106 = arith.mulf %103, %105 : vector<8x256xf32>
    %107 = tpu.concatenate %64, %70, %76, %82, %57, %88, %94, %100, %106 in 0 : vector<8x256xf32>, vector<8x256xf32>, vector<8x256xf32>, vector<8x256xf32>, vector<8x256xf32>, vector<8x256xf32>, vector<8x256xf32>, vector<8x256xf32>, vector<8x256xf32> -> vector<72x256xf32>
    %c0_11 = arith.constant 0 : index
    %c0_12 = arith.constant 0 : index
    %108 = vector.load %arg11[%c0_11, %c0_12] : memref<16x72xf32, #tpu.memory_space<vmem>>, vector<16x72xf32>
    %cst_13 = arith.constant dense<0.000000e+00> : vector<16x256xf32>
    %109 = tpu.matmul %108, %107, %cst_13 {dimension_numbers = #tpu.dot_dimension_numbers<[1], [0], [0], [1], [0, 0, 1, 1], [], []>} : vector<16x72xf32>, vector<72x256xf32>, vector<16x256xf32> -> vector<16x256xf32>
    %c0_14 = arith.constant 0 : index
    %c0_15 = arith.constant 0 : index
    %110 = vector.load %arg19[%c0_14, %c0_15] : memref<16x1xf32, #tpu.memory_space<vmem>>, vector<16x1xf32>
    %111 = vector.broadcast %110 : vector<16x1xf32> to vector<16x256xf32>
    %112 = arith.addf %109, %111 : vector<16x256xf32>
    %cst_16 = arith.constant 0.000000e+00 : f32
    %113 = vector.broadcast %cst_16 : f32 to vector<16x256xf32>
    %114 = arith.cmpf oge, %112, %113 : vector<16x256xf32>
    %cst_17 = arith.constant -2.000000e-01 : f32
    %115 = vector.broadcast %cst_17 : f32 to vector<16x256xf32>
    %116 = arith.mulf %115, %112 : vector<16x256xf32>
    %117 = arith.select %114, %112, %116 : vector<16x256xi1>, vector<16x256xf32>
    %c0_18 = arith.constant 0 : index
    %c0_19 = arith.constant 0 : index
    %118 = vector.load %arg3[%c0_18, %c0_19] : memref<9x256xf32, #tpu.memory_space<vmem>>, vector<9x256xf32>
    %119 = vector.extract_strided_slice %117 {offsets = [0, 239], sizes = [16, 17], strides = [1, 1]} : vector<16x256xf32> to vector<16x17xf32>
    %120 = vector.extract_strided_slice %117 {offsets = [0, 0], sizes = [16, 239], strides = [1, 1]} : vector<16x256xf32> to vector<16x239xf32>
    %121 = tpu.concatenate %119, %120 in 1 : vector<16x17xf32>, vector<16x239xf32> -> vector<16x256xf32>
    %122 = vector.extract_strided_slice %118 {offsets = [0, 0], sizes = [1, 256], strides = [1, 1]} : vector<9x256xf32> to vector<1x256xf32>
    %123 = vector.broadcast %122 : vector<1x256xf32> to vector<16x256xf32>
    %124 = arith.mulf %121, %123 : vector<16x256xf32>
    %125 = vector.extract_strided_slice %117 {offsets = [0, 240], sizes = [16, 16], strides = [1, 1]} : vector<16x256xf32> to vector<16x16xf32>
    %126 = vector.extract_strided_slice %117 {offsets = [0, 0], sizes = [16, 240], strides = [1, 1]} : vector<16x256xf32> to vector<16x240xf32>
    %127 = tpu.concatenate %125, %126 in 1 : vector<16x16xf32>, vector<16x240xf32> -> vector<16x256xf32>
    %128 = vector.extract_strided_slice %118 {offsets = [1, 0], sizes = [1, 256], strides = [1, 1]} : vector<9x256xf32> to vector<1x256xf32>
    %129 = vector.broadcast %128 : vector<1x256xf32> to vector<16x256xf32>
    %130 = arith.mulf %127, %129 : vector<16x256xf32>
    %131 = vector.extract_strided_slice %117 {offsets = [0, 241], sizes = [16, 15], strides = [1, 1]} : vector<16x256xf32> to vector<16x15xf32>
    %132 = vector.extract_strided_slice %117 {offsets = [0, 0], sizes = [16, 241], strides = [1, 1]} : vector<16x256xf32> to vector<16x241xf32>
    %133 = tpu.concatenate %131, %132 in 1 : vector<16x15xf32>, vector<16x241xf32> -> vector<16x256xf32>
    %134 = vector.extract_strided_slice %118 {offsets = [2, 0], sizes = [1, 256], strides = [1, 1]} : vector<9x256xf32> to vector<1x256xf32>
    %135 = vector.broadcast %134 : vector<1x256xf32> to vector<16x256xf32>
    %136 = arith.mulf %133, %135 : vector<16x256xf32>
    %137 = vector.extract_strided_slice %117 {offsets = [0, 255], sizes = [16, 1], strides = [1, 1]} : vector<16x256xf32> to vector<16x1xf32>
    %138 = vector.extract_strided_slice %117 {offsets = [0, 0], sizes = [16, 255], strides = [1, 1]} : vector<16x256xf32> to vector<16x255xf32>
    %139 = tpu.concatenate %137, %138 in 1 : vector<16x1xf32>, vector<16x255xf32> -> vector<16x256xf32>
    %140 = vector.extract_strided_slice %118 {offsets = [3, 0], sizes = [1, 256], strides = [1, 1]} : vector<9x256xf32> to vector<1x256xf32>
    %141 = vector.broadcast %140 : vector<1x256xf32> to vector<16x256xf32>
    %142 = arith.mulf %139, %141 : vector<16x256xf32>
    %143 = vector.extract_strided_slice %117 {offsets = [0, 1], sizes = [16, 255], strides = [1, 1]} : vector<16x256xf32> to vector<16x255xf32>
    %144 = vector.extract_strided_slice %117 {offsets = [0, 0], sizes = [16, 1], strides = [1, 1]} : vector<16x256xf32> to vector<16x1xf32>
    %145 = tpu.concatenate %143, %144 in 1 : vector<16x255xf32>, vector<16x1xf32> -> vector<16x256xf32>
    %146 = vector.extract_strided_slice %118 {offsets = [5, 0], sizes = [1, 256], strides = [1, 1]} : vector<9x256xf32> to vector<1x256xf32>
    %147 = vector.broadcast %146 : vector<1x256xf32> to vector<16x256xf32>
    %148 = arith.mulf %145, %147 : vector<16x256xf32>
    %149 = vector.extract_strided_slice %117 {offsets = [0, 15], sizes = [16, 241], strides = [1, 1]} : vector<16x256xf32> to vector<16x241xf32>
    %150 = vector.extract_strided_slice %117 {offsets = [0, 0], sizes = [16, 15], strides = [1, 1]} : vector<16x256xf32> to vector<16x15xf32>
    %151 = tpu.concatenate %149, %150 in 1 : vector<16x241xf32>, vector<16x15xf32> -> vector<16x256xf32>
    %152 = vector.extract_strided_slice %118 {offsets = [6, 0], sizes = [1, 256], strides = [1, 1]} : vector<9x256xf32> to vector<1x256xf32>
    %153 = vector.broadcast %152 : vector<1x256xf32> to vector<16x256xf32>
    %154 = arith.mulf %151, %153 : vector<16x256xf32>
    %155 = vector.extract_strided_slice %117 {offsets = [0, 16], sizes = [16, 240], strides = [1, 1]} : vector<16x256xf32> to vector<16x240xf32>
    %156 = vector.extract_strided_slice %117 {offsets = [0, 0], sizes = [16, 16], strides = [1, 1]} : vector<16x256xf32> to vector<16x16xf32>
    %157 = tpu.concatenate %155, %156 in 1 : vector<16x240xf32>, vector<16x16xf32> -> vector<16x256xf32>
    %158 = vector.extract_strided_slice %118 {offsets = [7, 0], sizes = [1, 256], strides = [1, 1]} : vector<9x256xf32> to vector<1x256xf32>
    %159 = vector.broadcast %158 : vector<1x256xf32> to vector<16x256xf32>
    %160 = arith.mulf %157, %159 : vector<16x256xf32>
    %161 = vector.extract_strided_slice %117 {offsets = [0, 17], sizes = [16, 239], strides = [1, 1]} : vector<16x256xf32> to vector<16x239xf32>
    %162 = vector.extract_strided_slice %117 {offsets = [0, 0], sizes = [16, 17], strides = [1, 1]} : vector<16x256xf32> to vector<16x17xf32>
    %163 = tpu.concatenate %161, %162 in 1 : vector<16x239xf32>, vector<16x17xf32> -> vector<16x256xf32>
    %164 = vector.extract_strided_slice %118 {offsets = [8, 0], sizes = [1, 256], strides = [1, 1]} : vector<9x256xf32> to vector<1x256xf32>
    %165 = vector.broadcast %164 : vector<1x256xf32> to vector<16x256xf32>
    %166 = arith.mulf %163, %165 : vector<16x256xf32>
    %167 = tpu.concatenate %124, %130, %136, %142, %117, %148, %154, %160, %166 in 0 : vector<16x256xf32>, vector<16x256xf32>, vector<16x256xf32>, vector<16x256xf32>, vector<16x256xf32>, vector<16x256xf32>, vector<16x256xf32>, vector<16x256xf32>, vector<16x256xf32> -> vector<144x256xf32>
    %c0_20 = arith.constant 0 : index
    %c0_21 = arith.constant 0 : index
    %168 = vector.load %arg12[%c0_20, %c0_21] : memref<16x144xf32, #tpu.memory_space<vmem>>, vector<16x144xf32>
    %cst_22 = arith.constant dense<0.000000e+00> : vector<16x256xf32>
    %169 = tpu.matmul %168, %167, %cst_22 {dimension_numbers = #tpu.dot_dimension_numbers<[1], [0], [0], [1], [0, 0, 1, 1], [], []>} : vector<16x144xf32>, vector<144x256xf32>, vector<16x256xf32> -> vector<16x256xf32>
    %c0_23 = arith.constant 0 : index
    %c0_24 = arith.constant 0 : index
    %170 = vector.load %arg20[%c0_23, %c0_24] : memref<16x1xf32, #tpu.memory_space<vmem>>, vector<16x1xf32>
    %171 = vector.broadcast %170 : vector<16x1xf32> to vector<16x256xf32>
    %172 = arith.addf %169, %171 : vector<16x256xf32>
    %cst_25 = arith.constant 0.000000e+00 : f32
    %173 = vector.broadcast %cst_25 : f32 to vector<16x256xf32>
    %174 = arith.cmpf oge, %172, %173 : vector<16x256xf32>
    %cst_26 = arith.constant -2.000000e-01 : f32
    %175 = vector.broadcast %cst_26 : f32 to vector<16x256xf32>
    %176 = arith.mulf %175, %172 : vector<16x256xf32>
    %177 = arith.select %174, %172, %176 : vector<16x256xi1>, vector<16x256xf32>
    %c0_27 = arith.constant 0 : index
    %c0_28 = arith.constant 0 : index
    %178 = vector.load %arg6[%c0_27, %c0_28] : memref<256x64xf32, #tpu.memory_space<vmem>>, vector<256x64xf32>
    %cst_29 = arith.constant dense<0.000000e+00> : vector<16x64xf32>
    %179 = tpu.matmul %177, %178, %cst_29 {dimension_numbers = #tpu.dot_dimension_numbers<[1], [0], [0], [1], [0, 0, 1, 1], [], []>} : vector<16x256xf32>, vector<256x64xf32>, vector<16x64xf32> -> vector<16x64xf32>
    %c0_30 = arith.constant 0 : index
    %c0_31 = arith.constant 0 : index
    %180 = vector.load %arg4[%c0_30, %c0_31] : memref<9x64xf32, #tpu.memory_space<vmem>>, vector<9x64xf32>
    %181 = vector.extract_strided_slice %179 {offsets = [0, 55], sizes = [16, 9], strides = [1, 1]} : vector<16x64xf32> to vector<16x9xf32>
    %182 = vector.extract_strided_slice %179 {offsets = [0, 0], sizes = [16, 55], strides = [1, 1]} : vector<16x64xf32> to vector<16x55xf32>
    %183 = tpu.concatenate %181, %182 in 1 : vector<16x9xf32>, vector<16x55xf32> -> vector<16x64xf32>
    %184 = vector.extract_strided_slice %180 {offsets = [0, 0], sizes = [1, 64], strides = [1, 1]} : vector<9x64xf32> to vector<1x64xf32>
    %185 = vector.broadcast %184 : vector<1x64xf32> to vector<16x64xf32>
    %186 = arith.mulf %183, %185 : vector<16x64xf32>
    %187 = vector.extract_strided_slice %179 {offsets = [0, 56], sizes = [16, 8], strides = [1, 1]} : vector<16x64xf32> to vector<16x8xf32>
    %188 = vector.extract_strided_slice %179 {offsets = [0, 0], sizes = [16, 56], strides = [1, 1]} : vector<16x64xf32> to vector<16x56xf32>
    %189 = tpu.concatenate %187, %188 in 1 : vector<16x8xf32>, vector<16x56xf32> -> vector<16x64xf32>
    %190 = vector.extract_strided_slice %180 {offsets = [1, 0], sizes = [1, 64], strides = [1, 1]} : vector<9x64xf32> to vector<1x64xf32>
    %191 = vector.broadcast %190 : vector<1x64xf32> to vector<16x64xf32>
    %192 = arith.mulf %189, %191 : vector<16x64xf32>
    %193 = vector.extract_strided_slice %179 {offsets = [0, 57], sizes = [16, 7], strides = [1, 1]} : vector<16x64xf32> to vector<16x7xf32>
    %194 = vector.extract_strided_slice %179 {offsets = [0, 0], sizes = [16, 57], strides = [1, 1]} : vector<16x64xf32> to vector<16x57xf32>
    %195 = tpu.concatenate %193, %194 in 1 : vector<16x7xf32>, vector<16x57xf32> -> vector<16x64xf32>
    %196 = vector.extract_strided_slice %180 {offsets = [2, 0], sizes = [1, 64], strides = [1, 1]} : vector<9x64xf32> to vector<1x64xf32>
    %197 = vector.broadcast %196 : vector<1x64xf32> to vector<16x64xf32>
    %198 = arith.mulf %195, %197 : vector<16x64xf32>
    %199 = vector.extract_strided_slice %179 {offsets = [0, 63], sizes = [16, 1], strides = [1, 1]} : vector<16x64xf32> to vector<16x1xf32>
    %200 = vector.extract_strided_slice %179 {offsets = [0, 0], sizes = [16, 63], strides = [1, 1]} : vector<16x64xf32> to vector<16x63xf32>
    %201 = tpu.concatenate %199, %200 in 1 : vector<16x1xf32>, vector<16x63xf32> -> vector<16x64xf32>
    %202 = vector.extract_strided_slice %180 {offsets = [3, 0], sizes = [1, 64], strides = [1, 1]} : vector<9x64xf32> to vector<1x64xf32>
    %203 = vector.broadcast %202 : vector<1x64xf32> to vector<16x64xf32>
    %204 = arith.mulf %201, %203 : vector<16x64xf32>
    %205 = vector.extract_strided_slice %179 {offsets = [0, 1], sizes = [16, 63], strides = [1, 1]} : vector<16x64xf32> to vector<16x63xf32>
    %206 = vector.extract_strided_slice %179 {offsets = [0, 0], sizes = [16, 1], strides = [1, 1]} : vector<16x64xf32> to vector<16x1xf32>
    %207 = tpu.concatenate %205, %206 in 1 : vector<16x63xf32>, vector<16x1xf32> -> vector<16x64xf32>
    %208 = vector.extract_strided_slice %180 {offsets = [5, 0], sizes = [1, 64], strides = [1, 1]} : vector<9x64xf32> to vector<1x64xf32>
    %209 = vector.broadcast %208 : vector<1x64xf32> to vector<16x64xf32>
    %210 = arith.mulf %207, %209 : vector<16x64xf32>
    %211 = vector.extract_strided_slice %179 {offsets = [0, 7], sizes = [16, 57], strides = [1, 1]} : vector<16x64xf32> to vector<16x57xf32>
    %212 = vector.extract_strided_slice %179 {offsets = [0, 0], sizes = [16, 7], strides = [1, 1]} : vector<16x64xf32> to vector<16x7xf32>
    %213 = tpu.concatenate %211, %212 in 1 : vector<16x57xf32>, vector<16x7xf32> -> vector<16x64xf32>
    %214 = vector.extract_strided_slice %180 {offsets = [6, 0], sizes = [1, 64], strides = [1, 1]} : vector<9x64xf32> to vector<1x64xf32>
    %215 = vector.broadcast %214 : vector<1x64xf32> to vector<16x64xf32>
    %216 = arith.mulf %213, %215 : vector<16x64xf32>
    %217 = vector.extract_strided_slice %179 {offsets = [0, 8], sizes = [16, 56], strides = [1, 1]} : vector<16x64xf32> to vector<16x56xf32>
    %218 = vector.extract_strided_slice %179 {offsets = [0, 0], sizes = [16, 8], strides = [1, 1]} : vector<16x64xf32> to vector<16x8xf32>
    %219 = tpu.concatenate %217, %218 in 1 : vector<16x56xf32>, vector<16x8xf32> -> vector<16x64xf32>
    %220 = vector.extract_strided_slice %180 {offsets = [7, 0], sizes = [1, 64], strides = [1, 1]} : vector<9x64xf32> to vector<1x64xf32>
    %221 = vector.broadcast %220 : vector<1x64xf32> to vector<16x64xf32>
    %222 = arith.mulf %219, %221 : vector<16x64xf32>
    %223 = vector.extract_strided_slice %179 {offsets = [0, 9], sizes = [16, 55], strides = [1, 1]} : vector<16x64xf32> to vector<16x55xf32>
    %224 = vector.extract_strided_slice %179 {offsets = [0, 0], sizes = [16, 9], strides = [1, 1]} : vector<16x64xf32> to vector<16x9xf32>
    %225 = tpu.concatenate %223, %224 in 1 : vector<16x55xf32>, vector<16x9xf32> -> vector<16x64xf32>
    %226 = vector.extract_strided_slice %180 {offsets = [8, 0], sizes = [1, 64], strides = [1, 1]} : vector<9x64xf32> to vector<1x64xf32>
    %227 = vector.broadcast %226 : vector<1x64xf32> to vector<16x64xf32>
    %228 = arith.mulf %225, %227 : vector<16x64xf32>
    %229 = tpu.concatenate %186, %192, %198, %204, %179, %210, %216, %222, %228 in 0 : vector<16x64xf32>, vector<16x64xf32>, vector<16x64xf32>, vector<16x64xf32>, vector<16x64xf32>, vector<16x64xf32>, vector<16x64xf32>, vector<16x64xf32>, vector<16x64xf32> -> vector<144x64xf32>
    %c0_32 = arith.constant 0 : index
    %c0_33 = arith.constant 0 : index
    %230 = vector.load %arg13[%c0_32, %c0_33] : memref<32x144xf32, #tpu.memory_space<vmem>>, vector<32x144xf32>
    %cst_34 = arith.constant dense<0.000000e+00> : vector<32x64xf32>
    %231 = tpu.matmul %230, %229, %cst_34 {dimension_numbers = #tpu.dot_dimension_numbers<[1], [0], [0], [1], [0, 0, 1, 1], [], []>} : vector<32x144xf32>, vector<144x64xf32>, vector<32x64xf32> -> vector<32x64xf32>
    %c0_35 = arith.constant 0 : index
    %c0_36 = arith.constant 0 : index
    %232 = vector.load %arg21[%c0_35, %c0_36] : memref<32x1xf32, #tpu.memory_space<vmem>>, vector<32x1xf32>
    %233 = vector.broadcast %232 : vector<32x1xf32> to vector<32x64xf32>
    %234 = arith.addf %231, %233 : vector<32x64xf32>
    %cst_37 = arith.constant 0.000000e+00 : f32
    %235 = vector.broadcast %cst_37 : f32 to vector<32x64xf32>
    %236 = arith.cmpf oge, %234, %235 : vector<32x64xf32>
    %cst_38 = arith.constant -2.000000e-01 : f32
    %237 = vector.broadcast %cst_38 : f32 to vector<32x64xf32>
    %238 = arith.mulf %237, %234 : vector<32x64xf32>
    %239 = arith.select %236, %234, %238 : vector<32x64xi1>, vector<32x64xf32>
    %c0_39 = arith.constant 0 : index
    %c0_40 = arith.constant 0 : index
    %240 = vector.load %arg4[%c0_39, %c0_40] : memref<9x64xf32, #tpu.memory_space<vmem>>, vector<9x64xf32>
    %241 = vector.extract_strided_slice %239 {offsets = [0, 55], sizes = [32, 9], strides = [1, 1]} : vector<32x64xf32> to vector<32x9xf32>
    %242 = vector.extract_strided_slice %239 {offsets = [0, 0], sizes = [32, 55], strides = [1, 1]} : vector<32x64xf32> to vector<32x55xf32>
    %243 = tpu.concatenate %241, %242 in 1 : vector<32x9xf32>, vector<32x55xf32> -> vector<32x64xf32>
    %244 = vector.extract_strided_slice %240 {offsets = [0, 0], sizes = [1, 64], strides = [1, 1]} : vector<9x64xf32> to vector<1x64xf32>
    %245 = vector.broadcast %244 : vector<1x64xf32> to vector<32x64xf32>
    %246 = arith.mulf %243, %245 : vector<32x64xf32>
    %247 = vector.extract_strided_slice %239 {offsets = [0, 56], sizes = [32, 8], strides = [1, 1]} : vector<32x64xf32> to vector<32x8xf32>
    %248 = vector.extract_strided_slice %239 {offsets = [0, 0], sizes = [32, 56], strides = [1, 1]} : vector<32x64xf32> to vector<32x56xf32>
    %249 = tpu.concatenate %247, %248 in 1 : vector<32x8xf32>, vector<32x56xf32> -> vector<32x64xf32>
    %250 = vector.extract_strided_slice %240 {offsets = [1, 0], sizes = [1, 64], strides = [1, 1]} : vector<9x64xf32> to vector<1x64xf32>
    %251 = vector.broadcast %250 : vector<1x64xf32> to vector<32x64xf32>
    %252 = arith.mulf %249, %251 : vector<32x64xf32>
    %253 = vector.extract_strided_slice %239 {offsets = [0, 57], sizes = [32, 7], strides = [1, 1]} : vector<32x64xf32> to vector<32x7xf32>
    %254 = vector.extract_strided_slice %239 {offsets = [0, 0], sizes = [32, 57], strides = [1, 1]} : vector<32x64xf32> to vector<32x57xf32>
    %255 = tpu.concatenate %253, %254 in 1 : vector<32x7xf32>, vector<32x57xf32> -> vector<32x64xf32>
    %256 = vector.extract_strided_slice %240 {offsets = [2, 0], sizes = [1, 64], strides = [1, 1]} : vector<9x64xf32> to vector<1x64xf32>
    %257 = vector.broadcast %256 : vector<1x64xf32> to vector<32x64xf32>
    %258 = arith.mulf %255, %257 : vector<32x64xf32>
    %259 = vector.extract_strided_slice %239 {offsets = [0, 63], sizes = [32, 1], strides = [1, 1]} : vector<32x64xf32> to vector<32x1xf32>
    %260 = vector.extract_strided_slice %239 {offsets = [0, 0], sizes = [32, 63], strides = [1, 1]} : vector<32x64xf32> to vector<32x63xf32>
    %261 = tpu.concatenate %259, %260 in 1 : vector<32x1xf32>, vector<32x63xf32> -> vector<32x64xf32>
    %262 = vector.extract_strided_slice %240 {offsets = [3, 0], sizes = [1, 64], strides = [1, 1]} : vector<9x64xf32> to vector<1x64xf32>
    %263 = vector.broadcast %262 : vector<1x64xf32> to vector<32x64xf32>
    %264 = arith.mulf %261, %263 : vector<32x64xf32>
    %265 = vector.extract_strided_slice %239 {offsets = [0, 1], sizes = [32, 63], strides = [1, 1]} : vector<32x64xf32> to vector<32x63xf32>
    %266 = vector.extract_strided_slice %239 {offsets = [0, 0], sizes = [32, 1], strides = [1, 1]} : vector<32x64xf32> to vector<32x1xf32>
    %267 = tpu.concatenate %265, %266 in 1 : vector<32x63xf32>, vector<32x1xf32> -> vector<32x64xf32>
    %268 = vector.extract_strided_slice %240 {offsets = [5, 0], sizes = [1, 64], strides = [1, 1]} : vector<9x64xf32> to vector<1x64xf32>
    %269 = vector.broadcast %268 : vector<1x64xf32> to vector<32x64xf32>
    %270 = arith.mulf %267, %269 : vector<32x64xf32>
    %271 = vector.extract_strided_slice %239 {offsets = [0, 7], sizes = [32, 57], strides = [1, 1]} : vector<32x64xf32> to vector<32x57xf32>
    %272 = vector.extract_strided_slice %239 {offsets = [0, 0], sizes = [32, 7], strides = [1, 1]} : vector<32x64xf32> to vector<32x7xf32>
    %273 = tpu.concatenate %271, %272 in 1 : vector<32x57xf32>, vector<32x7xf32> -> vector<32x64xf32>
    %274 = vector.extract_strided_slice %240 {offsets = [6, 0], sizes = [1, 64], strides = [1, 1]} : vector<9x64xf32> to vector<1x64xf32>
    %275 = vector.broadcast %274 : vector<1x64xf32> to vector<32x64xf32>
    %276 = arith.mulf %273, %275 : vector<32x64xf32>
    %277 = vector.extract_strided_slice %239 {offsets = [0, 8], sizes = [32, 56], strides = [1, 1]} : vector<32x64xf32> to vector<32x56xf32>
    %278 = vector.extract_strided_slice %239 {offsets = [0, 0], sizes = [32, 8], strides = [1, 1]} : vector<32x64xf32> to vector<32x8xf32>
    %279 = tpu.concatenate %277, %278 in 1 : vector<32x56xf32>, vector<32x8xf32> -> vector<32x64xf32>
    %280 = vector.extract_strided_slice %240 {offsets = [7, 0], sizes = [1, 64], strides = [1, 1]} : vector<9x64xf32> to vector<1x64xf32>
    %281 = vector.broadcast %280 : vector<1x64xf32> to vector<32x64xf32>
    %282 = arith.mulf %279, %281 : vector<32x64xf32>
    %283 = vector.extract_strided_slice %239 {offsets = [0, 9], sizes = [32, 55], strides = [1, 1]} : vector<32x64xf32> to vector<32x55xf32>
    %284 = vector.extract_strided_slice %239 {offsets = [0, 0], sizes = [32, 9], strides = [1, 1]} : vector<32x64xf32> to vector<32x9xf32>
    %285 = tpu.concatenate %283, %284 in 1 : vector<32x55xf32>, vector<32x9xf32> -> vector<32x64xf32>
    %286 = vector.extract_strided_slice %240 {offsets = [8, 0], sizes = [1, 64], strides = [1, 1]} : vector<9x64xf32> to vector<1x64xf32>
    %287 = vector.broadcast %286 : vector<1x64xf32> to vector<32x64xf32>
    %288 = arith.mulf %285, %287 : vector<32x64xf32>
    %289 = tpu.concatenate %246, %252, %258, %264, %239, %270, %276, %282, %288 in 0 : vector<32x64xf32>, vector<32x64xf32>, vector<32x64xf32>, vector<32x64xf32>, vector<32x64xf32>, vector<32x64xf32>, vector<32x64xf32>, vector<32x64xf32>, vector<32x64xf32> -> vector<288x64xf32>
    %c0_41 = arith.constant 0 : index
    %c0_42 = arith.constant 0 : index
    %290 = vector.load %arg14[%c0_41, %c0_42] : memref<32x288xf32, #tpu.memory_space<vmem>>, vector<32x288xf32>
    %cst_43 = arith.constant dense<0.000000e+00> : vector<32x64xf32>
    %291 = tpu.matmul %290, %289, %cst_43 {dimension_numbers = #tpu.dot_dimension_numbers<[1], [0], [0], [1], [0, 0, 1, 1], [], []>} : vector<32x288xf32>, vector<288x64xf32>, vector<32x64xf32> -> vector<32x64xf32>
    %c0_44 = arith.constant 0 : index
    %c0_45 = arith.constant 0 : index
    %292 = vector.load %arg22[%c0_44, %c0_45] : memref<32x1xf32, #tpu.memory_space<vmem>>, vector<32x1xf32>
    %293 = vector.broadcast %292 : vector<32x1xf32> to vector<32x64xf32>
    %294 = arith.addf %291, %293 : vector<32x64xf32>
    %cst_46 = arith.constant 0.000000e+00 : f32
    %295 = vector.broadcast %cst_46 : f32 to vector<32x64xf32>
    %296 = arith.cmpf oge, %294, %295 : vector<32x64xf32>
    %cst_47 = arith.constant -2.000000e-01 : f32
    %297 = vector.broadcast %cst_47 : f32 to vector<32x64xf32>
    %298 = arith.mulf %297, %294 : vector<32x64xf32>
    %299 = arith.select %296, %294, %298 : vector<32x64xi1>, vector<32x64xf32>
    %c0_48 = arith.constant 0 : index
    %c0_49 = arith.constant 0 : index
    %300 = vector.load %arg7[%c0_48, %c0_49] : memref<64x16xf32, #tpu.memory_space<vmem>>, vector<64x16xf32>
    %cst_50 = arith.constant dense<0.000000e+00> : vector<32x16xf32>
    %301 = tpu.matmul %299, %300, %cst_50 {dimension_numbers = #tpu.dot_dimension_numbers<[1], [0], [0], [1], [0, 0, 1, 1], [], []>} : vector<32x64xf32>, vector<64x16xf32>, vector<32x16xf32> -> vector<32x16xf32>
    %c0_51 = arith.constant 0 : index
    %c0_52 = arith.constant 0 : index
    %302 = vector.load %arg5[%c0_51, %c0_52] : memref<9x16xf32, #tpu.memory_space<vmem>>, vector<9x16xf32>
    %303 = vector.extract_strided_slice %301 {offsets = [0, 11], sizes = [32, 5], strides = [1, 1]} : vector<32x16xf32> to vector<32x5xf32>
    %304 = vector.extract_strided_slice %301 {offsets = [0, 0], sizes = [32, 11], strides = [1, 1]} : vector<32x16xf32> to vector<32x11xf32>
    %305 = tpu.concatenate %303, %304 in 1 : vector<32x5xf32>, vector<32x11xf32> -> vector<32x16xf32>
    %306 = vector.extract_strided_slice %302 {offsets = [0, 0], sizes = [1, 16], strides = [1, 1]} : vector<9x16xf32> to vector<1x16xf32>
    %307 = vector.broadcast %306 : vector<1x16xf32> to vector<32x16xf32>
    %308 = arith.mulf %305, %307 : vector<32x16xf32>
    %309 = vector.extract_strided_slice %301 {offsets = [0, 12], sizes = [32, 4], strides = [1, 1]} : vector<32x16xf32> to vector<32x4xf32>
    %310 = vector.extract_strided_slice %301 {offsets = [0, 0], sizes = [32, 12], strides = [1, 1]} : vector<32x16xf32> to vector<32x12xf32>
    %311 = tpu.concatenate %309, %310 in 1 : vector<32x4xf32>, vector<32x12xf32> -> vector<32x16xf32>
    %312 = vector.extract_strided_slice %302 {offsets = [1, 0], sizes = [1, 16], strides = [1, 1]} : vector<9x16xf32> to vector<1x16xf32>
    %313 = vector.broadcast %312 : vector<1x16xf32> to vector<32x16xf32>
    %314 = arith.mulf %311, %313 : vector<32x16xf32>
    %315 = vector.extract_strided_slice %301 {offsets = [0, 13], sizes = [32, 3], strides = [1, 1]} : vector<32x16xf32> to vector<32x3xf32>
    %316 = vector.extract_strided_slice %301 {offsets = [0, 0], sizes = [32, 13], strides = [1, 1]} : vector<32x16xf32> to vector<32x13xf32>
    %317 = tpu.concatenate %315, %316 in 1 : vector<32x3xf32>, vector<32x13xf32> -> vector<32x16xf32>
    %318 = vector.extract_strided_slice %302 {offsets = [2, 0], sizes = [1, 16], strides = [1, 1]} : vector<9x16xf32> to vector<1x16xf32>
    %319 = vector.broadcast %318 : vector<1x16xf32> to vector<32x16xf32>
    %320 = arith.mulf %317, %319 : vector<32x16xf32>
    %321 = vector.extract_strided_slice %301 {offsets = [0, 15], sizes = [32, 1], strides = [1, 1]} : vector<32x16xf32> to vector<32x1xf32>
    %322 = vector.extract_strided_slice %301 {offsets = [0, 0], sizes = [32, 15], strides = [1, 1]} : vector<32x16xf32> to vector<32x15xf32>
    %323 = tpu.concatenate %321, %322 in 1 : vector<32x1xf32>, vector<32x15xf32> -> vector<32x16xf32>
    %324 = vector.extract_strided_slice %302 {offsets = [3, 0], sizes = [1, 16], strides = [1, 1]} : vector<9x16xf32> to vector<1x16xf32>
    %325 = vector.broadcast %324 : vector<1x16xf32> to vector<32x16xf32>
    %326 = arith.mulf %323, %325 : vector<32x16xf32>
    %327 = vector.extract_strided_slice %301 {offsets = [0, 1], sizes = [32, 15], strides = [1, 1]} : vector<32x16xf32> to vector<32x15xf32>
    %328 = vector.extract_strided_slice %301 {offsets = [0, 0], sizes = [32, 1], strides = [1, 1]} : vector<32x16xf32> to vector<32x1xf32>
    %329 = tpu.concatenate %327, %328 in 1 : vector<32x15xf32>, vector<32x1xf32> -> vector<32x16xf32>
    %330 = vector.extract_strided_slice %302 {offsets = [5, 0], sizes = [1, 16], strides = [1, 1]} : vector<9x16xf32> to vector<1x16xf32>
    %331 = vector.broadcast %330 : vector<1x16xf32> to vector<32x16xf32>
    %332 = arith.mulf %329, %331 : vector<32x16xf32>
    %333 = vector.extract_strided_slice %301 {offsets = [0, 3], sizes = [32, 13], strides = [1, 1]} : vector<32x16xf32> to vector<32x13xf32>
    %334 = vector.extract_strided_slice %301 {offsets = [0, 0], sizes = [32, 3], strides = [1, 1]} : vector<32x16xf32> to vector<32x3xf32>
    %335 = tpu.concatenate %333, %334 in 1 : vector<32x13xf32>, vector<32x3xf32> -> vector<32x16xf32>
    %336 = vector.extract_strided_slice %302 {offsets = [6, 0], sizes = [1, 16], strides = [1, 1]} : vector<9x16xf32> to vector<1x16xf32>
    %337 = vector.broadcast %336 : vector<1x16xf32> to vector<32x16xf32>
    %338 = arith.mulf %335, %337 : vector<32x16xf32>
    %339 = vector.extract_strided_slice %301 {offsets = [0, 4], sizes = [32, 12], strides = [1, 1]} : vector<32x16xf32> to vector<32x12xf32>
    %340 = vector.extract_strided_slice %301 {offsets = [0, 0], sizes = [32, 4], strides = [1, 1]} : vector<32x16xf32> to vector<32x4xf32>
    %341 = tpu.concatenate %339, %340 in 1 : vector<32x12xf32>, vector<32x4xf32> -> vector<32x16xf32>
    %342 = vector.extract_strided_slice %302 {offsets = [7, 0], sizes = [1, 16], strides = [1, 1]} : vector<9x16xf32> to vector<1x16xf32>
    %343 = vector.broadcast %342 : vector<1x16xf32> to vector<32x16xf32>
    %344 = arith.mulf %341, %343 : vector<32x16xf32>
    %345 = vector.extract_strided_slice %301 {offsets = [0, 5], sizes = [32, 11], strides = [1, 1]} : vector<32x16xf32> to vector<32x11xf32>
    %346 = vector.extract_strided_slice %301 {offsets = [0, 0], sizes = [32, 5], strides = [1, 1]} : vector<32x16xf32> to vector<32x5xf32>
    %347 = tpu.concatenate %345, %346 in 1 : vector<32x11xf32>, vector<32x5xf32> -> vector<32x16xf32>
    %348 = vector.extract_strided_slice %302 {offsets = [8, 0], sizes = [1, 16], strides = [1, 1]} : vector<9x16xf32> to vector<1x16xf32>
    %349 = vector.broadcast %348 : vector<1x16xf32> to vector<32x16xf32>
    %350 = arith.mulf %347, %349 : vector<32x16xf32>
    %351 = tpu.concatenate %308, %314, %320, %326, %301, %332, %338, %344, %350 in 0 : vector<32x16xf32>, vector<32x16xf32>, vector<32x16xf32>, vector<32x16xf32>, vector<32x16xf32>, vector<32x16xf32>, vector<32x16xf32>, vector<32x16xf32>, vector<32x16xf32> -> vector<288x16xf32>
    %c0_53 = arith.constant 0 : index
    %c0_54 = arith.constant 0 : index
    %352 = vector.load %arg15[%c0_53, %c0_54] : memref<16x288xf32, #tpu.memory_space<vmem>>, vector<16x288xf32>
    %cst_55 = arith.constant dense<0.000000e+00> : vector<16x16xf32>
    %353 = tpu.matmul %352, %351, %cst_55 {dimension_numbers = #tpu.dot_dimension_numbers<[1], [0], [0], [1], [0, 0, 1, 1], [], []>} : vector<16x288xf32>, vector<288x16xf32>, vector<16x16xf32> -> vector<16x16xf32>
    %c0_56 = arith.constant 0 : index
    %c0_57 = arith.constant 0 : index
    %354 = vector.load %arg23[%c0_56, %c0_57] : memref<16x1xf32, #tpu.memory_space<vmem>>, vector<16x1xf32>
    %355 = vector.broadcast %354 : vector<16x1xf32> to vector<16x16xf32>
    %356 = arith.addf %353, %355 : vector<16x16xf32>
    %cst_58 = arith.constant 0.000000e+00 : f32
    %357 = vector.broadcast %cst_58 : f32 to vector<16x16xf32>
    %358 = arith.cmpf oge, %356, %357 : vector<16x16xf32>
    %cst_59 = arith.constant -2.000000e-01 : f32
    %359 = vector.broadcast %cst_59 : f32 to vector<16x16xf32>
    %360 = arith.mulf %359, %356 : vector<16x16xf32>
    %361 = arith.select %358, %356, %360 : vector<16x16xi1>, vector<16x16xf32>
    %c0_60 = arith.constant 0 : index
    %c0_61 = arith.constant 0 : index
    %362 = vector.load %arg5[%c0_60, %c0_61] : memref<9x16xf32, #tpu.memory_space<vmem>>, vector<9x16xf32>
    %363 = vector.extract_strided_slice %361 {offsets = [0, 11], sizes = [16, 5], strides = [1, 1]} : vector<16x16xf32> to vector<16x5xf32>
    %364 = vector.extract_strided_slice %361 {offsets = [0, 0], sizes = [16, 11], strides = [1, 1]} : vector<16x16xf32> to vector<16x11xf32>
    %365 = tpu.concatenate %363, %364 in 1 : vector<16x5xf32>, vector<16x11xf32> -> vector<16x16xf32>
    %366 = vector.extract_strided_slice %362 {offsets = [0, 0], sizes = [1, 16], strides = [1, 1]} : vector<9x16xf32> to vector<1x16xf32>
    %367 = vector.broadcast %366 : vector<1x16xf32> to vector<16x16xf32>
    %368 = arith.mulf %365, %367 : vector<16x16xf32>
    %369 = vector.extract_strided_slice %361 {offsets = [0, 12], sizes = [16, 4], strides = [1, 1]} : vector<16x16xf32> to vector<16x4xf32>
    %370 = vector.extract_strided_slice %361 {offsets = [0, 0], sizes = [16, 12], strides = [1, 1]} : vector<16x16xf32> to vector<16x12xf32>
    %371 = tpu.concatenate %369, %370 in 1 : vector<16x4xf32>, vector<16x12xf32> -> vector<16x16xf32>
    %372 = vector.extract_strided_slice %362 {offsets = [1, 0], sizes = [1, 16], strides = [1, 1]} : vector<9x16xf32> to vector<1x16xf32>
    %373 = vector.broadcast %372 : vector<1x16xf32> to vector<16x16xf32>
    %374 = arith.mulf %371, %373 : vector<16x16xf32>
    %375 = vector.extract_strided_slice %361 {offsets = [0, 13], sizes = [16, 3], strides = [1, 1]} : vector<16x16xf32> to vector<16x3xf32>
    %376 = vector.extract_strided_slice %361 {offsets = [0, 0], sizes = [16, 13], strides = [1, 1]} : vector<16x16xf32> to vector<16x13xf32>
    %377 = tpu.concatenate %375, %376 in 1 : vector<16x3xf32>, vector<16x13xf32> -> vector<16x16xf32>
    %378 = vector.extract_strided_slice %362 {offsets = [2, 0], sizes = [1, 16], strides = [1, 1]} : vector<9x16xf32> to vector<1x16xf32>
    %379 = vector.broadcast %378 : vector<1x16xf32> to vector<16x16xf32>
    %380 = arith.mulf %377, %379 : vector<16x16xf32>
    %381 = vector.extract_strided_slice %361 {offsets = [0, 15], sizes = [16, 1], strides = [1, 1]} : vector<16x16xf32> to vector<16x1xf32>
    %382 = vector.extract_strided_slice %361 {offsets = [0, 0], sizes = [16, 15], strides = [1, 1]} : vector<16x16xf32> to vector<16x15xf32>
    %383 = tpu.concatenate %381, %382 in 1 : vector<16x1xf32>, vector<16x15xf32> -> vector<16x16xf32>
    %384 = vector.extract_strided_slice %362 {offsets = [3, 0], sizes = [1, 16], strides = [1, 1]} : vector<9x16xf32> to vector<1x16xf32>
    %385 = vector.broadcast %384 : vector<1x16xf32> to vector<16x16xf32>
    %386 = arith.mulf %383, %385 : vector<16x16xf32>
    %387 = vector.extract_strided_slice %361 {offsets = [0, 1], sizes = [16, 15], strides = [1, 1]} : vector<16x16xf32> to vector<16x15xf32>
    %388 = vector.extract_strided_slice %361 {offsets = [0, 0], sizes = [16, 1], strides = [1, 1]} : vector<16x16xf32> to vector<16x1xf32>
    %389 = tpu.concatenate %387, %388 in 1 : vector<16x15xf32>, vector<16x1xf32> -> vector<16x16xf32>
    %390 = vector.extract_strided_slice %362 {offsets = [5, 0], sizes = [1, 16], strides = [1, 1]} : vector<9x16xf32> to vector<1x16xf32>
    %391 = vector.broadcast %390 : vector<1x16xf32> to vector<16x16xf32>
    %392 = arith.mulf %389, %391 : vector<16x16xf32>
    %393 = vector.extract_strided_slice %361 {offsets = [0, 3], sizes = [16, 13], strides = [1, 1]} : vector<16x16xf32> to vector<16x13xf32>
    %394 = vector.extract_strided_slice %361 {offsets = [0, 0], sizes = [16, 3], strides = [1, 1]} : vector<16x16xf32> to vector<16x3xf32>
    %395 = tpu.concatenate %393, %394 in 1 : vector<16x13xf32>, vector<16x3xf32> -> vector<16x16xf32>
    %396 = vector.extract_strided_slice %362 {offsets = [6, 0], sizes = [1, 16], strides = [1, 1]} : vector<9x16xf32> to vector<1x16xf32>
    %397 = vector.broadcast %396 : vector<1x16xf32> to vector<16x16xf32>
    %398 = arith.mulf %395, %397 : vector<16x16xf32>
    %399 = vector.extract_strided_slice %361 {offsets = [0, 4], sizes = [16, 12], strides = [1, 1]} : vector<16x16xf32> to vector<16x12xf32>
    %400 = vector.extract_strided_slice %361 {offsets = [0, 0], sizes = [16, 4], strides = [1, 1]} : vector<16x16xf32> to vector<16x4xf32>
    %401 = tpu.concatenate %399, %400 in 1 : vector<16x12xf32>, vector<16x4xf32> -> vector<16x16xf32>
    %402 = vector.extract_strided_slice %362 {offsets = [7, 0], sizes = [1, 16], strides = [1, 1]} : vector<9x16xf32> to vector<1x16xf32>
    %403 = vector.broadcast %402 : vector<1x16xf32> to vector<16x16xf32>
    %404 = arith.mulf %401, %403 : vector<16x16xf32>
    %405 = vector.extract_strided_slice %361 {offsets = [0, 5], sizes = [16, 11], strides = [1, 1]} : vector<16x16xf32> to vector<16x11xf32>
    %406 = vector.extract_strided_slice %361 {offsets = [0, 0], sizes = [16, 5], strides = [1, 1]} : vector<16x16xf32> to vector<16x5xf32>
    %407 = tpu.concatenate %405, %406 in 1 : vector<16x11xf32>, vector<16x5xf32> -> vector<16x16xf32>
    %408 = vector.extract_strided_slice %362 {offsets = [8, 0], sizes = [1, 16], strides = [1, 1]} : vector<9x16xf32> to vector<1x16xf32>
    %409 = vector.broadcast %408 : vector<1x16xf32> to vector<16x16xf32>
    %410 = arith.mulf %407, %409 : vector<16x16xf32>
    %411 = tpu.concatenate %368, %374, %380, %386, %361, %392, %398, %404, %410 in 0 : vector<16x16xf32>, vector<16x16xf32>, vector<16x16xf32>, vector<16x16xf32>, vector<16x16xf32>, vector<16x16xf32>, vector<16x16xf32>, vector<16x16xf32>, vector<16x16xf32> -> vector<144x16xf32>
    %c0_62 = arith.constant 0 : index
    %c0_63 = arith.constant 0 : index
    %412 = vector.load %arg16[%c0_62, %c0_63] : memref<16x144xf32, #tpu.memory_space<vmem>>, vector<16x144xf32>
    %cst_64 = arith.constant dense<0.000000e+00> : vector<16x16xf32>
    %413 = tpu.matmul %412, %411, %cst_64 {dimension_numbers = #tpu.dot_dimension_numbers<[1], [0], [0], [1], [0, 0, 1, 1], [], []>} : vector<16x144xf32>, vector<144x16xf32>, vector<16x16xf32> -> vector<16x16xf32>
    %c0_65 = arith.constant 0 : index
    %c0_66 = arith.constant 0 : index
    %414 = vector.load %arg24[%c0_65, %c0_66] : memref<16x1xf32, #tpu.memory_space<vmem>>, vector<16x1xf32>
    %415 = vector.broadcast %414 : vector<16x1xf32> to vector<16x16xf32>
    %416 = arith.addf %413, %415 : vector<16x16xf32>
    %cst_67 = arith.constant 0.000000e+00 : f32
    %417 = vector.broadcast %cst_67 : f32 to vector<16x16xf32>
    %418 = arith.cmpf oge, %416, %417 : vector<16x16xf32>
    %cst_68 = arith.constant -2.000000e-01 : f32
    %419 = vector.broadcast %cst_68 : f32 to vector<16x16xf32>
    %420 = arith.mulf %419, %416 : vector<16x16xf32>
    %421 = arith.select %418, %416, %420 : vector<16x16xi1>, vector<16x16xf32>
    %c0_69 = arith.constant 0 : index
    %c0_70 = arith.constant 0 : index
    %422 = vector.load %arg8[%c0_69, %c0_70] : memref<16x64xf32, #tpu.memory_space<vmem>>, vector<16x64xf32>
    %cst_71 = arith.constant dense<0.000000e+00> : vector<16x64xf32>
    %423 = tpu.matmul %421, %422, %cst_71 {dimension_numbers = #tpu.dot_dimension_numbers<[1], [0], [0], [1], [0, 0, 1, 1], [], []>} : vector<16x16xf32>, vector<16x64xf32>, vector<16x64xf32> -> vector<16x64xf32>
    %c0_72 = arith.constant 0 : index
    %c0_73 = arith.constant 0 : index
    %424 = vector.load %arg4[%c0_72, %c0_73] : memref<9x64xf32, #tpu.memory_space<vmem>>, vector<9x64xf32>
    %425 = vector.extract_strided_slice %423 {offsets = [0, 55], sizes = [16, 9], strides = [1, 1]} : vector<16x64xf32> to vector<16x9xf32>
    %426 = vector.extract_strided_slice %423 {offsets = [0, 0], sizes = [16, 55], strides = [1, 1]} : vector<16x64xf32> to vector<16x55xf32>
    %427 = tpu.concatenate %425, %426 in 1 : vector<16x9xf32>, vector<16x55xf32> -> vector<16x64xf32>
    %428 = vector.extract_strided_slice %424 {offsets = [0, 0], sizes = [1, 64], strides = [1, 1]} : vector<9x64xf32> to vector<1x64xf32>
    %429 = vector.broadcast %428 : vector<1x64xf32> to vector<16x64xf32>
    %430 = arith.mulf %427, %429 : vector<16x64xf32>
    %431 = vector.extract_strided_slice %423 {offsets = [0, 56], sizes = [16, 8], strides = [1, 1]} : vector<16x64xf32> to vector<16x8xf32>
    %432 = vector.extract_strided_slice %423 {offsets = [0, 0], sizes = [16, 56], strides = [1, 1]} : vector<16x64xf32> to vector<16x56xf32>
    %433 = tpu.concatenate %431, %432 in 1 : vector<16x8xf32>, vector<16x56xf32> -> vector<16x64xf32>
    %434 = vector.extract_strided_slice %424 {offsets = [1, 0], sizes = [1, 64], strides = [1, 1]} : vector<9x64xf32> to vector<1x64xf32>
    %435 = vector.broadcast %434 : vector<1x64xf32> to vector<16x64xf32>
    %436 = arith.mulf %433, %435 : vector<16x64xf32>
    %437 = vector.extract_strided_slice %423 {offsets = [0, 57], sizes = [16, 7], strides = [1, 1]} : vector<16x64xf32> to vector<16x7xf32>
    %438 = vector.extract_strided_slice %423 {offsets = [0, 0], sizes = [16, 57], strides = [1, 1]} : vector<16x64xf32> to vector<16x57xf32>
    %439 = tpu.concatenate %437, %438 in 1 : vector<16x7xf32>, vector<16x57xf32> -> vector<16x64xf32>
    %440 = vector.extract_strided_slice %424 {offsets = [2, 0], sizes = [1, 64], strides = [1, 1]} : vector<9x64xf32> to vector<1x64xf32>
    %441 = vector.broadcast %440 : vector<1x64xf32> to vector<16x64xf32>
    %442 = arith.mulf %439, %441 : vector<16x64xf32>
    %443 = vector.extract_strided_slice %423 {offsets = [0, 63], sizes = [16, 1], strides = [1, 1]} : vector<16x64xf32> to vector<16x1xf32>
    %444 = vector.extract_strided_slice %423 {offsets = [0, 0], sizes = [16, 63], strides = [1, 1]} : vector<16x64xf32> to vector<16x63xf32>
    %445 = tpu.concatenate %443, %444 in 1 : vector<16x1xf32>, vector<16x63xf32> -> vector<16x64xf32>
    %446 = vector.extract_strided_slice %424 {offsets = [3, 0], sizes = [1, 64], strides = [1, 1]} : vector<9x64xf32> to vector<1x64xf32>
    %447 = vector.broadcast %446 : vector<1x64xf32> to vector<16x64xf32>
    %448 = arith.mulf %445, %447 : vector<16x64xf32>
    %449 = vector.extract_strided_slice %423 {offsets = [0, 1], sizes = [16, 63], strides = [1, 1]} : vector<16x64xf32> to vector<16x63xf32>
    %450 = vector.extract_strided_slice %423 {offsets = [0, 0], sizes = [16, 1], strides = [1, 1]} : vector<16x64xf32> to vector<16x1xf32>
    %451 = tpu.concatenate %449, %450 in 1 : vector<16x63xf32>, vector<16x1xf32> -> vector<16x64xf32>
    %452 = vector.extract_strided_slice %424 {offsets = [5, 0], sizes = [1, 64], strides = [1, 1]} : vector<9x64xf32> to vector<1x64xf32>
    %453 = vector.broadcast %452 : vector<1x64xf32> to vector<16x64xf32>
    %454 = arith.mulf %451, %453 : vector<16x64xf32>
    %455 = vector.extract_strided_slice %423 {offsets = [0, 7], sizes = [16, 57], strides = [1, 1]} : vector<16x64xf32> to vector<16x57xf32>
    %456 = vector.extract_strided_slice %423 {offsets = [0, 0], sizes = [16, 7], strides = [1, 1]} : vector<16x64xf32> to vector<16x7xf32>
    %457 = tpu.concatenate %455, %456 in 1 : vector<16x57xf32>, vector<16x7xf32> -> vector<16x64xf32>
    %458 = vector.extract_strided_slice %424 {offsets = [6, 0], sizes = [1, 64], strides = [1, 1]} : vector<9x64xf32> to vector<1x64xf32>
    %459 = vector.broadcast %458 : vector<1x64xf32> to vector<16x64xf32>
    %460 = arith.mulf %457, %459 : vector<16x64xf32>
    %461 = vector.extract_strided_slice %423 {offsets = [0, 8], sizes = [16, 56], strides = [1, 1]} : vector<16x64xf32> to vector<16x56xf32>
    %462 = vector.extract_strided_slice %423 {offsets = [0, 0], sizes = [16, 8], strides = [1, 1]} : vector<16x64xf32> to vector<16x8xf32>
    %463 = tpu.concatenate %461, %462 in 1 : vector<16x56xf32>, vector<16x8xf32> -> vector<16x64xf32>
    %464 = vector.extract_strided_slice %424 {offsets = [7, 0], sizes = [1, 64], strides = [1, 1]} : vector<9x64xf32> to vector<1x64xf32>
    %465 = vector.broadcast %464 : vector<1x64xf32> to vector<16x64xf32>
    %466 = arith.mulf %463, %465 : vector<16x64xf32>
    %467 = vector.extract_strided_slice %423 {offsets = [0, 9], sizes = [16, 55], strides = [1, 1]} : vector<16x64xf32> to vector<16x55xf32>
    %468 = vector.extract_strided_slice %423 {offsets = [0, 0], sizes = [16, 9], strides = [1, 1]} : vector<16x64xf32> to vector<16x9xf32>
    %469 = tpu.concatenate %467, %468 in 1 : vector<16x55xf32>, vector<16x9xf32> -> vector<16x64xf32>
    %470 = vector.extract_strided_slice %424 {offsets = [8, 0], sizes = [1, 64], strides = [1, 1]} : vector<9x64xf32> to vector<1x64xf32>
    %471 = vector.broadcast %470 : vector<1x64xf32> to vector<16x64xf32>
    %472 = arith.mulf %469, %471 : vector<16x64xf32>
    %473 = tpu.concatenate %430, %436, %442, %448, %423, %454, %460, %466, %472 in 0 : vector<16x64xf32>, vector<16x64xf32>, vector<16x64xf32>, vector<16x64xf32>, vector<16x64xf32>, vector<16x64xf32>, vector<16x64xf32>, vector<16x64xf32>, vector<16x64xf32> -> vector<144x64xf32>
    %c0_74 = arith.constant 0 : index
    %c0_75 = arith.constant 0 : index
    %474 = vector.load %arg17[%c0_74, %c0_75] : memref<8x144xf32, #tpu.memory_space<vmem>>, vector<8x144xf32>
    %cst_76 = arith.constant dense<0.000000e+00> : vector<8x64xf32>
    %475 = tpu.matmul %474, %473, %cst_76 {dimension_numbers = #tpu.dot_dimension_numbers<[1], [0], [0], [1], [0, 0, 1, 1], [], []>} : vector<8x144xf32>, vector<144x64xf32>, vector<8x64xf32> -> vector<8x64xf32>
    %c0_77 = arith.constant 0 : index
    %c0_78 = arith.constant 0 : index
    %476 = vector.load %arg25[%c0_77, %c0_78] : memref<8x1xf32, #tpu.memory_space<vmem>>, vector<8x1xf32>
    %477 = vector.broadcast %476 : vector<8x1xf32> to vector<8x64xf32>
    %478 = arith.addf %475, %477 : vector<8x64xf32>
    %cst_79 = arith.constant 0.000000e+00 : f32
    %479 = vector.broadcast %cst_79 : f32 to vector<8x64xf32>
    %480 = arith.cmpf oge, %478, %479 : vector<8x64xf32>
    %cst_80 = arith.constant -2.000000e-01 : f32
    %481 = vector.broadcast %cst_80 : f32 to vector<8x64xf32>
    %482 = arith.mulf %481, %478 : vector<8x64xf32>
    %483 = arith.select %480, %478, %482 : vector<8x64xi1>, vector<8x64xf32>
    %c0_81 = arith.constant 0 : index
    %c0_82 = arith.constant 0 : index
    %484 = vector.load %arg4[%c0_81, %c0_82] : memref<9x64xf32, #tpu.memory_space<vmem>>, vector<9x64xf32>
    %485 = vector.extract_strided_slice %483 {offsets = [0, 55], sizes = [8, 9], strides = [1, 1]} : vector<8x64xf32> to vector<8x9xf32>
    %486 = vector.extract_strided_slice %483 {offsets = [0, 0], sizes = [8, 55], strides = [1, 1]} : vector<8x64xf32> to vector<8x55xf32>
    %487 = tpu.concatenate %485, %486 in 1 : vector<8x9xf32>, vector<8x55xf32> -> vector<8x64xf32>
    %488 = vector.extract_strided_slice %484 {offsets = [0, 0], sizes = [1, 64], strides = [1, 1]} : vector<9x64xf32> to vector<1x64xf32>
    %489 = vector.broadcast %488 : vector<1x64xf32> to vector<8x64xf32>
    %490 = arith.mulf %487, %489 : vector<8x64xf32>
    %491 = vector.extract_strided_slice %483 {offsets = [0, 56], sizes = [8, 8], strides = [1, 1]} : vector<8x64xf32> to vector<8x8xf32>
    %492 = vector.extract_strided_slice %483 {offsets = [0, 0], sizes = [8, 56], strides = [1, 1]} : vector<8x64xf32> to vector<8x56xf32>
    %493 = tpu.concatenate %491, %492 in 1 : vector<8x8xf32>, vector<8x56xf32> -> vector<8x64xf32>
    %494 = vector.extract_strided_slice %484 {offsets = [1, 0], sizes = [1, 64], strides = [1, 1]} : vector<9x64xf32> to vector<1x64xf32>
    %495 = vector.broadcast %494 : vector<1x64xf32> to vector<8x64xf32>
    %496 = arith.mulf %493, %495 : vector<8x64xf32>
    %497 = vector.extract_strided_slice %483 {offsets = [0, 57], sizes = [8, 7], strides = [1, 1]} : vector<8x64xf32> to vector<8x7xf32>
    %498 = vector.extract_strided_slice %483 {offsets = [0, 0], sizes = [8, 57], strides = [1, 1]} : vector<8x64xf32> to vector<8x57xf32>
    %499 = tpu.concatenate %497, %498 in 1 : vector<8x7xf32>, vector<8x57xf32> -> vector<8x64xf32>
    %500 = vector.extract_strided_slice %484 {offsets = [2, 0], sizes = [1, 64], strides = [1, 1]} : vector<9x64xf32> to vector<1x64xf32>
    %501 = vector.broadcast %500 : vector<1x64xf32> to vector<8x64xf32>
    %502 = arith.mulf %499, %501 : vector<8x64xf32>
    %503 = vector.extract_strided_slice %483 {offsets = [0, 63], sizes = [8, 1], strides = [1, 1]} : vector<8x64xf32> to vector<8x1xf32>
    %504 = vector.extract_strided_slice %483 {offsets = [0, 0], sizes = [8, 63], strides = [1, 1]} : vector<8x64xf32> to vector<8x63xf32>
    %505 = tpu.concatenate %503, %504 in 1 : vector<8x1xf32>, vector<8x63xf32> -> vector<8x64xf32>
    %506 = vector.extract_strided_slice %484 {offsets = [3, 0], sizes = [1, 64], strides = [1, 1]} : vector<9x64xf32> to vector<1x64xf32>
    %507 = vector.broadcast %506 : vector<1x64xf32> to vector<8x64xf32>
    %508 = arith.mulf %505, %507 : vector<8x64xf32>
    %509 = vector.extract_strided_slice %483 {offsets = [0, 1], sizes = [8, 63], strides = [1, 1]} : vector<8x64xf32> to vector<8x63xf32>
    %510 = vector.extract_strided_slice %483 {offsets = [0, 0], sizes = [8, 1], strides = [1, 1]} : vector<8x64xf32> to vector<8x1xf32>
    %511 = tpu.concatenate %509, %510 in 1 : vector<8x63xf32>, vector<8x1xf32> -> vector<8x64xf32>
    %512 = vector.extract_strided_slice %484 {offsets = [5, 0], sizes = [1, 64], strides = [1, 1]} : vector<9x64xf32> to vector<1x64xf32>
    %513 = vector.broadcast %512 : vector<1x64xf32> to vector<8x64xf32>
    %514 = arith.mulf %511, %513 : vector<8x64xf32>
    %515 = vector.extract_strided_slice %483 {offsets = [0, 7], sizes = [8, 57], strides = [1, 1]} : vector<8x64xf32> to vector<8x57xf32>
    %516 = vector.extract_strided_slice %483 {offsets = [0, 0], sizes = [8, 7], strides = [1, 1]} : vector<8x64xf32> to vector<8x7xf32>
    %517 = tpu.concatenate %515, %516 in 1 : vector<8x57xf32>, vector<8x7xf32> -> vector<8x64xf32>
    %518 = vector.extract_strided_slice %484 {offsets = [6, 0], sizes = [1, 64], strides = [1, 1]} : vector<9x64xf32> to vector<1x64xf32>
    %519 = vector.broadcast %518 : vector<1x64xf32> to vector<8x64xf32>
    %520 = arith.mulf %517, %519 : vector<8x64xf32>
    %521 = vector.extract_strided_slice %483 {offsets = [0, 8], sizes = [8, 56], strides = [1, 1]} : vector<8x64xf32> to vector<8x56xf32>
    %522 = vector.extract_strided_slice %483 {offsets = [0, 0], sizes = [8, 8], strides = [1, 1]} : vector<8x64xf32> to vector<8x8xf32>
    %523 = tpu.concatenate %521, %522 in 1 : vector<8x56xf32>, vector<8x8xf32> -> vector<8x64xf32>
    %524 = vector.extract_strided_slice %484 {offsets = [7, 0], sizes = [1, 64], strides = [1, 1]} : vector<9x64xf32> to vector<1x64xf32>
    %525 = vector.broadcast %524 : vector<1x64xf32> to vector<8x64xf32>
    %526 = arith.mulf %523, %525 : vector<8x64xf32>
    %527 = vector.extract_strided_slice %483 {offsets = [0, 9], sizes = [8, 55], strides = [1, 1]} : vector<8x64xf32> to vector<8x55xf32>
    %528 = vector.extract_strided_slice %483 {offsets = [0, 0], sizes = [8, 9], strides = [1, 1]} : vector<8x64xf32> to vector<8x9xf32>
    %529 = tpu.concatenate %527, %528 in 1 : vector<8x55xf32>, vector<8x9xf32> -> vector<8x64xf32>
    %530 = vector.extract_strided_slice %484 {offsets = [8, 0], sizes = [1, 64], strides = [1, 1]} : vector<9x64xf32> to vector<1x64xf32>
    %531 = vector.broadcast %530 : vector<1x64xf32> to vector<8x64xf32>
    %532 = arith.mulf %529, %531 : vector<8x64xf32>
    %533 = tpu.concatenate %490, %496, %502, %508, %483, %514, %520, %526, %532 in 0 : vector<8x64xf32>, vector<8x64xf32>, vector<8x64xf32>, vector<8x64xf32>, vector<8x64xf32>, vector<8x64xf32>, vector<8x64xf32>, vector<8x64xf32>, vector<8x64xf32> -> vector<72x64xf32>
    %c0_83 = arith.constant 0 : index
    %c0_84 = arith.constant 0 : index
    %534 = vector.load %arg18[%c0_83, %c0_84] : memref<8x72xf32, #tpu.memory_space<vmem>>, vector<8x72xf32>
    %cst_85 = arith.constant dense<0.000000e+00> : vector<8x64xf32>
    %535 = tpu.matmul %534, %533, %cst_85 {dimension_numbers = #tpu.dot_dimension_numbers<[1], [0], [0], [1], [0, 0, 1, 1], [], []>} : vector<8x72xf32>, vector<72x64xf32>, vector<8x64xf32> -> vector<8x64xf32>
    %c0_86 = arith.constant 0 : index
    %c0_87 = arith.constant 0 : index
    %536 = vector.load %arg26[%c0_86, %c0_87] : memref<8x1xf32, #tpu.memory_space<vmem>>, vector<8x1xf32>
    %537 = vector.broadcast %536 : vector<8x1xf32> to vector<8x64xf32>
    %538 = arith.addf %535, %537 : vector<8x64xf32>
    %cst_88 = arith.constant 0.000000e+00 : f32
    %539 = vector.broadcast %cst_88 : f32 to vector<8x64xf32>
    %540 = arith.cmpf oge, %538, %539 : vector<8x64xf32>
    %cst_89 = arith.constant -2.000000e-01 : f32
    %541 = vector.broadcast %cst_89 : f32 to vector<8x64xf32>
    %542 = arith.mulf %541, %538 : vector<8x64xf32>
    %543 = arith.select %540, %538, %542 : vector<8x64xi1>, vector<8x64xf32>
    %c0_90 = arith.constant 0 : index
    %c0_91 = arith.constant 0 : index
    %544 = vector.load %arg9[%c0_90, %c0_91] : memref<64x256xf32, #tpu.memory_space<vmem>>, vector<64x256xf32>
    %cst_92 = arith.constant dense<0.000000e+00> : vector<8x256xf32>
    %545 = tpu.matmul %543, %544, %cst_92 {dimension_numbers = #tpu.dot_dimension_numbers<[1], [0], [0], [1], [0, 0, 1, 1], [], []>} : vector<8x64xf32>, vector<64x256xf32>, vector<8x256xf32> -> vector<8x256xf32>
    %c0_93 = arith.constant 0 : index
    %c0_94 = arith.constant 0 : index
    %c0_95 = arith.constant 0 : index
    %546 = vector.load %arg27[%c0_93, %c0_94, %c0_95] : memref<1x8x256xf32, #tpu.memory_space<vmem>>, vector<1x8x256xf32>
    %547 = vector.shape_cast %546 : vector<1x8x256xf32> to vector<8x256xf32>
    %548 = vector.shape_cast %545 : vector<8x256xf32> to vector<1x8x256xf32>
    tpu.vector_store %arg27[%c0_93, %c0_94, %c0_95], %548 {strides = array<i32>} : memref<1x8x256xf32, #tpu.memory_space<vmem>>, vector<1x8x256xf32>,
    return
  }
  func.func @transform_0(%arg0: i32) -> (i32, i32, i32) {
    %c0_i32 = arith.constant 0 : i32
    %c0_i32_0 = arith.constant 0 : i32
    %c0_i32_1 = arith.constant 0 : i32
    return %arg0, %c0_i32, %c0_i32_0 : i32, i32, i32
  }
  func.func @transform_1(%arg0: i32) -> (i32, i32, i32) {
    %c0_i32 = arith.constant 0 : i32
    %c0_i32_0 = arith.constant 0 : i32
    %c0_i32_1 = arith.constant 0 : i32
    return %arg0, %c0_i32, %c0_i32_0 : i32, i32, i32
  }
  func.func @transform_2(%arg0: i32) -> (i32, i32) {
    %c0_i32 = arith.constant 0 : i32
    %c0_i32_0 = arith.constant 0 : i32
    %c0_i32_1 = arith.constant 0 : i32
    return %c0_i32, %c0_i32_0 : i32, i32
  }
  func.func @transform_3(%arg0: i32) -> (i32, i32) {
    %c0_i32 = arith.constant 0 : i32
    %c0_i32_0 = arith.constant 0 : i32
    %c0_i32_1 = arith.constant 0 : i32
    return %c0_i32, %c0_i32_0 : i32, i32
  }
  func.func @transform_4(%arg0: i32) -> (i32, i32) {
    %c0_i32 = arith.constant 0 : i32
    %c0_i32_0 = arith.constant 0 : i32
    %c0_i32_1 = arith.constant 0 : i32
    return %c0_i32, %c0_i32_0 : i32, i32
  }
  func.func @transform_5(%arg0: i32) -> (i32, i32) {
    %c0_i32 = arith.constant 0 : i32
    %c0_i32_0 = arith.constant 0 : i32
    %c0_i32_1 = arith.constant 0 : i32
    return %c0_i32, %c0_i32_0 : i32, i32
  }
  func.func @transform_6(%arg0: i32) -> (i32, i32) {
    %c0_i32 = arith.constant 0 : i32
    %c0_i32_0 = arith.constant 0 : i32
    %c0_i32_1 = arith.constant 0 : i32
    return %c0_i32, %c0_i32_0 : i32, i32
  }
  func.func @transform_7(%arg0: i32) -> (i32, i32) {
    %c0_i32 = arith.constant 0 : i32
    %c0_i32_0 = arith.constant 0 : i32
    %c0_i32_1 = arith.constant 0 : i32
    return %c0_i32, %c0_i32_0 : i32, i32
  }
  func.func @transform_8(%arg0: i32) -> (i32, i32) {
    %c0_i32 = arith.constant 0 : i32
    %c0_i32_0 = arith.constant 0 : i32
    %c0_i32_1 = arith.constant 0 : i32
    return %c0_i32, %c0_i32_0 : i32, i32
  }
  func.func @transform_9(%arg0: i32) -> (i32, i32) {
    %c0_i32 = arith.constant 0 : i32
    %c0_i32_0 = arith.constant 0 : i32
    %c0_i32_1 = arith.constant 0 : i32
    return %c0_i32, %c0_i32_0 : i32, i32
  }
  func.func @transform_10(%arg0: i32) -> (i32, i32) {
    %c0_i32 = arith.constant 0 : i32
    %c0_i32_0 = arith.constant 0 : i32
    %c0_i32_1 = arith.constant 0 : i32
    return %c0_i32, %c0_i32_0 : i32, i32
  }
  func.func @transform_11(%arg0: i32) -> (i32, i32) {
    %c0_i32 = arith.constant 0 : i32
    %c0_i32_0 = arith.constant 0 : i32
    %c0_i32_1 = arith.constant 0 : i32
    return %c0_i32, %c0_i32_0 : i32, i32
  }
  func.func @transform_12(%arg0: i32) -> (i32, i32) {
    %c0_i32 = arith.constant 0 : i32
    %c0_i32_0 = arith.constant 0 : i32
    %c0_i32_1 = arith.constant 0 : i32
    return %c0_i32, %c0_i32_0 : i32, i32
  }
  func.func @transform_13(%arg0: i32) -> (i32, i32) {
    %c0_i32 = arith.constant 0 : i32
    %c0_i32_0 = arith.constant 0 : i32
    %c0_i32_1 = arith.constant 0 : i32
    return %c0_i32, %c0_i32_0 : i32, i32
  }
  func.func @transform_14(%arg0: i32) -> (i32, i32) {
    %c0_i32 = arith.constant 0 : i32
    %c0_i32_0 = arith.constant 0 : i32
    %c0_i32_1 = arith.constant 0 : i32
    return %c0_i32, %c0_i32_0 : i32, i32
  }
  func.func @transform_15(%arg0: i32) -> (i32, i32) {
    %c0_i32 = arith.constant 0 : i32
    %c0_i32_0 = arith.constant 0 : i32
    %c0_i32_1 = arith.constant 0 : i32
    return %c0_i32, %c0_i32_0 : i32, i32
  }
  func.func @transform_16(%arg0: i32) -> (i32, i32) {
    %c0_i32 = arith.constant 0 : i32
    %c0_i32_0 = arith.constant 0 : i32
    %c0_i32_1 = arith.constant 0 : i32
    return %c0_i32, %c0_i32_0 : i32, i32
  }
  func.func @transform_17(%arg0: i32) -> (i32, i32) {
    %c0_i32 = arith.constant 0 : i32
    %c0_i32_0 = arith.constant 0 : i32
    %c0_i32_1 = arith.constant 0 : i32
    return %c0_i32, %c0_i32_0 : i32, i32
  }
  func.func @transform_18(%arg0: i32) -> (i32, i32) {
    %c0_i32 = arith.constant 0 : i32
    %c0_i32_0 = arith.constant 0 : i32
    %c0_i32_1 = arith.constant 0 : i32
    return %c0_i32, %c0_i32_0 : i32, i32
  }
  func.func @transform_19(%arg0: i32) -> (i32, i32) {
    %c0_i32 = arith.constant 0 : i32
    %c0_i32_0 = arith.constant 0 : i32
    %c0_i32_1 = arith.constant 0 : i32
    return %c0_i32, %c0_i32_0 : i32, i32
  }
  func.func @transform_20(%arg0: i32) -> (i32, i32) {
    %c0_i32 = arith.constant 0 : i32
    %c0_i32_0 = arith.constant 0 : i32
    %c0_i32_1 = arith.constant 0 : i32
    return %c0_i32, %c0_i32_0 : i32, i32
  }
  func.func @transform_21(%arg0: i32) -> (i32, i32) {
    %c0_i32 = arith.constant 0 : i32
    %c0_i32_0 = arith.constant 0 : i32
    %c0_i32_1 = arith.constant 0 : i32
    return %c0_i32, %c0_i32_0 : i32, i32
  }
  func.func @transform_22(%arg0: i32) -> (i32, i32) {
    %c0_i32 = arith.constant 0 : i32
    %c0_i32_0 = arith.constant 0 : i32
    %c0_i32_1 = arith.constant 0 : i32
    return %c0_i32, %c0_i32_0 : i32, i32
  }
  func.func @transform_23(%arg0: i32) -> (i32, i32) {
    %c0_i32 = arith.constant 0 : i32
    %c0_i32_0 = arith.constant 0 : i32
    %c0_i32_1 = arith.constant 0 : i32
    return %c0_i32, %c0_i32_0 : i32, i32
  }
  func.func @transform_24(%arg0: i32) -> (i32, i32) {
    %c0_i32 = arith.constant 0 : i32
    %c0_i32_0 = arith.constant 0 : i32
    %c0_i32_1 = arith.constant 0 : i32
    return %c0_i32, %c0_i32_0 : i32, i32
  }
  func.func @transform_25(%arg0: i32) -> (i32, i32) {
    %c0_i32 = arith.constant 0 : i32
    %c0_i32_0 = arith.constant 0 : i32
    %c0_i32_1 = arith.constant 0 : i32
    return %c0_i32, %c0_i32_0 : i32, i32
  }
  func.func @transform_26(%arg0: i32) -> (i32, i32, i32) {
    %c0_i32 = arith.constant 0 : i32
    %c0_i32_0 = arith.constant 0 : i32
    %c0_i32_1 = arith.constant 0 : i32
    return %arg0, %c0_i32, %c0_i32_0 : i32, i32, i32
  }
}

</mosaic_0001>

<bundles_post_ra>
// kernel: tpu_custom_call.1
= control target key start
LH: loop header
LB: loop body
LE: loop exit
PB: predicated region body
PF: predicated region fallthrough
CT: control target
= control target key end

     0   :  { %s6636_s0 = inlined_call_operand.vmem [shape: f32[2,3,256], index: 0, kind: input, shape index: {}]   ;;  %s6637_s1 = inlined_call_operand.vmem [shape: f32[2,8,1], index: 1, kind: input, shape index: {}]   ;;  %s6638_s2 = inlined_call_operand.vmem [shape: f32[9,256], index: 2, kind: input, shape index: {}]   ;;  %s6639_s3 = inlined_call_operand.vmem [shape: f32[9,64], index: 3, kind: input, shape index: {}]   ;;  %s6640_s4 = inlined_call_operand.vmem [shape: f32[9,16], index: 4, kind: input, shape index: {}]   ;;  %s6641_s5 = inlined_call_operand.vmem [shape: f32[256,64], index: 5, kind: input, shape index: {}]   ;;  %s6642_s6 = inlined_call_operand.vmem [shape: f32[64,16], index: 6, kind: input, shape index: {}]   ;;  %s6643_s7 = inlined_call_operand.vmem [shape: f32[16,64], index: 7, kind: input, shape index: {}]   ;;  %s6644_s8 = inlined_call_operand.vmem [shape: f32[64,256], index: 8, kind: input, shape index: {}]   ;;  %s6645_s9 = inlined_call_operand.vmem [shape: f32[8,27], index: 9, kind: input, shape index: {}]   ;;  %s6646_s10 = inlined_call_operand.vmem [shape: f32[16,72], index: 10, kind: input, shape index: {}]   ;;  %s6647_s11 = inlined_call_operand.vmem [shape: f32[16,144], index: 11, kind: input, shape index: {}]   ;;  %s6648_s12 = inlined_call_operand.vmem [shape: f32[32,144], index: 12, kind: input, shape index: {}]   ;;  %s6649_s13 = inlined_call_operand.vmem [shape: f32[32,288], index: 13, kind: input, shape index: {}]   ;;  %s6650_s14 = inlined_call_operand.vmem [shape: f32[16,288], index: 14, kind: input, shape index: {}]   ;;  %s6651_s15 = inlined_call_operand.vmem [shape: f32[16,144], index: 15, kind: input, shape index: {}]   ;;  %s6652_s16 = inlined_call_operand.vmem [shape: f32[8,144], index: 16, kind: input, shape index: {}]   ;;  %s6653_s17 = inlined_call_operand.vmem [shape: f32[8,72], index: 17, kind: input, shape index: {}]   ;;  %s6654_s18 = inlined_call_operand.vmem [shape: f32[16,1], index: 18, kind: input, shape index: {}]   ;;  %s6655_s19 = inlined_call_operand.vmem [shape: f32[16,1], index: 19, kind: input, shape index: {}]   ;;  %s6656_s20 = inlined_call_operand.vmem [shape: f32[32,1], index: 20, kind: input, shape index: {}]   ;;  %s6657_s21 = inlined_call_operand.vmem [shape: f32[32,1], index: 21, kind: input, shape index: {}]   ;;  %s6658_s22 = inlined_call_operand.vmem [shape: f32[16,1], index: 22, kind: input, shape index: {}]   ;;  %s6659_s23 = inlined_call_operand.vmem [shape: f32[16,1], index: 23, kind: input, shape index: {}]   ;;  %s6660_s24 = inlined_call_operand.vmem [shape: f32[8,1], index: 24, kind: input, shape index: {}]   ;;  %s6661_s25 = inlined_call_operand.vmem [shape: f32[8,1], index: 25, kind: input, shape index: {}]   ;;  %s6662_s26 = inlined_call_operand.hbm [shape: f32[2,8,256], index: 26, kind: output, shape index: {}]  }
   0x1   :  { %6763 = sst [smem:[#allocation14_spill]] %s6636_s0 }
   0x2   :  { %6764 = sst [smem:[#allocation15_spill]] %s6637_s1 }
   0x3   :  { %6765 = sst [smem:[#allocation16_spill]] %s6638_s2 }
   0x4   :  { %6766 = sst [smem:[#allocation17_spill]] %s6639_s3 }
   0x5   :  { %6767 = sst [smem:[#allocation18_spill]] %s6640_s4 }
   0x6   :  { %6768 = sst [smem:[#allocation19_spill]] %s6641_s5 }
   0x7   :  { %6769 = sst [smem:[#allocation20_spill]] %s6642_s6 }
   0x8   :  { %6770 = sst [smem:[#allocation21_spill]] %s6643_s7 }
   0x9   :  { %6771 = sst [smem:[#allocation22_spill]] %s6644_s8 }
   0xa   :  { %6772 = sst [smem:[#allocation23_spill]] %s6645_s9 }
   0xb   :  { %6773 = sst [smem:[#allocation24_spill]] %s6646_s10 }
   0xc   :  { %6774 = sst [smem:[#allocation25_spill]] %s6647_s11 }
   0xd   :  { %6775 = sst [smem:[#allocation26_spill]] %s6648_s12 }
   0xe   :  { %6776 = sst [smem:[#allocation27_spill]] %s6649_s13 }
   0xf   :  { %6777 = sst [smem:[#allocation28_spill]] %s6652_s16 }
  0x10   :  { %6778 = sst [smem:[#allocation29_spill]] %s6653_s17 }
  0x11   :  { %6779 = sst [smem:[#allocation30_spill]] %s6654_s18 }
  0x12   :  { %6780 = sst [smem:[#allocation31_spill]] %s6655_s19 }
  0x13   :  { %6781 = sst [smem:[#allocation32_spill]] %s6656_s20 }
  0x14   :  { %6782 = sst [smem:[#allocation33_spill]] %s6657_s21 }
  0x15   :  { %6783 = sst [smem:[#allocation34_spill]] %s6658_s22 }
  0x16   :  { %6784 = sst [smem:[#allocation35_spill]] %s6660_s24 }
  0x17   :  { %6785 = sst [smem:[#allocation36_spill]] %s6661_s25 }
  0x18   :  { %6786 = sst [smem:[#allocation37_spill]] %s6662_s26 }
  0x19   :  { %31 = vsyncpa [#allocation3], 0 }
  0x1a   :  { %33 = vsyncpa [#allocation3 + $0x1], 0  ;;  %s4871_s27 = smov 0   ;;  %s4873_s3 = smov 0  }
  0x1b   :  { %s4875_s7 = smov 0   ;;  %s4877_s28 = smov 0  }
  0x1c LB: > { %6787 = sst [smem:[#allocation5_spill]] %s4682_s27  ;;  %s4892_s8 = sadd.s32 4294967295, %s4694_s28   ;;  %s4694_s28 = sphi %s4877_s28, %s6876_s28   ;;  %s4690_s7 = sphi %s4875_s7, %s6879_s7   ;;  %s4686_s3 = sphi %s4873_s3, %s6878_s3   ;;  %s4682_s27 = sphi %s4871_s27, %s6877_s27  }
  0x1d   : > { %6788 = sst [smem:[#allocation6_spill]] %s4686_s3  ;;  %s3964_s4 = sadd.s32 4294967294, %s4694_s28  }
  0x1e   : > { %6789 = sst [smem:[#allocation7_spill]] %s4690_s7  ;;  %s4896_s29 = sadd.s32 1, %s4694_s28  }
  0x1f   : > { %6790 = sst [smem:[#allocation8_spill]] %s4694_s28  ;;  %s602_s0 = sadd.s32 1, %s4690_s7 }
  0x20   : > { %6791 = sst [smem:[#allocation9_spill]] %s4892_s8  ;;  %s599_s9 = ssub.s32 %s4694_s28, %s4896_s29 }
  0x21   : > { %6792 = sst [smem:[#allocation10_spill]] %s4896_s29  ;;  %p612_p0 = scmp.ne.s32.totalorder %s4690_s7, %s4686_s3 }
  0x22   : > { %p600_p1 = scmp.eq.s32.totalorder %s599_s9, 0  ;;  %p613_p2 = scmp.eq.s32.totalorder %s4892_s8, 1 }
  0x23   : > { %p618_p3 = scmp.ne.s32.totalorder %s4686_s3, %s4682_s27  ;;  %p619_p4 = scmp.eq.s32.totalorder %s3964_s4, 1 }
  0x24   : > { %s4907_s30 = scalar_select %p600_p1, %s4690_s7, %s602_s0  }
  0x25   : > { %p4909_p5 = por %p613_p2, %p612_p0  ;;  %p4913_p6 = por %p619_p4, %p618_p3 }
  0x26   : > { %6793 = sst [smem:[#allocation11_spill]] %s4907_s30  ;;  %p3967_p7 = scmp.ge.s32.totalorder %s4694_s28, 1 }
  0x27   : > { %s6794_s2 = scalar_select %p4909_p5, 1, 0 }
  0x28   : > { %s6796_s5 = scalar_select %p4913_p6, 1, 0 }
  0x29   : > { %6795 = sst [smem:[#allocation12_spill]] %s6794_s2  ;;  %p724_p8 = scmp.lt.s32.totalorder %s4694_s28, 3 }
  0x2a   : > { %6797 = sst [smem:[#allocation13_spill]] %s6796_s5 }
  0x2b   : > { %p725_p9 = pnand %p3967_p7, %p724_p8 }
  0x2c   : > { %p798_p10 = scmp.lt.s32.totalorder (!%p725_p9), %s4892_s8, 1  ;;  %s6798_s0 = sld [smem:[#allocation14_spill]] (!%p725_p9)  ;;  %v4702_v2 = vmov (!%p725_p9), 0.0   ;;  %v4704_v3 = vmov (!%p725_p9), 0   ;;  %v824_v5 = vlaneseq (!%p725_p9)  ;;  %vm859_vm0 = vcmask (!%p725_p9), 121856  }
  0x2d   : > { %728 = sbr.rel (%p725_p9) target bundleno = 4577 (0x11e1), region = 124  ;;  %s6674_s30 = smov (!%p725_p9), 1   ;;  %1114 = vmatprep.mubr.f32.mxu0 (!%p725_p9), %v4702_v2  ;;  %1296 = vmatprep.mubr.f32.mxu1 (!%p725_p9), %v4702_v2  ;;  %vm879_vm1 = vcmask (!%p725_p9), 7168   ;;  %vm839_vm2 = vcmask (!%p725_p9), 130048   ;;  %vm898_vm3 = vcmask (!%p725_p9), 1039360   ;;  %vm819_vm4 = vcmask (!%p725_p9), 138240  }
  0x2e   : > { %s6676_s7 = smov (!%p725_p9), 15   ;;  %s6678_s29 = smov (!%p725_p9), 16   ;;  %4627 = vset.pattern.permute.xlu0 (!%p725_p9), %v4704_v3  ;;  %4628 = vset.pattern.permute.xlu1 (!%p725_p9), %v4704_v3  ;;  %v825_v6 = vshrl.u32 (!%p725_p9), %v824_v5, 7  ;;  %vm1018_vm5 = vcmask (!%p725_p9), 1040384   ;;  %vm1021_vm6 = vcmask (!%p725_p9), 1043456   ;;  %vm1024_vm7 = vcmask (!%p725_p9), 1046528  }
  0x2f   : > { %s6686_s1 = smov (!%p725_p9), 127   ;;  %s6680_s4 = smov (!%p725_p9), 17   ;;  %vm1012_vm8 = vcmask (!%p725_p9), 1042432   ;;  %vm918_vm9 = vcmask (!%p725_p9), 924672   ;;  %vm1015_vm10 = vcmask (!%p725_p9), 1045504   ;;  %vm938_vm11 = vcmask (!%p725_p9), 916480  }
  0x30   : > { %v4964_v9 = vsub.s32 (!%p725_p9), 2, %v825_v6  ;;  %v4976_v12 = vsub.s32 (!%p725_p9), 3, %v825_v6  ;;  %v4978_v13 = vsub.s32 (!%p725_p9), 1, %v825_v6  ;;  %v4980_v14 = vsub.s32 (!%p725_p9), 5, %v825_v6  ;;  %s6809_s18 = sld [smem:[#allocation30_spill]] (!%p725_p9)  ;;  %s6810_s5 = sld [smem:[#allocation24_spill]] (!%p725_p9) }
  0x31   : > { %v4982_v17 = vsub.s32 (!%p725_p9), 0, %v825_v6  ;;  %v5034_v40 = vsub.s32 (!%p725_p9), 6, %v825_v6  ;;  %v5052_v56 = vsub.s32 (!%p725_p9), 7, %v825_v6  ;;  %vm1027_vm12 = vcmask (!%p725_p9), 1041408   ;;  %s6812_s11 = sld [smem:[#allocation25_spill]] (!%p725_p9)  ;;  %s6813_s19 = sld [smem:[#allocation31_spill]] (!%p725_p9) }
  0x32   : > { %vm958_vm13 = vcmask (!%p725_p9), 908288   ;;  %vm1030_vm14 = vcmask (!%p725_p9), 1044480   ;;  %vm4706_vm15 = vmmov (!%p725_p9), 1   ;;  %s6725_s2 = smov (!%p725_p9), 73   ;;  %s6711_s27 = smov (!%p725_p9), 8  }
  0x33   : > { %s6703_s28 = smov (!%p725_p9), 71   ;;  %s6705_s26 = smov (!%p725_p9), 121  }
  0x34   : > { %s4921_s10 = scalar_select %p798_p10, %s4892_s8, 1 }
  0x35   : > { %s6709_s8 = smov 120   ;;  %s6815_s12 = sld [smem:[#allocation26_spill]] }
  0x36   : > { %s4009_s6 = sshll.u32 %s4921_s10, 3  ;;  %s6806_s10 = smov 1  }
  0x37   : > { %s802_s9 = scalar_lea.vmem %s6798_s0, %s4009_s6  ;;  %s6682_s0 = smov 113  }
  0x38   : > { %v4929_v0 = vld [vmem:[%s802_s9] sm:$0x77]  ;;  %s6684_s9 = smov 112   ;;  %s6816_s20 = sld [smem:[#allocation32_spill]] }
  0x39   : > { %877 = vrot.lane.b32.xlu1 %v4929_v0, %s6674_s30  ;;  %857 = vrot.lane.b32.xlu0 %v4929_v0, %s6676_s7  ;;  %v813_v1 = vcombine.high %v4929_v0, %v4929_v0  ;;  %v992_v45 = vcombine.low %v4929_v0, %v4929_v0  ;;  %s6831_s13 = sld [smem:[#allocation27_spill]]  ;;  %s6832_s3 = smov 55  }
  0x3a   : > { %s6833_s21 = sld [smem:[#allocation33_spill]]  ;;  %s6834_s25 = sld [smem:[#allocation20_spill]] }
  0x3b   : > { %s6744_s17 = smov 116   ;;  %s6746_s24 = smov 13  }
  0x3c   : > { %s6738_s16 = smov 3   ;;  %s6841_s22 = sld [smem:[#allocation34_spill]] }
  0x3d   : > { %837 = vrot.lane.b32.xlu1 %v4929_v0, %s6678_s29  ;;  %854 = vrot.lane.b32.xlu0 %v813_v1, %s6676_s7  ;;  %s6807_s7 = smov 113  }
  0x41   : > { %874 = vrot.lane.b32.xlu1 %v813_v1, %s6674_s30  ;;  %834 = vrot.lane.b32.xlu0 %v813_v1, %s6678_s29  ;;  %s6799_s29 = sld [smem:[#allocation15_spill]]  ;;  %s6802_s30 = smov 127  }
  0x45   : > { %896 = vrot.lane.b32.xlu1 %v813_v1, %s6686_s1  ;;  %894 = vrot.lane.b32.xlu0 %v4929_v0, %s6686_s1  ;;  %s6800_s1 = sld [smem:[#allocation16_spill]] }
  0x49   : > { %817 = vrot.lane.b32.xlu1 %v4929_v0, %s6680_s4  ;;  %814 = vrot.lane.b32.xlu0 %v813_v1, %s6680_s4  ;;  %s806_s4 = scalar_lea.vmem %s6799_s29, %s4009_s6  ;;  %s6801_s29 = sld [smem:[#allocation23_spill]] }
  0x4a   : > { %v1034_v4 = vld [vmem:[%s806_s4] sm:$0xff]  ;;  %s6803_s6 = smov 17   ;;  %s6804_s4 = smov 16  }
  0x4b   : > { %v4969_v10 = vld [vmem:[%s6800_s1] sm:$0xff]  ;;  %v4974_v11 = vld [vmem:[%s6800_s1 + $0x8] sm:$0xff] }
  0x4c   : > { %v4986_v18 = vrot.slane %v4969_v10, %v4964_v9  ;;  %v4990_v19 = vrot.slane %v4974_v11, %v4964_v9  ;;  %v4996_v22 = vrot.slane %v4969_v10, %v4976_v12  ;;  %v5000_v23 = vrot.slane %v4974_v11, %v4976_v12 }
  0x4d   : > { %916 = vrot.lane.b32.xlu1 %v813_v1, %s6682_s0  ;;  %914 = vrot.lane.b32.xlu0 %v4929_v0, %s6682_s0  ;;  %s6692_s0 = smov 111   ;;  %v5004_v24 = vrot.slane %v4969_v10, %v4978_v13  ;;  %v5008_v25 = vrot.slane %v4974_v11, %v4978_v13  ;;  %v5012_v26 = vrot.slane %v4969_v10, %v4980_v14 }
  0x4e   : > { %v5016_v29 = vrot.slane %v4974_v11, %v4980_v14  ;;  %v5020_v30 = vrot.slane %v4969_v10, %v4982_v17  ;;  %v5024_v31 = vrot.slane %v4974_v11, %v4982_v17  ;;  %v5046_v54 = vrot.slane %v4969_v10, %v5034_v40 }
  0x4f   : > { %v5050_v55 = vrot.slane %v4974_v11, %v5034_v40 }
  0x51   : > { %936 = vrot.lane.b32.xlu1 %v813_v1, %s6684_s9  ;;  %934 = vrot.lane.b32.xlu0 %v4929_v0, %s6684_s9  ;;  %s6805_s9 = smov 15  }
  0x55   : > { %956 = vrot.lane.b32.xlu1 %v813_v1, %s6692_s0  ;;  %954 = vrot.lane.b32.xlu0 %v4929_v0, %s6692_s0 }
  0x59   : > { %1037 = vperm.xlu0 %4627, %v1034_v4  }
  0xab   : > { %v878_v7 = vpop.permute.xlu1 %877  ;;  %v858_v8 = vpop.permute.xlu0 %857 }
  0xaf   : > { %v838_v15 = vpop.permute.xlu1 %837  ;;  %v855_v16 = vpop.permute.xlu0 %854 }
  0xb0   : > { %v860_v20 = vsel %vm859_vm0, %v858_v8, %v855_v16  ;;  %v863_v21 = vsel %vm859_vm0, %v855_v16, %v858_v8  ;;  %v5064_v8 = vrot.slane %v4969_v10, %v5052_v56 }
  0xb1   : > { %v872_v32 = vmul.f32 %v4986_v18, %v863_v21  ;;  %v873_v33 = vmul.f32 %v4990_v19, %v860_v20 }
  0xb3   : > { %v875_v27 = vpop.permute.xlu1 %874  ;;  %v835_v28 = vpop.permute.xlu0 %834  ;;  %v982_v46 = vrot.slane %v872_v32, 2  ;;  %v983_v47 = vrot.slane %v873_v33, 2 }
  0xb4   : > { %v880_v34 = vsel %vm879_vm1, %v878_v7, %v875_v27  ;;  %v883_v35 = vsel %vm879_vm1, %v875_v27, %v878_v7  ;;  %v840_v38 = vsel %vm839_vm2, %v838_v15, %v835_v28  ;;  %v843_v39 = vsel %vm839_vm2, %v835_v28, %v838_v15 }
  0xb5   : > { %v892_v36 = vmul.f32 %v4996_v22, %v883_v35  ;;  %v893_v37 = vmul.f32 %v5000_v23, %v880_v34  ;;  %v852_v50 = vmul.f32 %v5004_v24, %v843_v39  ;;  %v853_v51 = vmul.f32 %v5008_v25, %v840_v38 }
  0xb6   : > { %v5068_v15 = vrot.slane %v4974_v11, %v5052_v56 }
  0xb7   : > { %v988_v41 = vrot.slane %v892_v36, 7  ;;  %v989_v42 = vrot.slane %v893_v37, 7  ;;  %v897_v43 = vpop.permute.xlu1 %896  ;;  %v895_v44 = vpop.permute.xlu0 %894  ;;  %v976_v3 = vrot.slane %v852_v50, 5  ;;  %v977_v4 = vrot.slane %v853_v51, 5 }
  0xb8   : > { %v899_v48 = vsel %vm898_vm3, %v895_v44, %v897_v43  ;;  %v903_v49 = vsel %vm898_vm3, %v897_v43, %v895_v44 }
  0xb9   : > { %v912_v52 = vmul.f32 %v5012_v26, %v899_v48  ;;  %v913_v53 = vmul.f32 %v5016_v29, %v903_v49  ;;  %v1020_v61 = vsel %vm1018_vm5, %v983_v47, %v989_v42  ;;  %v1019_v62 = vsel %vm1018_vm5, %v982_v46, %v988_v41  ;;  %v5088_v48 = vld [vmem:[%s6800_s1 + $0x10] ss:$0 sm:$0xff]  ;;  %v5093_v49 = vld [vmem:[%s6800_s1 + $0x18] ss:$0 sm:$0xff]  ;;  %vm4251_vm5 = vmpackc.low %vm1012_vm8, %vm4706_vm15  ;;  %s6701_s1 = smov 7  }
  0xba   : > { %v1023_v7 = vsel %vm1021_vm6, %v1020_v61, %v4929_v0  ;;  %v1022_v16 = vsel %vm1021_vm6, %v1019_v62, %v992_v45  ;;  %vm1040_vm6 = vcmask 220160   ;;  %vm1756_vm15 = vcmask 64512  }
  0xbb   : > { %v996_v57 = vrot.slane %v912_v52, 1  ;;  %v997_v58 = vrot.slane %v913_v53, 1  ;;  %v818_v59 = vpop.permute.xlu1 %817  ;;  %v815_v60 = vpop.permute.xlu0 %814 }
  0xbc   : > { %v820_v63 = vsel %vm819_vm4, %v818_v59, %v815_v60  ;;  %v823_v1 = vsel %vm819_vm4, %v815_v60, %v818_v59 }
  0xbd   : > { %v832_v5 = vmul.f32 %v5020_v30, %v823_v1  ;;  %v833_v6 = vmul.f32 %v5024_v31, %v820_v63  ;;  %v1026_v28 = vsel %vm1024_vm7, %v1023_v7, %v997_v58  ;;  %v1025_v0 = vsel %vm1024_vm7, %v1022_v16, %v996_v57 }
  0xbe   : > { %vm6733_vm7 = vcmask 588800  }
  0xbf   : > { %v917_v20 = vpop.permute.xlu1 %916  ;;  %v915_v21 = vpop.permute.xlu0 %914  ;;  %v1014_v27 = vsel %vm1012_vm8, %v833_v6, %v977_v4  ;;  %v1013_v32 = vsel %vm1012_vm8, %v832_v5, %v976_v3 }
  0xc0   : > { %v919_v33 = vsel %vm918_vm9, %v915_v21, %v917_v20  ;;  %v923_v10 = vsel %vm918_vm9, %v917_v20, %v915_v21  ;;  %v1017_v34 = vsel %vm1015_vm10, %v1014_v27, %v983_v47  ;;  %v1016_v11 = vsel %vm1015_vm10, %v1013_v32, %v982_v46  ;;  %v1213_v27 = vld [vmem:[%s6809_s18] sm:$0xff] }
  0xc1   : > { %v932_v35 = vmul.f32 %v5046_v54, %v919_v33  ;;  %v933_v36 = vmul.f32 %v5050_v55, %v923_v10  ;;  %v4246_v37 = vpack.c.bf16 %v1026_v28, %v1017_v34  ;;  %v4248_v38 = vpack.c.bf16 %v1025_v0, %v1016_v11  ;;  %v1214_v28 = vld [vmem:[%s6809_s18 + $0x8] sm:$0xff]  ;;  %s6814_s18 = sld [smem:[#allocation19_spill]] }
  0xc3   : > { %v937_v39 = vpop.permute.xlu1 %936  ;;  %4247 = vmatprep.subr.bf16.mxu0 %v4246_v37  ;;  %v935_v41 = vpop.permute.xlu0 %934  ;;  %v1002_v42 = vrot.slane %v932_v35, 6  ;;  %v1003_v43 = vrot.slane %v933_v36, 6 }
  0xc4   : > { %v939_v44 = vsel %vm938_vm11, %v935_v41, %v937_v39  ;;  %v943_v45 = vsel %vm938_vm11, %v937_v39, %v935_v41  ;;  %4249 = vmatpush1.bf16.msra.mxu0 %v4248_v38 }
  0xc5   : > { %v952_v47 = vmul.f32 %v5064_v8, %v939_v44  ;;  %v953_v46 = vmul.f32 %v5068_v15, %v943_v45  ;;  %v1028_v59 = vsel %vm1027_vm12, %v996_v57, %v1002_v42  ;;  %v1029_v60 = vsel %vm1027_vm12, %v997_v58, %v1003_v43  ;;  %v1033_v57 = vld [vmem:[%s6801_s29] sm:$0xff]  ;;  %s6808_s29 = smov 112  }
  0xc7   : > { %v1008_v50 = vrot.slane %v952_v47, 3  ;;  %v1009_v51 = vrot.slane %v953_v46, 3  ;;  %v957_v52 = vpop.permute.xlu1 %956  ;;  %v955_v53 = vpop.permute.xlu0 %954 }
  0xc8   : > { %v959_v61 = vsel %vm958_vm13, %v955_v53, %v957_v52  ;;  %v963_v62 = vsel %vm958_vm13, %v957_v52, %v955_v53 }
  0xc9   : > { %v1031_v63 = vsel %vm1030_vm14, %v1028_v59, %v1008_v50  ;;  %v1032_v1 = vsel %vm1030_vm14, %v1029_v60, %v1009_v51  ;;  %v972_v3 = vmul.f32 %v5088_v48, %v959_v61  ;;  %v973_v4 = vmul.f32 %v5093_v49, %v963_v62 }
  0xcb   : > { %v4250_v5 = vpack.c.bf16 %v973_v4, %v1032_v1  ;;  %v4253_v6 = vpack.c.bf16 %v972_v3, %v1031_v63 }
  0xcd   : > { %4252 = vmatprep.subr.msk.bf16.mxu0 %vm4251_vm5, %v4250_v5 }
  0xce   : > { %4255 = vmatpush1.bf16.msk.msra.mxu0 %vm4251_vm5, %v4253_v6  ;;  %vm1777_vm5 = vcmask 56320  }
  0xd1   : > { %3976 = vmatmul.mubr.msk.f32.vlgmr.msra.gmra.mrb[0].mxu0 %vm1040_vm6, %v1033_v57  ;;  %vm1818_vm6 = vcmask 515072  }
  0xd8   : > { %v1038_v58 = vpop.permute.xlu0 %1037 }
 0x1a4   : > { %v1116_v7 = vpop.f32.mrb[0].mxu0 }
 0x1a5   : > { %v5103_v16 = vadd.f32 %v1116_v7, %v1038_v58  ;;  %v1118_v20 = vpop.f32.mrb[1].mxu0 }
 0x1a6   : > { %v5109_v21 = vadd.f32 %v1118_v20, %v1038_v58 }
 0x1a7   : > { %1167 = vrot.lane.b32.xlu0 %v5103_v16, %s6802_s30  ;;  %1126 = vrot.lane.b32.xlu1 %v5103_v16, %s6803_s6 }
 0x1ab   : > { %1134 = vrot.lane.b32.xlu0 %v5109_v21, %s6804_s4  ;;  %1137 = vrot.lane.b32.xlu1 %v5103_v16, %s6804_s4 }
 0x1af   : > { %1145 = vrot.lane.b32.xlu0 %v5109_v21, %s6805_s9  ;;  %1148 = vrot.lane.b32.xlu1 %v5103_v16, %s6805_s9 }
 0x1b3   : > { %1156 = vrot.lane.b32.xlu0 %v5109_v21, %s6806_s10  ;;  %1159 = vrot.lane.b32.xlu1 %v5103_v16, %s6806_s10 }
 0x1b7   : > { %1178 = vrot.lane.b32.xlu0 %v5103_v16, %s6807_s7  ;;  %1122 = vrot.lane.b32.xlu1 %v5109_v21, %s6803_s6 }
 0x1bb   : > { %1189 = vrot.lane.b32.xlu0 %v5103_v16, %s6808_s29  ;;  %1169 = vrot.lane.b32.xlu1 %v5109_v21, %s6802_s30 }
 0x1bf   : > { %1200 = vrot.lane.b32.xlu0 %v5103_v16, %s6692_s0  ;;  %1180 = vrot.lane.b32.xlu1 %v5109_v21, %s6807_s7 }
 0x1c3   : > { %1217 = vperm.xlu0 %4627, %v1213_v27   ;;  %1191 = vrot.lane.b32.xlu1 %v5109_v21, %s6808_s29 }
 0x1c7   : > { %1202 = vrot.lane.b32.xlu1 %v5109_v21, %s6692_s0  ;;  %s6811_s0 = smov 111  }
 0x1cb   : > { %1222 = vperm.xlu1 %4628, %v1214_v28  }
 0x219   : > { %v1168_v32 = vpop.permute.xlu0 %1167  ;;  %v1127_v0 = vpop.permute.xlu1 %1126 }
 0x21d   : > { %v1135_v33 = vpop.permute.xlu0 %1134  ;;  %v1138_v10 = vpop.permute.xlu1 %1137 }
 0x21e   : > { %v1139_v37 = vsel %vm839_vm2, %v1138_v10, %v1135_v33  ;;  %v1142_v38 = vsel %vm839_vm2, %v1135_v33, %v1138_v10 }
 0x21f   : > { %v1144_v42 = vmul.f32 %v1139_v37, %v5008_v25  ;;  %v1143_v47 = vmul.f32 %v1142_v38, %v5004_v24 }
 0x221   : > { %v1146_v34 = vpop.permute.xlu0 %1145  ;;  %v1149_v11 = vpop.permute.xlu1 %1148 }
 0x222   : > { %v1150_v43 = vsel %vm859_vm0, %v1149_v11, %v1146_v34  ;;  %v1153_v53 = vsel %vm859_vm0, %v1146_v34, %v1149_v11 }
 0x223   : > { %v1155_v59 = vmul.f32 %v1150_v43, %v4990_v19  ;;  %v1154_v57 = vmul.f32 %v1153_v53, %v4986_v18 }
 0x225   : > { %v1157_v35 = vpop.permute.xlu0 %1156  ;;  %v1160_v36 = vpop.permute.xlu1 %1159 }
 0x226   : > { %v1161_v39 = vsel %vm879_vm1, %v1160_v36, %v1157_v35  ;;  %v1164_v46 = vsel %vm879_vm1, %v1157_v35, %v1160_v36 }
 0x227   : > { %v1166_v50 = vmul.f32 %v1161_v39, %v5000_v23  ;;  %v1165_v1 = vmul.f32 %v1164_v46, %v4996_v22  ;;  %v1212_v46 = vld [vmem:[%s6810_s5 + $0x8] sm:$0xff] }
 0x229   : > { %v1123_v41 = vpop.permute.xlu1 %1122  ;;  %v1179_v60 = vpop.permute.xlu0 %1178  ;;  %v4260_v6 = vpack.c.bf16 %v1166_v50, %v1155_v59  ;;  %v4262_v20 = vpack.c.bf16 %v1165_v1, %v1154_v57 }
 0x22a   : > { %v1131_v44 = vsel %vm819_vm4, %v1123_v41, %v1127_v0  ;;  %v1128_v45 = vsel %vm819_vm4, %v1127_v0, %v1123_v41 }
 0x22b   : > { %v1133_v51 = vmul.f32 %v1128_v45, %v5024_v31  ;;  %v1132_v52 = vmul.f32 %v1131_v44, %v5020_v30 }
 0x22d   : > { %v1170_v61 = vpop.permute.xlu1 %1169  ;;  %v4256_v62 = vpack.c.bf16 %v1144_v42, %v1133_v51  ;;  %v4258_v63 = vpack.c.bf16 %v1143_v47, %v1132_v52  ;;  %v1190_v27 = vpop.permute.xlu0 %1189  ;;  %v1211_v47 = vld [vmem:[%s6810_s5] sm:$0xff]  ;;  %s6699_s5 = smov 65  }
 0x22e   : > { %v1175_v3 = vsel %vm898_vm3, %v1170_v61, %v1168_v32  ;;  %v1171_v4 = vsel %vm898_vm3, %v1168_v32, %v1170_v61 }
 0x22f   : > { %v1177_v5 = vmul.f32 %v1175_v3, %v5016_v29  ;;  %4257 = vmatprep.subr.bf16.mxu1 %v4256_v62  ;;  %v1176_v7 = vmul.f32 %v1171_v4, %v5012_v26 }
 0x230   : > { %4259 = vmatpush1.bf16.msra.mxu1 %v4258_v63 }
 0x231   : > { %4261 = vmatprep.subr.bf16.mxu1 %v4260_v6  ;;  %v1181_v58 = vpop.permute.xlu1 %1180  ;;  %v4264_v28 = vpack.c.bf16 %v1177_v5, %v5109_v21  ;;  %v4266_v11 = vpack.c.bf16 %v1176_v7, %v5103_v16  ;;  %v1201_v38 = vpop.permute.xlu0 %1200 }
 0x232   : > { %v1182_v0 = vsel %vm918_vm9, %v1179_v60, %v1181_v58  ;;  %v1186_v33 = vsel %vm918_vm9, %v1181_v58, %v1179_v60 }
 0x233   : > { %v1187_v35 = vmul.f32 %v1182_v0, %v5046_v54  ;;  %v1188_v36 = vmul.f32 %v1186_v33, %v5050_v55  ;;  %v1502_v0 = vld [vmem:[%s6812_s11 + $0x8] sm:$0xff]  ;;  %v1505_v33 = vld [vmem:[%s6813_s19] sm:$0xff] }
 0x234   : > { %4263 = vmatpush1.bf16.msra.mxu1 %v4262_v20  ;;  %3979 = vmatprep.mubr.msk.f32.mxu0 %vm839_vm2, %v1502_v0 }
 0x235   : > { %4265 = vmatprep.subr.bf16.mxu1 %v4264_v28  ;;  %v1192_v32 = vpop.permute.xlu1 %1191 }
 0x236   : > { %v1193_v10 = vsel %vm938_vm11, %v1190_v27, %v1192_v32  ;;  %v1197_v34 = vsel %vm938_vm11, %v1192_v32, %v1190_v27  ;;  %v1506_v32 = vld [vmem:[%s6813_s19 + $0x8] sm:$0xff]  ;;  %s6742_s19 = smov 117  }
 0x237   : > { %v1198_v37 = vmul.f32 %v1193_v10, %v5064_v8  ;;  %v1199_v21 = vmul.f32 %v1197_v34, %v5068_v15  ;;  %v1628_v10 = vld [vmem:[%s6814_s18 + $0x80] sm:$0xff]  ;;  %v1629_v34 = vld [vmem:[%s6814_s18 + $0x88] sm:$0xff] }
 0x238   : > { %4267 = vmatpush1.bf16.msra.mxu1 %v4266_v11  ;;  %v1612_v11 = vld [vmem:[%s6814_s18] sm:$0xff] }
 0x239   : > { %v1203_v39 = vpop.permute.xlu1 %1202  ;;  %v4268_v41 = vpack.c.bf16 %v1199_v21, %v1188_v36  ;;  %v4270_v42 = vpack.c.bf16 %v1198_v37, %v1187_v35  ;;  %v4308_v35 = vpack.c.bf16 %v1629_v34, %v1628_v10  ;;  %v1613_v36 = vld [vmem:[%s6814_s18 + $0x8] sm:$0xff]  ;;  %v1630_v37 = vld [vmem:[%s6814_s18 + $0x90] sm:$0xff]  ;;  %v1631_v21 = vld [vmem:[%s6814_s18 + $0x98] sm:$0xff] }
 0x23a   : > { %v1208_v43 = vsel %vm958_vm13, %v1203_v39, %v1201_v38  ;;  %v1204_v44 = vsel %vm958_vm13, %v1201_v38, %v1203_v39  ;;  %v4310_v38 = vpack.c.bf16 %v1613_v36, %v1612_v11  ;;  %v4312_v39 = vpack.c.bf16 %v1631_v21, %v1630_v37  ;;  %v1623_v10 = vld [vmem:[%s6814_s18 + $0x58] sm:$0xff] }
 0x23b   : > { %4269 = vmatprep.subr.bf16.mxu1 %v4268_v41  ;;  %v1210_v16 = vmul.f32 %v5093_v49, %v1208_v43  ;;  %v1209_v45 = vmul.f32 %v5088_v48, %v1204_v44  ;;  %v1614_v41 = vld [vmem:[%s6814_s18 + $0x10] sm:$0xff]  ;;  %v1632_v43 = vld [vmem:[%s6814_s18 + $0xa0] sm:$0xff]  ;;  %v1633_v44 = vld [vmem:[%s6814_s18 + $0xa8] sm:$0xff] }
 0x23c   : > { %4271 = vmatpush1.bf16.msra.mxu1 %v4270_v42  ;;  %v1615_v42 = vld [vmem:[%s6814_s18 + $0x18] sm:$0xff] }
 0x23d   : > { %1248 = vmatprep.subr.mxu1 %v1210_v16  ;;  %v4314_v16 = vpack.c.bf16 %v1615_v42, %v1614_v41 }
 0x240   : > { %1249 = vmatpush1.msra.mxu1 %v1209_v45  ;;  %v4316_v45 = vpack.c.bf16 %v1633_v44, %v1632_v43 }
 0x241   : > { %3977 = vmatmul.mubr.msk.f32.vlgmr.msra.gmra.mrb[0].mxu1 %vm6733_vm7, %v1211_v47  ;;  %4309 = vmatprep.subr.bf16.mxu1 %v4308_v35  ;;  %v1616_v47 = vld [vmem:[%s6814_s18 + $0x20] sm:$0xff] }
 0x242   : > { %1302 = vmatprep.mubr.f32.mxu1 %v4702_v2  ;;  %v1218_v50 = vpop.permute.xlu0 %1217  ;;  %4311 = vmatpush3.bf16.msra.mxu1 %v4310_v38 }
 0x243   : > { %4313 = vmatprep.subr.bf16.mxu1 %v4312_v39 }
 0x245   : > { %3978 = vmatmul.mubr.msk.f32.gmra.mrb[2].mxu1 %vm6733_vm7, %v1212_v46  ;;  %v1617_v46 = vld [vmem:[%s6814_s18 + $0x28] sm:$0xff] }
 0x246   : > { %4315 = vmatpush3.bf16.msra.mxu1 %v4314_v16 }
 0x247   : > { %4317 = vmatprep.subr.bf16.mxu1 %v4316_v45 }
 0x24a   : > { %v1223_v60 = vpop.permute.xlu1 %1222 }
 0x314   : > { %v1298_v51 = vpop.f32.mrb[0].mxu1 }
 0x315   : > { %v1299_v52 = vadd.f32 %v1298_v51, %v1218_v50  ;;  %v1300_v53 = vpop.f32.mrb[1].mxu1  ;;  %v1635_v51 = vld [vmem:[%s6814_s18 + $0xb8] sm:$0xff] }
 0x316   : > { %v1301_v59 = vadd.f32 %v1300_v53, %v1218_v50  ;;  %v1634_v50 = vld [vmem:[%s6814_s18 + $0xb0] sm:$0xff] }
 0x317   : > { %vm1309_vm8 = vcmp.ge.f32.partialorder %v1299_v52, 0.0  ;;  %v1313_v61 = vmul.f32 -0.2, %v1299_v52  ;;  %v4320_v53 = vpack.c.bf16 %v1635_v51, %v1634_v50 }
 0x318   : > { %vm1310_vm10 = vcmp.ge.f32.partialorder %v1301_v59, 0.0  ;;  %v1314_v62 = vmul.f32 -0.2, %v1301_v59  ;;  %v1304_v63 = vpop.f32.mrb[2].mxu1 }
 0x319   : > { %v5188_v1 = vsel %vm1309_vm8, %v1299_v52, %v1313_v61  ;;  %v1305_v3 = vadd.f32 %v1304_v63, %v1223_v60  ;;  %v1306_v4 = vpop.f32.mrb[3].mxu1  ;;  %v4318_v52 = vpack.c.bf16 %v1617_v46, %v1616_v47  ;;  %v1636_v61 = vld [vmem:[%s6814_s18 + $0xc0] sm:$0xff]  ;;  %vm6762_vm8 = vcmask 465920  }
 0x31a   : > { %v5190_v5 = vsel %vm1310_vm10, %v1301_v59, %v1314_v62  ;;  %v1307_v6 = vadd.f32 %v1306_v4, %v1223_v60  ;;  %1331 = vrot.lane.b32.xlu0 %v5188_v1, %s6803_s6  ;;  %v1618_v59 = vld [vmem:[%s6814_s18 + $0x30] sm:$0xff]  ;;  %v1619_v60 = vld [vmem:[%s6814_s18 + $0x38] sm:$0xff]  ;;  %v1637_v62 = vld [vmem:[%s6814_s18 + $0xc8] sm:$0xff]  ;;  %vm6761_vm10 = vcmask 457728  }
 0x31b   : > { %vm1311_vm12 = vcmp.ge.f32.partialorder %v1305_v3, 0.0  ;;  %v1315_v57 = vmul.f32 -0.2, %v1305_v3  ;;  %1415 = vrot.lane.b32.xlu1 %v5190_v5, %s6802_s30  ;;  %4319 = vmatpush3.bf16.msra.mxu1 %v4318_v52  ;;  %v4322_v63 = vpack.c.bf16 %v1619_v60, %v1618_v59  ;;  %v1620_v4 = vld [vmem:[%s6814_s18 + $0x40] sm:$0xff] }
 0x31c   : > { %vm1312_vm14 = vcmp.ge.f32.partialorder %v1307_v6, 0.0  ;;  %v1316_v58 = vmul.f32 -0.2, %v1307_v6  ;;  %4321 = vmatprep.subr.bf16.mxu1 %v4320_v53 }
 0x31d   : > { %v5196_v7 = vsel %vm1311_vm12, %v1305_v3, %v1315_v57  ;;  %v4324_v3 = vpack.c.bf16 %v1637_v62, %v1636_v61  ;;  %v1638_v57 = vld [vmem:[%s6814_s18 + $0xd0] sm:$0xff]  ;;  %vm6759_vm12 = vcmask 449536  }
 0x31e   : > { %v5198_v20 = vsel %vm1312_vm14, %v1307_v6, %v1316_v58  ;;  %1353 = vrot.lane.b32.xlu0 %v5188_v1, %s6804_s4  ;;  %v4290_v27 = vpack.c.bf16 %v5196_v7, %v5188_v1  ;;  %v1621_v6 = vld [vmem:[%s6814_s18 + $0x48] sm:$0xff]  ;;  %v1639_v58 = vld [vmem:[%s6814_s18 + $0xd8] sm:$0xff] }
 0x31f   : > { %1437 = vrot.lane.b32.xlu1 %v5190_v5, %s6807_s7  ;;  %v4288_v28 = vpack.c.bf16 %v5198_v20, %v5190_v5  ;;  %4323 = vmatpush3.bf16.msra.mxu1 %v4322_v63  ;;  %v4326_v0 = vpack.c.bf16 %v1621_v6, %v1620_v4 }
 0x320   : > { %4325 = vmatprep.subr.bf16.mxu1 %v4324_v3 }
 0x322   : > { %1375 = vrot.lane.b32.xlu0 %v5188_v1, %s6805_s9 }
 0x323   : > { %1459 = vrot.lane.b32.xlu1 %v5190_v5, %s6808_s29  ;;  %4327 = vmatpush3.bf16.msra.mxu1 %v4326_v0 }
 0x326   : > { %1397 = vrot.lane.b32.xlu0 %v5188_v1, %s6806_s10 }
 0x327   : > { %1333 = vrot.lane.b32.xlu1 %v5196_v7, %s6803_s6 }
 0x32a   : > { %1413 = vrot.lane.b32.xlu0 %v5188_v1, %s6802_s30 }
 0x32b   : > { %1355 = vrot.lane.b32.xlu1 %v5196_v7, %s6804_s4 }
 0x32e   : > { %1435 = vrot.lane.b32.xlu0 %v5188_v1, %s6807_s7 }
 0x32f   : > { %1377 = vrot.lane.b32.xlu1 %v5196_v7, %s6805_s9 }
 0x332   : > { %1457 = vrot.lane.b32.xlu0 %v5188_v1, %s6808_s29 }
 0x333   : > { %1399 = vrot.lane.b32.xlu1 %v5196_v7, %s6806_s10 }
 0x336   : > { %1323 = vrot.lane.b32.xlu0 %v5190_v5, %s6803_s6 }
 0x337   : > { %1325 = vrot.lane.b32.xlu1 %v5198_v20, %s6803_s6  ;;  %s6717_s6 = smov 63  }
 0x33a   : > { %1347 = vrot.lane.b32.xlu0 %v5190_v5, %s6804_s4 }
 0x33b   : > { %1349 = vrot.lane.b32.xlu1 %v5198_v20, %s6804_s4  ;;  %s6707_s4 = smov 57  }
 0x33e   : > { %1369 = vrot.lane.b32.xlu0 %v5190_v5, %s6805_s9 }
 0x33f   : > { %1371 = vrot.lane.b32.xlu1 %v5198_v20, %s6805_s9 }
 0x342   : > { %1391 = vrot.lane.b32.xlu0 %v5190_v5, %s6806_s10 }
 0x343   : > { %1393 = vrot.lane.b32.xlu1 %v5198_v20, %s6806_s10 }
 0x346   : > { %1479 = vrot.lane.b32.xlu0 %v5188_v1, %s6811_s0 }
 0x347   : > { %1481 = vrot.lane.b32.xlu1 %v5190_v5, %s6811_s0 }
 0x34a   : > { %1417 = vrot.lane.b32.xlu0 %v5196_v7, %s6802_s30 }
 0x34b   : > { %1419 = vrot.lane.b32.xlu1 %v5198_v20, %s6802_s30 }
 0x34e   : > { %1439 = vrot.lane.b32.xlu0 %v5196_v7, %s6807_s7 }
 0x34f   : > { %1441 = vrot.lane.b32.xlu1 %v5198_v20, %s6807_s7 }
 0x352   : > { %1461 = vrot.lane.b32.xlu0 %v5196_v7, %s6808_s29 }
 0x353   : > { %1463 = vrot.lane.b32.xlu1 %v5198_v20, %s6808_s29  ;;  %s6721_s29 = smov 9  }
 0x356   : > { %1483 = vrot.lane.b32.xlu0 %v5196_v7, %s6811_s0 }
 0x357   : > { %1485 = vrot.lane.b32.xlu1 %v5198_v20, %s6811_s0  ;;  %s6715_s0 = smov 72  }
 0x35a   : > { %1509 = vperm.xlu0 %4627, %v1505_v33   ;;  %v4328_v33 = vpack.c.bf16 %v1639_v58, %v1638_v57 }
 0x35b   : > { %1514 = vperm.xlu1 %4628, %v1506_v32   ;;  %v1622_v32 = vld [vmem:[%s6814_s18 + $0x50] sm:$0xff] }
 0x35c   : > { %v4330_v34 = vpack.c.bf16 %v1623_v10, %v1622_v32  ;;  %4329 = vmatprep.subr.bf16.mxu1 %v4328_v33 }
 0x35e   : > { %4331 = vmatpush3.bf16.msra.mxu1 %v4330_v34 }
 0x38c   : > { %v1332_v11 = vpop.permute.xlu0 %1331 }
 0x38d   : > { %v5346_v35 = vpop.permute.xlu1 %1415 }
 0x390   : > { %v1354_v36 = vpop.permute.xlu0 %1353 }
 0x391   : > { %v5348_v37 = vpop.permute.xlu1 %1437 }
 0x394   : > { %v1376_v21 = vpop.permute.xlu0 %1375 }
 0x395   : > { %v5350_v38 = vpop.permute.xlu1 %1459 }
 0x398   : > { %v1398_v39 = vpop.permute.xlu0 %1397 }
 0x399   : > { %v1334_v41 = vpop.permute.xlu1 %1333 }
 0x39c   : > { %v5352_v42 = vpop.permute.xlu0 %1413 }
 0x39d   : > { %v1356_v43 = vpop.permute.xlu1 %1355 }
 0x3a0   : > { %v5354_v44 = vpop.permute.xlu0 %1435 }
 0x3a1   : > { %v1378_v16 = vpop.permute.xlu1 %1377  ;;  %v1451_v5 = vsel %vm918_vm9, %v5348_v37, %v5354_v44 }
 0x3a4   : > { %v5356_v45 = vpop.permute.xlu0 %1457 }
 0x3a5   : > { %v1400_v47 = vpop.permute.xlu1 %1399  ;;  %v1465_v1 = vsel %vm938_vm11, %v5356_v45, %v5350_v38  ;;  %v1473_v7 = vsel %vm938_vm11, %v5350_v38, %v5356_v45 }
 0x3a8   : > { %v1324_v46 = vpop.permute.xlu0 %1323 }
 0x3a9   : > { %v1335_v50 = vsel %vm819_vm4, %v1332_v11, %v1324_v46  ;;  %v1341_v51 = vsel %vm819_vm4, %v1324_v46, %v1332_v11  ;;  %v1326_v52 = vpop.permute.xlu1 %1325 }
 0x3aa   : > { %v1343_v53 = vmul.f32 %v1341_v51, %v5020_v30  ;;  %v1344_v59 = vmul.f32 %v1335_v50, %v5024_v31  ;;  %v1336_v60 = vsel %vm819_vm4, %v1334_v41, %v1326_v52  ;;  %v1342_v61 = vsel %vm819_vm4, %v1326_v52, %v1334_v41 }
 0x3ab   : > { %v1345_v62 = vmul.f32 %v1342_v61, %v5020_v30  ;;  %v1346_v63 = vmul.f32 %v1336_v60, %v5024_v31 }
 0x3ac   : > { %v1348_v3 = vpop.permute.xlu0 %1347 }
 0x3ad   : > { %v4274_v4 = vpack.c.bf16 %v1345_v62, %v1343_v53  ;;  %v1357_v6 = vsel %vm839_vm2, %v1354_v36, %v1348_v3  ;;  %v1363_v57 = vsel %vm839_vm2, %v1348_v3, %v1354_v36  ;;  %v1350_v58 = vpop.permute.xlu1 %1349  ;;  %v4272_v0 = vpack.c.bf16 %v1346_v63, %v1344_v59 }
 0x3ae   : > { %v1365_v33 = vmul.f32 %v1363_v57, %v5004_v24  ;;  %v1366_v32 = vmul.f32 %v1357_v6, %v5008_v25  ;;  %v1358_v10 = vsel %vm839_vm2, %v1356_v43, %v1350_v58  ;;  %v1364_v34 = vsel %vm839_vm2, %v1350_v58, %v1356_v43 }
 0x3af   : > { %v1367_v30 = vmul.f32 %v1364_v34, %v5004_v24  ;;  %v1368_v31 = vmul.f32 %v1358_v10, %v5008_v25  ;;  %4273 = vmatprep.subr.bf16.mxu0 %v4272_v0  ;;  %v1429_v10 = vsel %vm898_vm3, %v5346_v35, %v5352_v42 }
 0x3b0   : > { %v1370_v11 = vpop.permute.xlu0 %1369  ;;  %4275 = vmatpush1.bf16.msra.mxu0 %v4274_v4 }
 0x3b1   : > { %v4278_v41 = vpack.c.bf16 %v1367_v30, %v1365_v33  ;;  %v1379_v36 = vsel %vm859_vm0, %v1376_v21, %v1370_v11  ;;  %v1385_v46 = vsel %vm859_vm0, %v1370_v11, %v1376_v21  ;;  %v1372_v50 = vpop.permute.xlu1 %1371  ;;  %v4276_v51 = vpack.c.bf16 %v1368_v31, %v1366_v32 }
 0x3b2   : > { %v1387_v52 = vmul.f32 %v1385_v46, %v4986_v18  ;;  %v1388_v53 = vmul.f32 %v1379_v36, %v4990_v19  ;;  %v1380_v43 = vsel %vm859_vm0, %v1378_v16, %v1372_v50  ;;  %v1386_v24 = vsel %vm859_vm0, %v1372_v50, %v1378_v16 }
 0x3b3   : > { %v1389_v25 = vmul.f32 %v1386_v24, %v4986_v18  ;;  %v1390_v59 = vmul.f32 %v1380_v43, %v4990_v19  ;;  %4277 = vmatprep.subr.bf16.mxu0 %v4276_v51  ;;  %v1421_v32 = vsel %vm898_vm3, %v5352_v42, %v5346_v35  ;;  %v1432_v31 = vmul.f32 %v1429_v10, %v5016_v29  ;;  %v1642_v10 = vld [vmem:[%s6814_s18 + $0xf0] sm:$0xff] }
 0x3b4   : > { %v1392_v60 = vpop.permute.xlu0 %1391  ;;  %4279 = vmatpush1.bf16.msra.mxu0 %v4278_v41  ;;  %v1431_v30 = vmul.f32 %v1421_v32, %v5012_v26  ;;  %v1443_v35 = vsel %vm918_vm9, %v5354_v44, %v5348_v37  ;;  %v1454_v50 = vmul.f32 %v1451_v5, %v5050_v55  ;;  %v1476_v24 = vmul.f32 %v1473_v7, %v5068_v15 }
 0x3b5   : > { %v4282_v61 = vpack.c.bf16 %v1389_v25, %v1387_v52  ;;  %v1401_v21 = vsel %vm879_vm1, %v1398_v39, %v1392_v60  ;;  %v1407_v62 = vsel %vm879_vm1, %v1392_v60, %v1398_v39  ;;  %v1394_v63 = vpop.permute.xlu1 %1393  ;;  %v4280_v3 = vpack.c.bf16 %v1390_v59, %v1388_v53 }
 0x3b6   : > { %v1409_v4 = vmul.f32 %v1407_v62, %v4996_v22  ;;  %v1410_v6 = vmul.f32 %v1401_v21, %v5000_v23  ;;  %v1402_v16 = vsel %vm879_vm1, %v1400_v47, %v1394_v63  ;;  %v1408_v18 = vsel %vm879_vm1, %v1394_v63, %v1400_v47 }
 0x3b7   : > { %v1411_v19 = vmul.f32 %v1408_v18, %v4996_v22  ;;  %v1412_v57 = vmul.f32 %v1402_v16, %v5000_v23  ;;  %4281 = vmatprep.subr.bf16.mxu0 %v4280_v3  ;;  %v1453_v46 = vmul.f32 %v1443_v35, %v5046_v54 }
 0x3b8   : > { %v1480_v58 = vpop.permute.xlu0 %1479  ;;  %4283 = vmatpush1.bf16.msra.mxu0 %v4282_v61 }
 0x3b9   : > { %v4286_v0 = vpack.c.bf16 %v1411_v19, %v1409_v4  ;;  %v1482_v33 = vpop.permute.xlu1 %1481  ;;  %v4284_v39 = vpack.c.bf16 %v1412_v57, %v1410_v6  ;;  %v1501_v19 = vld [vmem:[%s6812_s11] sm:$0xff]  ;;  %v1504_v57 = vld [vmem:[%s6812_s11 + $0x18] sm:$0xff] }
 0x3ba   : > { %v1487_v38 = vsel %vm958_vm13, %v1480_v58, %v1482_v33  ;;  %v1495_v45 = vsel %vm958_vm13, %v1482_v33, %v1480_v58  ;;  %v1641_v58 = vld [vmem:[%s6814_s18 + $0xe8] sm:$0xff]  ;;  %v1624_v33 = vld [vmem:[%s6814_s18 + $0x60] sm:$0xff] }
 0x3bb   : > { %4285 = vmatprep.subr.bf16.mxu0 %v4284_v39  ;;  %v1497_v4 = vmul.f32 %v5088_v48, %v1487_v38  ;;  %v1625_v39 = vld [vmem:[%s6814_s18 + $0x68] sm:$0xff]  ;;  %v1898_v38 = vld [vmem:[%s6816_s20] sm:$0xff] }
 0x3bc   : > { %v1418_v47 = vpop.permute.xlu0 %1417  ;;  %4287 = vmatpush1.bf16.msra.mxu0 %v4286_v0  ;;  %v4334_v32 = vpack.c.bf16 %v1625_v39, %v1624_v33 }
 0x3bd   : > { %4289 = vmatprep.subr.bf16.mxu0 %v4288_v28  ;;  %v1420_v22 = vpop.permute.xlu1 %1419 }
 0x3be   : > { %v1422_v23 = vsel %vm898_vm3, %v1418_v47, %v1420_v22  ;;  %v1430_v34 = vsel %vm898_vm3, %v1420_v22, %v1418_v47  ;;  %v1643_v47 = vld [vmem:[%s6814_s18 + $0xf8] sm:$0xff] }
 0x3bf   : > { %v1433_v11 = vmul.f32 %v1422_v23, %v5012_v26  ;;  %v1434_v41 = vmul.f32 %v1430_v34, %v5016_v29  ;;  %v4336_v22 = vpack.c.bf16 %v1643_v47, %v1642_v10  ;;  %v1626_v23 = vld [vmem:[%s6814_s18 + $0x70] sm:$0xff]  ;;  %v1627_v34 = vld [vmem:[%s6814_s18 + $0x78] sm:$0xff] }
 0x3c0   : > { %v1440_v20 = vpop.permute.xlu0 %1439  ;;  %4291 = vmatpush1.bf16.msra.mxu0 %v4290_v27 }
 0x3c1   : > { %v4294_v28 = vpack.c.bf16 %v1433_v11, %v1431_v30  ;;  %v1442_v42 = vpop.permute.xlu1 %1441  ;;  %v4292_v36 = vpack.c.bf16 %v1434_v41, %v1432_v31  ;;  %v4338_v30 = vpack.c.bf16 %v1627_v34, %v1626_v23 }
 0x3c2   : > { %v1444_v26 = vsel %vm918_vm9, %v1440_v20, %v1442_v42  ;;  %v1452_v29 = vsel %vm918_vm9, %v1442_v42, %v1440_v20 }
 0x3c3   : > { %v1455_v51 = vmul.f32 %v1444_v26, %v5046_v54  ;;  %v1456_v37 = vmul.f32 %v1452_v29, %v5050_v55  ;;  %4293 = vmatprep.subr.bf16.mxu0 %v4292_v36  ;;  %v1475_v55 = vmul.f32 %v1465_v1, %v5064_v8 }
 0x3c4   : > { %v1462_v27 = vpop.permute.xlu0 %1461  ;;  %4295 = vmatpush1.bf16.msra.mxu0 %v4294_v28 }
 0x3c5   : > { %v4298_v44 = vpack.c.bf16 %v1455_v51, %v1453_v46  ;;  %v1464_v52 = vpop.permute.xlu1 %1463  ;;  %v4296_v53 = vpack.c.bf16 %v1456_v37, %v1454_v50 }
 0x3c6   : > { %v1466_v43 = vsel %vm938_vm11, %v1462_v27, %v1464_v52  ;;  %v1474_v54 = vsel %vm938_vm11, %v1464_v52, %v1462_v27 }
 0x3c7   : > { %v1477_v25 = vmul.f32 %v1466_v43, %v5064_v8  ;;  %v1478_v59 = vmul.f32 %v1474_v54, %v5068_v15  ;;  %4297 = vmatprep.subr.bf16.mxu0 %v4296_v53  ;;  %v1498_v8 = vmul.f32 %v5093_v49, %v1495_v45  ;;  %v4707_v43 = vmov 0.0|0.0   ;;  %v1900_v45 = vld [vmem:[%s6816_s20 + $0x10] sm:$0xff] }
 0x3c8   : > { %v1484_v60 = vpop.permute.xlu0 %1483  ;;  %4299 = vmatpush1.bf16.msra.mxu0 %v4298_v44 }
 0x3c9   : > { %v4302_v61 = vpack.c.bf16 %v1477_v25, %v1475_v55  ;;  %v1486_v21 = vpop.permute.xlu1 %1485  ;;  %v4300_v62 = vpack.c.bf16 %v1478_v59, %v1476_v24  ;;  %v1891_v59 = vld [vmem:[%s6815_s12 + $0x8] sm:$0xff] }
 0x3ca   : > { %v1488_v63 = vsel %vm958_vm13, %v1484_v60, %v1486_v21  ;;  %v1496_v3 = vsel %vm958_vm13, %v1486_v21, %v1484_v60  ;;  %v1899_v60 = vld [vmem:[%s6816_s20 + $0x8] sm:$0xff]  ;;  %vm1735_vm13 = vcmask 72704  }
 0x3cb   : > { %v1499_v15 = vmul.f32 %v5088_v48, %v1488_v63  ;;  %v1500_v6 = vmul.f32 %v5093_v49, %v1496_v3  ;;  %4301 = vmatprep.subr.bf16.mxu0 %v4300_v62  ;;  %v1503_v48 = vld [vmem:[%s6812_s11 + $0x10] sm:$0xff]  ;;  %v1640_v49 = vld [vmem:[%s6814_s18 + $0xe0] sm:$0xff]  ;;  %s6828_s11 = smov 65   ;;  %s6830_s18 = smov 73  }
 0x3cc   : > { %4303 = vmatpush1.bf16.msra.mxu0 %v4302_v61  ;;  %v4332_v0 = vpack.c.bf16 %v1641_v58, %v1640_v49  ;;  %v1901_v61 = vld [vmem:[%s6816_s20 + $0x18] sm:$0xff]  ;;  %s6740_s20 = smov 5  }
 0x3cd   : > { %v4306_v16 = vpack.c.bf16 %v1499_v15, %v1497_v4  ;;  %v4304_v18 = vpack.c.bf16 %v1500_v6, %v1498_v8 }
 0x3ce   : > { %4333 = vmatprep.subr.bf16.mxu1 %v4332_v0 }
 0x3cf   : > { %4305 = vmatprep.subr.bf16.mxu0 %v4304_v18  ;;  %4335 = vmatpush3.bf16.msra.mxu1 %v4334_v32 }
 0x3d0   : > { %4307 = vmatpush1.bf16.msra.mxu0 %v4306_v16  ;;  %4337 = vmatprep.subr.bf16.mxu1 %v4336_v22 }
 0x3d1   : > { %4340 = vmatprep.subr.bf16.mxu0 %v4707_v43 }
 0x3d3   : > { %1588 = vmatmul.mubr.f32.vlgmr.msra.gmra.mrb[2].mxu0 %v1501_v19  ;;  %4339 = vmatpush3.bf16.msra.mxu1 %v4338_v30 }
 0x3d4   : > { %3980 = vmatprep.mubr.msk.f32.mxu0 %vm839_vm2, %v1504_v57 }
 0x3d7   : > { %1594 = vmatmul.mubr.f32.gmra.mrb[4].mxu0 %v1503_v48 }
 0x3d8   : > { %3982 = vmatprep.mubr.msk.f32.mxu0 %vm839_vm2, %v1891_v59 }
 0x3d9   : > { %v1510_v31 = vpop.permute.xlu0 %1509 }
 0x3da   : > { %v1515_v28 = vpop.permute.xlu1 %1514 }
 0x4a6   : > { %v1589_v11 = vpop.f32.mrb[2].mxu0 }
 0x4a7   : > { %v1590_v41 = vadd.f32 %v1589_v11, %v1510_v31  ;;  %v1591_v35 = vpop.f32.mrb[3].mxu0 }
 0x4a8   : > { %v1592_v5 = vadd.f32 %v1591_v35, %v1510_v31 }
 0x4a9   : > { %v1604_v20 = vmul.f32 -0.2, %v1590_v41  ;;  %vm1600_vm3 = vcmp.ge.f32.partialorder %v1590_v41, 0.0 }
 0x4aa   : > { %v1605_v42 = vmul.f32 -0.2, %v1592_v5  ;;  %v1595_v36 = vpop.f32.mrb[4].mxu0  ;;  %vm1601_vm4 = vcmp.ge.f32.partialorder %v1592_v5, 0.0 }
 0x4ab   : > { %v1596_v26 = vadd.f32 %v1595_v36, %v1515_v28  ;;  %v1597_v29 = vpop.f32.mrb[5].mxu0  ;;  %v1608_v51 = vsel %vm1600_vm3, %v1590_v41, %v1604_v20 }
 0x4ac   : > { %v1598_v46 = vadd.f32 %v1597_v29, %v1515_v28  ;;  %v1609_v50 = vsel %vm1601_vm4, %v1592_v5, %v1605_v42 }
 0x4ad   : > { %v1606_v37 = vmul.f32 -0.2, %v1596_v26  ;;  %1708 = vmatprep.mubr.f32.mxu1 %v1609_v50  ;;  %vm1602_vm11 = vcmp.ge.f32.partialorder %v1596_v26, 0.0 }
 0x4ae   : > { %v1607_v1 = vmul.f32 -0.2, %v1598_v46  ;;  %1709 = vmatmul.mubr.f32.vlgmr.msra.gmra.mrb[4].mxu1 %v1608_v51  ;;  %vm1603_vm9 = vcmp.ge.f32.partialorder %v1598_v46, 0.0 }
 0x4af   : > { %v1610_v27 = vsel %vm1602_vm11, %v1596_v26, %v1606_v37  ;;  %vm2327_vm11 = vcmask 261120  }
 0x4b0   : > { %v1611_v7 = vsel %vm1603_vm9, %v1598_v46, %v1607_v1 }
 0x4b1   : > { %1713 = vmatprep.mubr.f32.mxu1 %v1611_v7 }
 0x4b2   : > { %1714 = vmatmul.mubr.f32.gmra.mrb[6].mxu1 %v1610_v27 }
 0x581   : > { %v4043_v44 = vpop.f32.mrb[4].mxu1 }
 0x582   : > { %v4044_v52 = vpop.f32.mrb[5].mxu1 }
 0x583   : > { %v5474_v53 = vadd.f32 %v4044_v52, %v4043_v44 }
 0x585   : > { %1723 = vrot.lane.b32.xlu0 %v5474_v53, %s6725_s2  ;;  %v4046_v54 = vpop.f32.mrb[6].mxu1 }
 0x586   : > { %v4047_v55 = vpop.f32.mrb[7].mxu1 }
 0x587   : > { %v5479_v24 = vadd.f32 %v4047_v55, %v4046_v54 }
 0x589   : > { %1729 = vrot.lane.b32.xlu0 %v5474_v53, %s6721_s29  ;;  %1725 = vrot.lane.b32.xlu1 %v5479_v24, %s6725_s2  ;;  %v4353_v25 = vpack.c.bf16 %v5479_v24, %v5474_v53 }
 0x58d   : > { %1744 = vrot.lane.b32.xlu0 %v5474_v53, %s6715_s0  ;;  %1731 = vrot.lane.b32.xlu1 %v5479_v24, %s6721_s29  ;;  %s6817_s29 = sld [smem:[#allocation17_spill]] }
 0x591   : > { %1750 = vrot.lane.b32.xlu0 %v5474_v53, %s6711_s27  ;;  %1746 = vrot.lane.b32.xlu1 %v5479_v24, %s6715_s0  ;;  %s6818_s0 = smov 9  }
 0x593   : > { %v5564_v62 = vld [vmem:[%s6817_s29] sm:$0xff] }
 0x594   : > { %v5568_v4 = vrot.slane %v5564_v62, %v4982_v17  ;;  %v5576_v58 = vrot.slane %v5564_v62, %v4978_v13  ;;  %v5585_v30 = vrot.slane %v5564_v62, %v4964_v9  ;;  %v5594_v26 = vrot.slane %v5564_v62, %v4976_v12 }
 0x595   : > { %1765 = vrot.lane.b32.xlu0 %v5474_v53, %s6703_s28  ;;  %1752 = vrot.lane.b32.xlu1 %v5479_v24, %s6711_s27  ;;  %v5603_v52 = vrot.slane %v5564_v62, %v4980_v14  ;;  %s6824_s27 = smov 71  }
 0x599   : > { %1771 = vrot.lane.b32.xlu0 %v5474_v53, %s6701_s1  ;;  %1767 = vrot.lane.b32.xlu1 %v5479_v24, %s6703_s28  ;;  %s6822_s28 = smov 121  }
 0x59d   : > { %1786 = vrot.lane.b32.xlu0 %v5474_v53, %s6699_s5  ;;  %1773 = vrot.lane.b32.xlu1 %v5479_v24, %s6701_s1  ;;  %s6719_s1 = smov 119  }
 0x5a1   : > { %1792 = vrot.lane.b32.xlu0 %v5474_v53, %s6806_s10  ;;  %1788 = vrot.lane.b32.xlu1 %v5479_v24, %s6699_s5  ;;  %s6713_s5 = smov 56  }
 0x5a5   : > { %1806 = vrot.lane.b32.xlu0 %v5474_v53, %s6802_s30  ;;  %1794 = vrot.lane.b32.xlu1 %v5479_v24, %s6806_s10 }
 0x5a9   : > { %1812 = vrot.lane.b32.xlu0 %v5474_v53, %s6717_s6  ;;  %1808 = vrot.lane.b32.xlu1 %v5479_v24, %s6802_s30 }
 0x5ad   : > { %1827 = vrot.lane.b32.xlu0 %v5474_v53, %s6705_s26  ;;  %1814 = vrot.lane.b32.xlu1 %v5479_v24, %s6717_s6  ;;  %s6821_s6 = smov 8  }
 0x5b1   : > { %1833 = vrot.lane.b32.xlu0 %v5474_v53, %s6707_s4  ;;  %1829 = vrot.lane.b32.xlu1 %v5479_v24, %s6705_s26  ;;  %s6823_s26 = smov 57  }
 0x5b5   : > { %1848 = vrot.lane.b32.xlu0 %v5474_v53, %s6709_s8  ;;  %1835 = vrot.lane.b32.xlu1 %v5479_v24, %s6707_s4  ;;  %s6723_s4 = smov 55  }
 0x5b9   : > { %1854 = vrot.lane.b32.xlu0 %v5474_v53, %s6713_s5  ;;  %1850 = vrot.lane.b32.xlu1 %v5479_v24, %s6709_s8  ;;  %s6825_s8 = smov 7  }
 0x5bd   : > { %1869 = vrot.lane.b32.xlu0 %v5474_v53, %s6719_s1  ;;  %1856 = vrot.lane.b32.xlu1 %v5479_v24, %s6713_s5  ;;  %s6820_s5 = smov 72  }
 0x5c1   : > { %1875 = vrot.lane.b32.xlu0 %v5474_v53, %s6723_s4  ;;  %1871 = vrot.lane.b32.xlu1 %v5479_v24, %s6719_s1  ;;  %s6819_s1 = smov 63  }
 0x5c5   : > { %1904 = vperm.xlu0 %4627, %v1898_v38   ;;  %1877 = vrot.lane.b32.xlu1 %v5479_v24, %s6723_s4  ;;  %s6826_s4 = smov 120  }
 0x5c9   : > { %1914 = vperm.xlu0 %4627, %v1900_v45   ;;  %1909 = vperm.xlu1 %4628, %v1899_v60  }
 0x5cd   : > { %1919 = vperm.xlu1 %4628, %v1901_v61  }
 0x5f7   : > { %v1724_v21 = vpop.permute.xlu0 %1723 }
 0x5fb   : > { %v1730_v63 = vpop.permute.xlu0 %1729  ;;  %v1726_v3 = vpop.permute.xlu1 %1725 }
 0x5fc   : > { %v1736_v8 = vsel %vm1735_vm13, %v1724_v21, %v1730_v63 }
 0x5fd   : > { %v1742_v18 = vmul.f32 %v5568_v4, %v1736_v8 }
 0x5ff   : > { %v1745_v15 = vpop.permute.xlu0 %1744  ;;  %v1732_v6 = vpop.permute.xlu1 %1731 }
 0x600   : > { %v1737_v16 = vsel %vm1735_vm13, %v1726_v3, %v1732_v6  ;;  %v5616_v3 = vrot.slane %v5564_v62, %v5034_v40 }
 0x601   : > { %v1743_v19 = vmul.f32 %v5568_v4, %v1737_v16 }
 0x603   : > { %v4341_v57 = vpack.c.bf16 %v1743_v19, %v1742_v18  ;;  %v1751_v48 = vpop.permute.xlu0 %1750  ;;  %v1747_v49 = vpop.permute.xlu1 %1746 }
 0x604   : > { %v1757_v0 = vsel %vm1756_vm15, %v1745_v15, %v1751_v48 }
 0x605   : > { %4342 = vmatpush1.bf16.msra.mxu0 %v4341_v57  ;;  %v1763_v10 = vmul.f32 %v5576_v58, %v1757_v0  ;;  %v5625_v57 = vrot.slane %v5564_v62, %v5052_v56  ;;  %v5635_v62 = vld [vmem:[%s6817_s29 + $0x8] ss:$0 sm:$0xff]  ;;  %s6754_s29 = smov 124  }
 0x606   : > { %4343 = vmatprep.subr.bf16.mxu0 %v4707_v43 }
 0x607   : > { %v1766_v33 = vpop.permute.xlu0 %1765  ;;  %v1753_v39 = vpop.permute.xlu1 %1752 }
 0x608   : > { %v1758_v32 = vsel %vm1756_vm15, %v1747_v49, %v1753_v39 }
 0x609   : > { %v1764_v47 = vmul.f32 %v5576_v58, %v1758_v32 }
 0x60b   : > { %v4344_v22 = vpack.c.bf16 %v1764_v47, %v1763_v10  ;;  %v1772_v23 = vpop.permute.xlu0 %1771  ;;  %v1768_v34 = vpop.permute.xlu1 %1767 }
 0x60c   : > { %v1778_v31 = vsel %vm1777_vm5, %v1766_v33, %v1772_v23 }
 0x60d   : > { %4345 = vmatpush1.bf16.msra.mxu0 %v4344_v22  ;;  %v1784_v5 = vmul.f32 %v5585_v30, %v1778_v31 }
 0x60e   : > { %4346 = vmatprep.subr.bf16.mxu0 %v4707_v43 }
 0x60f   : > { %v1787_v11 = vpop.permute.xlu0 %1786  ;;  %v1774_v41 = vpop.permute.xlu1 %1773 }
 0x610   : > { %v1779_v35 = vsel %vm1777_vm5, %v1768_v34, %v1774_v41 }
 0x611   : > { %v1785_v20 = vmul.f32 %v5585_v30, %v1779_v35 }
 0x613   : > { %v4347_v28 = vpack.c.bf16 %v1785_v20, %v1784_v5  ;;  %v1793_v42 = vpop.permute.xlu0 %1792  ;;  %v1789_v36 = vpop.permute.xlu1 %1788  ;;  %v1890_v5 = vld [vmem:[%s6815_s12] sm:$0xff]  ;;  %v1893_v20 = vld [vmem:[%s6815_s12 + $0x18] sm:$0xff] }
 0x614   : > { %v1798_v29 = vsel %vm879_vm1, %v1787_v11, %v1793_v42  ;;  %v1895_v42 = vld [vmem:[%s6815_s12 + $0x28] sm:$0xff] }
 0x615   : > { %4348 = vmatpush1.bf16.msra.mxu0 %v4347_v28  ;;  %v1804_v37 = vmul.f32 %v5594_v26, %v1798_v29  ;;  %v1892_v28 = vld [vmem:[%s6815_s12 + $0x10] sm:$0xff]  ;;  %v1897_v29 = vld [vmem:[%s6815_s12 + $0x38] sm:$0xff] }
 0x616   : > { %4349 = vmatprep.subr.bf16.mxu0 %v4707_v43 }
 0x617   : > { %v1807_v46 = vpop.permute.xlu0 %1806  ;;  %v1795_v50 = vpop.permute.xlu1 %1794 }
 0x618   : > { %v1799_v51 = vsel %vm879_vm1, %v1789_v36, %v1795_v50  ;;  %v1894_v36 = vld [vmem:[%s6815_s12 + $0x20] sm:$0xff] }
 0x619   : > { %v1805_v1 = vmul.f32 %v5594_v26, %v1799_v51 }
 0x61b   : > { %v4350_v7 = vpack.c.bf16 %v1805_v1, %v1804_v37  ;;  %v1813_v27 = vpop.permute.xlu0 %1812  ;;  %v1809_v44 = vpop.permute.xlu1 %1808 }
 0x61c   : > { %v1819_v54 = vsel %vm1818_vm6, %v1807_v46, %v1813_v27  ;;  %v1896_v46 = vld [vmem:[%s6815_s12 + $0x30] sm:$0xff]  ;;  %s6829_s12 = smov 119  }
 0x61d   : > { %4351 = vmatpush1.bf16.msra.mxu0 %v4350_v7  ;;  %v1825_v45 = vmul.f32 %v5603_v52, %v1819_v54 }
 0x61e   : > { %4352 = vmatprep.subr.bf16.mxu0 %v4707_v43 }
 0x61f   : > { %v1828_v55 = vpop.permute.xlu0 %1827  ;;  %v1815_v59 = vpop.permute.xlu1 %1814 }
 0x620   : > { %v1820_v38 = vsel %vm1818_vm6, %v1809_v44, %v1815_v59 }
 0x621   : > { %v1826_v60 = vmul.f32 %v5603_v52, %v1820_v38  ;;  %4354 = vmatpush1.bf16.msra.mxu0 %v4353_v25 }
 0x622   : > { %4355 = vmatprep.subr.bf16.mxu0 %v4707_v43 }
 0x623   : > { %v4356_v61 = vpack.c.bf16 %v1826_v60, %v1825_v45  ;;  %v1834_v21 = vpop.permute.xlu0 %1833  ;;  %v1830_v63 = vpop.permute.xlu1 %1829 }
 0x624   : > { %v1840_v8 = vsel %vm6762_vm8, %v1828_v55, %v1834_v21 }
 0x625   : > { %4357 = vmatpush1.bf16.msra.mxu0 %v4356_v61  ;;  %v1846_v24 = vmul.f32 %v5616_v3, %v1840_v8 }
 0x626   : > { %4358 = vmatprep.subr.bf16.mxu0 %v4707_v43 }
 0x627   : > { %v1849_v15 = vpop.permute.xlu0 %1848  ;;  %v1836_v6 = vpop.permute.xlu1 %1835 }
 0x628   : > { %v1841_v53 = vsel %vm6762_vm8, %v1830_v63, %v1836_v6 }
 0x629   : > { %v1847_v25 = vmul.f32 %v5616_v3, %v1841_v53 }
 0x62b   : > { %v4359_v16 = vpack.c.bf16 %v1847_v25, %v1846_v24  ;;  %v1855_v18 = vpop.permute.xlu0 %1854  ;;  %v1851_v19 = vpop.permute.xlu1 %1850 }
 0x62c   : > { %v1861_v48 = vsel %vm6761_vm10, %v1849_v15, %v1855_v18 }
 0x62d   : > { %4360 = vmatpush1.bf16.msra.mxu0 %v4359_v16  ;;  %v1867_v39 = vmul.f32 %v5625_v57, %v1861_v48  ;;  %v2292_v48 = vld [vmem:[%s6831_s13 + $0x8] sm:$0xff] }
 0x62e   : > { %4361 = vmatprep.subr.bf16.mxu0 %v4707_v43  ;;  %2404 = vmatprep.mubr.f32.mxu1 %v2292_v48 }
 0x62f   : > { %v1870_v49 = vpop.permute.xlu0 %1869  ;;  %v1857_v0 = vpop.permute.xlu1 %1856 }
 0x630   : > { %v1862_v33 = vsel %vm6761_vm10, %v1851_v19, %v1857_v0 }
 0x631   : > { %v1868_v32 = vmul.f32 %v5625_v57, %v1862_v33 }
 0x633   : > { %v4362_v10 = vpack.c.bf16 %v1868_v32, %v1867_v39  ;;  %v1876_v47 = vpop.permute.xlu0 %1875  ;;  %v1872_v22 = vpop.permute.xlu1 %1871 }
 0x634   : > { %v1882_v23 = vsel %vm6759_vm12, %v1870_v49, %v1876_v47 }
 0x635   : > { %4363 = vmatpush1.bf16.msra.mxu0 %v4362_v10  ;;  %v1888_v11 = vmul.f32 %v5635_v62, %v1882_v23 }
 0x636   : > { %4364 = vmatprep.subr.bf16.mxu0 %v4707_v43 }
 0x637   : > { %v1878_v34 = vpop.permute.xlu1 %1877 }
 0x638   : > { %v1883_v31 = vsel %vm6759_vm12, %v1872_v22, %v1878_v34  ;;  %v2293_v22 = vld [vmem:[%s6831_s13 + $0x10] sm:$0xff] }
 0x639   : > { %v1889_v41 = vmul.f32 %v5635_v62, %v1883_v31  ;;  %v2303_v31 = vld [vmem:[%s6833_s21] sm:$0xff] }
 0x63b   : > { %v4365_v35 = vpack.c.bf16 %v1889_v41, %v1888_v11 }
 0x63d   : > { %4366 = vmatpush1.bf16.msra.mxu0 %v4365_v35 }
 0x640   : > { %1999 = vmatmul.mubr.f32.vlgmr.msra.gmra.mrb[6].mxu0 %v1890_v5 }
 0x641   : > { %3983 = vmatprep.mubr.msk.f32.mxu0 %vm839_vm2, %v1893_v20  ;;  %v2304_v20 = vld [vmem:[%s6833_s21 + $0x8] sm:$0xff] }
 0x644   : > { %2004 = vmatmul.mubr.f32.gmra.mrb[8].mxu0 %v1892_v28  ;;  %v1905_v50 = vpop.permute.xlu0 %1904  ;;  %v2305_v28 = vld [vmem:[%s6833_s21 + $0x10] sm:$0xff] }
 0x645   : > { %3984 = vmatprep.mubr.msk.f32.mxu0 %vm839_vm2, %v1895_v42 }
 0x648   : > { %2009 = vmatmul.mubr.f32.gmra.mrb[10].mxu0 %v1894_v36  ;;  %v1910_v27 = vpop.permute.xlu1 %1909  ;;  %v1915_v15 = vpop.permute.xlu0 %1914 }
 0x649   : > { %3985 = vmatprep.mubr.msk.f32.mxu0 %vm839_vm2, %v1897_v29  ;;  %v2306_v29 = vld [vmem:[%s6833_s21 + $0x18] sm:$0xff]  ;;  %s6748_s21 = smov 4  }
 0x64c   : > { %2014 = vmatmul.mubr.f32.gmra.mrb[12].mxu0 %v1896_v46  ;;  %v1920_v53 = vpop.permute.xlu1 %1919 }
 0x64d   : > { %4179 = vmatprep.mubr.msk.f32.mxu0 %vm2327_vm11, %v2293_v22 }
 0x713   : > { %v2000_v51 = vpop.f32.mrb[6].mxu0 }
 0x714   : > { %v2001_v37 = vadd.f32 %v2000_v51, %v1905_v50  ;;  %v2002_v1 = vpop.f32.mrb[7].mxu0 }
 0x716   : > { %vm2019_vm14 = vcmp.ge.f32.partialorder %v2001_v37, 0.0  ;;  %v2023_v7 = vmul.f32 -0.2, %v2001_v37 }
 0x717   : > { %v2005_v44 = vpop.f32.mrb[8].mxu0 }
 0x718   : > { %v5666_v54 = vsel %vm2019_vm14, %v2001_v37, %v2023_v7  ;;  %v2006_v55 = vadd.f32 %v2005_v44, %v1910_v27  ;;  %v2007_v59 = vpop.f32.mrb[9].mxu0  ;;  %vm6758_vm14 = vcmask 523264  }
 0x719   : > { %2035 = vrot.lane.b32.xlu0 %v5666_v54, %s6725_s2 }
 0x71a   : > { %vm2020_vm3 = vcmp.ge.f32.partialorder %v2006_v55, 0.0  ;;  %v2024_v38 = vmul.f32 -0.2, %v2006_v55 }
 0x71b   : > { %v2010_v45 = vpop.f32.mrb[10].mxu0 }
 0x71c   : > { %v5670_v60 = vsel %vm2020_vm3, %v2006_v55, %v2024_v38  ;;  %v2012_v61 = vpop.f32.mrb[11].mxu0  ;;  %v2011_v6 = vadd.f32 %v2010_v45, %v1915_v15 }
 0x71d   : > { %2037 = vrot.lane.b32.xlu1 %v5670_v60, %s6725_s2  ;;  %2047 = vrot.lane.b32.xlu0 %v5666_v54, %s6818_s0  ;;  %v4367_v21 = vpack.c.bf16 %v5670_v60, %v5666_v54  ;;  %s6827_s2 = smov 56  }
 0x71e   : > { %v2025_v24 = vmul.f32 -0.2, %v2011_v6  ;;  %vm2021_vm4 = vcmp.ge.f32.partialorder %v2011_v6, 0.0 }
 0x71f   : > { %v2015_v63 = vpop.f32.mrb[12].mxu0  ;;  %4368 = vmatprep.subr.bf16.mxu1 %v4367_v21 }
 0x720   : > { %v2017_v8 = vpop.f32.mrb[13].mxu0  ;;  %v2016_v25 = vadd.f32 %v2015_v63, %v1920_v53  ;;  %v2029_v16 = vsel %vm2021_vm4, %v2011_v6, %v2025_v24 }
 0x721   : > { %2049 = vrot.lane.b32.xlu1 %v5670_v60, %s6818_s0  ;;  %2163 = vrot.lane.b32.xlu0 %v5666_v54, %s6802_s30 }
 0x722   : > { %v2026_v18 = vmul.f32 -0.2, %v2016_v25  ;;  %vm2022_vm9 = vcmp.ge.f32.partialorder %v2016_v25, 0.0 }
 0x724   : > { %v2030_v19 = vsel %vm2022_vm9, %v2016_v25, %v2026_v18 }
 0x725   : > { %2165 = vrot.lane.b32.xlu1 %v5670_v60, %s6802_s30  ;;  %2175 = vrot.lane.b32.xlu0 %v5666_v54, %s6819_s1  ;;  %v4371_v5 = vpack.c.bf16 %v2030_v19, %v2029_v16 }
 0x729   : > { %2177 = vrot.lane.b32.xlu1 %v5670_v60, %s6819_s1  ;;  %2067 = vrot.lane.b32.xlu0 %v5666_v54, %s6820_s5 }
 0x72d   : > { %2069 = vrot.lane.b32.xlu1 %v5670_v60, %s6820_s5  ;;  %2079 = vrot.lane.b32.xlu0 %v5666_v54, %s6821_s6 }
 0x731   : > { %2081 = vrot.lane.b32.xlu1 %v5670_v60, %s6821_s6  ;;  %2195 = vrot.lane.b32.xlu0 %v5666_v54, %s6822_s28 }
 0x735   : > { %2197 = vrot.lane.b32.xlu1 %v5670_v60, %s6822_s28  ;;  %2207 = vrot.lane.b32.xlu0 %v5666_v54, %s6823_s26 }
 0x739   : > { %2209 = vrot.lane.b32.xlu1 %v5670_v60, %s6823_s26  ;;  %2099 = vrot.lane.b32.xlu0 %v5666_v54, %s6824_s27 }
 0x73d   : > { %2101 = vrot.lane.b32.xlu1 %v5670_v60, %s6824_s27  ;;  %2111 = vrot.lane.b32.xlu0 %v5666_v54, %s6825_s8 }
 0x741   : > { %2113 = vrot.lane.b32.xlu1 %v5670_v60, %s6825_s8  ;;  %2227 = vrot.lane.b32.xlu0 %v5666_v54, %s6826_s4 }
 0x745   : > { %2229 = vrot.lane.b32.xlu1 %v5670_v60, %s6826_s4  ;;  %2239 = vrot.lane.b32.xlu0 %v5666_v54, %s6827_s2 }
 0x749   : > { %2241 = vrot.lane.b32.xlu1 %v5670_v60, %s6827_s2  ;;  %2131 = vrot.lane.b32.xlu0 %v5666_v54, %s6828_s11 }
 0x74d   : > { %2133 = vrot.lane.b32.xlu1 %v5670_v60, %s6828_s11  ;;  %2143 = vrot.lane.b32.xlu0 %v5666_v54, %s6806_s10 }
 0x751   : > { %2145 = vrot.lane.b32.xlu1 %v5670_v60, %s6806_s10  ;;  %2259 = vrot.lane.b32.xlu0 %v5666_v54, %s6829_s12 }
 0x755   : > { %2261 = vrot.lane.b32.xlu1 %v5670_v60, %s6829_s12  ;;  %2039 = vrot.lane.b32.xlu0 %v2029_v16, %s6830_s18 }
 0x759   : > { %2041 = vrot.lane.b32.xlu1 %v2030_v19, %s6830_s18  ;;  %2051 = vrot.lane.b32.xlu0 %v2029_v16, %s6818_s0 }
 0x75d   : > { %2053 = vrot.lane.b32.xlu1 %v2030_v19, %s6818_s0  ;;  %2167 = vrot.lane.b32.xlu0 %v2029_v16, %s6802_s30 }
 0x761   : > { %2169 = vrot.lane.b32.xlu1 %v2030_v19, %s6802_s30  ;;  %2179 = vrot.lane.b32.xlu0 %v2029_v16, %s6819_s1 }
 0x765   : > { %2181 = vrot.lane.b32.xlu1 %v2030_v19, %s6819_s1  ;;  %2071 = vrot.lane.b32.xlu0 %v2029_v16, %s6820_s5 }
 0x769   : > { %2073 = vrot.lane.b32.xlu1 %v2030_v19, %s6820_s5  ;;  %2083 = vrot.lane.b32.xlu0 %v2029_v16, %s6821_s6 }
 0x76d   : > { %2085 = vrot.lane.b32.xlu1 %v2030_v19, %s6821_s6  ;;  %2199 = vrot.lane.b32.xlu0 %v2029_v16, %s6822_s28 }
 0x771   : > { %2201 = vrot.lane.b32.xlu1 %v2030_v19, %s6822_s28  ;;  %2211 = vrot.lane.b32.xlu0 %v2029_v16, %s6823_s26 }
 0x775   : > { %2213 = vrot.lane.b32.xlu1 %v2030_v19, %s6823_s26  ;;  %2103 = vrot.lane.b32.xlu0 %v2029_v16, %s6824_s27 }
 0x779   : > { %2105 = vrot.lane.b32.xlu1 %v2030_v19, %s6824_s27  ;;  %2115 = vrot.lane.b32.xlu0 %v2029_v16, %s6825_s8 }
 0x77d   : > { %2117 = vrot.lane.b32.xlu1 %v2030_v19, %s6825_s8  ;;  %2231 = vrot.lane.b32.xlu0 %v2029_v16, %s6826_s4 }
 0x781   : > { %2233 = vrot.lane.b32.xlu1 %v2030_v19, %s6826_s4  ;;  %2243 = vrot.lane.b32.xlu0 %v2029_v16, %s6827_s2 }
 0x785   : > { %2245 = vrot.lane.b32.xlu1 %v2030_v19, %s6827_s2  ;;  %2135 = vrot.lane.b32.xlu0 %v2029_v16, %s6828_s11 }
 0x789   : > { %2137 = vrot.lane.b32.xlu1 %v2030_v19, %s6828_s11  ;;  %2147 = vrot.lane.b32.xlu0 %v2029_v16, %s6806_s10 }
 0x78b   : > { %v2036_v49 = vpop.permute.xlu0 %2035 }
 0x78d   : > { %2149 = vrot.lane.b32.xlu1 %v2030_v19, %s6806_s10  ;;  %2271 = vrot.lane.b32.xlu0 %v5666_v54, %s6832_s3 }
 0x78f   : > { %v2038_v0 = vpop.permute.xlu1 %2037  ;;  %v2048_v33 = vpop.permute.xlu0 %2047 }
 0x790   : > { %v2059_v39 = vsel %vm1735_vm13, %v2036_v49, %v2048_v33 }
 0x791   : > { %2273 = vrot.lane.b32.xlu1 %v5670_v60, %s6832_s3  ;;  %2263 = vrot.lane.b32.xlu0 %v2029_v16, %s6829_s12  ;;  %v2063_v23 = vmul.f32 %v2059_v39, %v5568_v4 }
 0x793   : > { %v2050_v32 = vpop.permute.xlu1 %2049  ;;  %v2164_v10 = vpop.permute.xlu0 %2163 }
 0x794   : > { %v2060_v47 = vsel %vm1735_vm13, %v2038_v0, %v2050_v32 }
 0x795   : > { %v2064_v34 = vmul.f32 %v2060_v47, %v5568_v4  ;;  %2265 = vrot.lane.b32.xlu1 %v2030_v19, %s6829_s12  ;;  %2275 = vrot.lane.b32.xlu0 %v2029_v16, %s6832_s3  ;;  %s6736_s12 = smov 115  }
 0x797   : > { %v4369_v11 = vpack.c.bf16 %v2064_v34, %v2063_v23  ;;  %v2166_v41 = vpop.permute.xlu1 %2165  ;;  %v2176_v35 = vpop.permute.xlu0 %2175 }
 0x798   : > { %v2187_v48 = vsel %vm1818_vm6, %v2164_v10, %v2176_v35 }
 0x799   : > { %2277 = vrot.lane.b32.xlu1 %v2030_v19, %s6832_s3  ;;  %2309 = vperm.xlu0 %4627, %v2303_v31   ;;  %v2191_v23 = vmul.f32 %v2187_v48, %v5603_v52  ;;  %s6734_s3 = smov 125  }
 0x79a   : > { %4370 = vmatpush3.bf16.msra.mxu1 %v4369_v11 }
 0x79b   : > { %4372 = vmatprep.subr.bf16.mxu1 %v4371_v5  ;;  %v2178_v42 = vpop.permute.xlu1 %2177  ;;  %v2068_v36 = vpop.permute.xlu0 %2067 }
 0x79c   : > { %v2188_v18 = vsel %vm1818_vm6, %v2166_v41, %v2178_v42 }
 0x79d   : > { %2314 = vperm.xlu1 %4628, %v2304_v20   ;;  %2319 = vperm.xlu0 %4627, %v2305_v28   ;;  %v2192_v33 = vmul.f32 %v2188_v18, %v5603_v52 }
 0x79f   : > { %v2070_v46 = vpop.permute.xlu1 %2069  ;;  %v2080_v50 = vpop.permute.xlu0 %2079  ;;  %v4375_v35 = vpack.c.bf16 %v2192_v33, %v2191_v23 }
 0x7a0   : > { %v2091_v34 = vsel %vm1756_vm15, %v2068_v36, %v2080_v50 }
 0x7a1   : > { %2324 = vperm.xlu1 %4628, %v2306_v29   ;;  %v2095_v5 = vmul.f32 %v2091_v34, %v5576_v58 }
 0x7a3   : > { %v2082_v51 = vpop.permute.xlu1 %2081  ;;  %v2196_v37 = vpop.permute.xlu0 %2195 }
 0x7a4   : > { %v2092_v39 = vsel %vm1756_vm15, %v2070_v46, %v2082_v51 }
 0x7a5   : > { %v2096_v31 = vmul.f32 %v2092_v39, %v5576_v58 }
 0x7a7   : > { %v2198_v1 = vpop.permute.xlu1 %2197  ;;  %v2208_v7 = vpop.permute.xlu0 %2207  ;;  %v4377_v28 = vpack.c.bf16 %v2096_v31, %v2095_v5 }
 0x7ab   : > { %v2210_v27 = vpop.permute.xlu1 %2209  ;;  %v2100_v44 = vpop.permute.xlu0 %2099 }
 0x7af   : > { %v2102_v54 = vpop.permute.xlu1 %2101  ;;  %v2112_v55 = vpop.permute.xlu0 %2111 }
 0x7b3   : > { %v2114_v59 = vpop.permute.xlu1 %2113  ;;  %v5791_v38 = vpop.permute.xlu0 %2227 }
 0x7b4   : > { %v2124_v33 = vsel %vm1777_vm5, %v2102_v54, %v2114_v59 }
 0x7b7   : > { %v5793_v45 = vpop.permute.xlu1 %2229  ;;  %v5795_v60 = vpop.permute.xlu0 %2239 }
 0x7bb   : > { %v5797_v61 = vpop.permute.xlu1 %2241  ;;  %v5799_v21 = vpop.permute.xlu0 %2131 }
 0x7bf   : > { %v5801_v63 = vpop.permute.xlu1 %2133  ;;  %v5803_v8 = vpop.permute.xlu0 %2143 }
 0x7c3   : > { %v5805_v15 = vpop.permute.xlu1 %2145  ;;  %v5807_v6 = vpop.permute.xlu0 %2259 }
 0x7c7   : > { %v5809_v53 = vpop.permute.xlu1 %2261  ;;  %v2040_v24 = vpop.permute.xlu0 %2039 }
 0x7cb   : > { %v2042_v25 = vpop.permute.xlu1 %2041  ;;  %v2052_v16 = vpop.permute.xlu0 %2051 }
 0x7cc   : > { %v2061_v19 = vsel %vm1735_vm13, %v2040_v24, %v2052_v16  ;;  %v2220_v16 = vsel %vm6762_vm8, %v2198_v1, %v2210_v27  ;;  %v2123_v1 = vsel %vm1777_vm5, %v2100_v44, %v2112_v55  ;;  %v2128_v27 = vmul.f32 %v2124_v33, %v5585_v30 }
 0x7cd   : > { %v2065_v47 = vmul.f32 %v2061_v19, %v5568_v4  ;;  %v2219_v19 = vsel %vm6762_vm8, %v2196_v37, %v2208_v7  ;;  %v2127_v31 = vmul.f32 %v2123_v1, %v5585_v30 }
 0x7cf   : > { %v2054_v49 = vpop.permute.xlu1 %2053  ;;  %v2168_v0 = vpop.permute.xlu0 %2167  ;;  %v4385_v59 = vpack.c.bf16 %v2128_v27, %v2127_v31 }
 0x7d0   : > { %v2062_v32 = vsel %vm1735_vm13, %v2042_v25, %v2054_v49 }
 0x7d1   : > { %v2066_v22 = vmul.f32 %v2062_v32, %v5568_v4 }
 0x7d3   : > { %v4373_v11 = vpack.c.bf16 %v2066_v22, %v2065_v47  ;;  %v2170_v10 = vpop.permute.xlu1 %2169  ;;  %v2180_v41 = vpop.permute.xlu0 %2179  ;;  %v2223_v22 = vmul.f32 %v2219_v19, %v5616_v3 }
 0x7d4   : > { %v2189_v20 = vsel %vm1818_vm6, %v2168_v0, %v2180_v41  ;;  %v2224_v0 = vmul.f32 %v2220_v16, %v5616_v3 }
 0x7d5   : > { %4374 = vmatpush3.bf16.msra.mxu1 %v4373_v11  ;;  %v2193_v51 = vmul.f32 %v2189_v20, %v5603_v52 }
 0x7d6   : > { %4376 = vmatprep.subr.bf16.mxu1 %v4375_v35  ;;  %v4383_v34 = vpack.c.bf16 %v2224_v0, %v2223_v22 }
 0x7d7   : > { %v2182_v42 = vpop.permute.xlu1 %2181  ;;  %v2072_v29 = vpop.permute.xlu0 %2071 }
 0x7d8   : > { %v2190_v46 = vsel %vm1818_vm6, %v2170_v10, %v2182_v42 }
 0x7d9   : > { %v2194_v36 = vmul.f32 %v2190_v46, %v5603_v52  ;;  %4378 = vmatpush3.bf16.msra.mxu1 %v4377_v28  ;;  %v2252_v28 = vsel %vm6761_vm10, %v5793_v45, %v5797_v61 }
 0x7db   : > { %v2074_v50 = vpop.permute.xlu1 %2073  ;;  %v2084_v24 = vpop.permute.xlu0 %2083  ;;  %v4379_v25 = vpack.c.bf16 %v2194_v36, %v2193_v51  ;;  %v2256_v36 = vmul.f32 %v2252_v28, %v5625_v57 }
 0x7dc   : > { %v2093_v18 = vsel %vm1756_vm15, %v2072_v29, %v2084_v24  ;;  %v2251_v29 = vsel %vm6761_vm10, %v5791_v38, %v5795_v60  ;;  %v2155_v38 = vsel %vm879_vm1, %v5799_v21, %v5803_v8 }
 0x7dd   : > { %4380 = vmatprep.subr.bf16.mxu1 %v4379_v25  ;;  %v2097_v32 = vmul.f32 %v2093_v18, %v5576_v58  ;;  %v2255_v61 = vmul.f32 %v2251_v29, %v5625_v57 }
 0x7df   : > { %v2086_v48 = vpop.permute.xlu1 %2085  ;;  %v2200_v49 = vpop.permute.xlu0 %2199 }
 0x7e0   : > { %v2094_v39 = vsel %vm1756_vm15, %v2074_v50, %v2086_v48  ;;  %v2156_v50 = vsel %vm879_vm1, %v5801_v63, %v5805_v15  ;;  %v4391_v48 = vpack.c.bf16 %v2256_v36, %v2255_v61  ;;  %v2159_v63 = vmul.f32 %v2155_v38, %v5594_v26  ;;  %v2299_v61 = vld [vmem:[%s6831_s13 + $0x40] sm:$0xff]  ;;  %v2302_v38 = vld [vmem:[%s6831_s13 + $0x58] sm:$0xff] }
 0x7e1   : > { %v2098_v47 = vmul.f32 %v2094_v39, %v5576_v58  ;;  %v2160_v60 = vmul.f32 %v2156_v50, %v5594_v26  ;;  %v2297_v50 = vld [vmem:[%s6831_s13 + $0x30] sm:$0xff] }
 0x7e3   : > { %v4381_v23 = vpack.c.bf16 %v2098_v47, %v2097_v32  ;;  %v2202_v37 = vpop.permute.xlu1 %2201  ;;  %v2212_v7 = vpop.permute.xlu0 %2211 }
 0x7e4   : > { %v2221_v54 = vsel %vm6762_vm8, %v2200_v49, %v2212_v7  ;;  %v4393_v49 = vpack.c.bf16 %v2160_v60, %v2159_v63  ;;  %v2522_v60 = vld [vmem:[%s6834_s25] sm:$0xff] }
 0x7e5   : > { %4382 = vmatpush3.bf16.msra.mxu1 %v4381_v23  ;;  %v2225_v35 = vmul.f32 %v2221_v54, %v5616_v3 }
 0x7e6   : > { %4384 = vmatprep.subr.bf16.mxu1 %v4383_v34 }
 0x7e7   : > { %v2214_v11 = vpop.permute.xlu1 %2213  ;;  %v2104_v10 = vpop.permute.xlu0 %2103 }
 0x7e8   : > { %v2222_v41 = vsel %vm6762_vm8, %v2202_v37, %v2214_v11 }
 0x7e9   : > { %v2226_v44 = vmul.f32 %v2222_v41, %v5616_v3  ;;  %4386 = vmatpush3.bf16.msra.mxu1 %v4385_v59 }
 0x7eb   : > { %v2106_v55 = vpop.permute.xlu1 %2105  ;;  %v2116_v5 = vpop.permute.xlu0 %2115  ;;  %v4387_v20 = vpack.c.bf16 %v2226_v44, %v2225_v35  ;;  %v2291_v44 = vld [vmem:[%s6831_s13] sm:$0xff] }
 0x7ec   : > { %v2125_v42 = vsel %vm1777_vm5, %v2104_v10, %v2116_v5 }
 0x7ed   : > { %4388 = vmatprep.subr.bf16.mxu1 %v4387_v20  ;;  %v2129_v25 = vmul.f32 %v2125_v42, %v5585_v30  ;;  %v2298_v42 = vld [vmem:[%s6831_s13 + $0x38] sm:$0xff] }
 0x7ef   : > { %v2118_v46 = vpop.permute.xlu1 %2117  ;;  %v2232_v51 = vpop.permute.xlu0 %2231 }
 0x7f0   : > { %v2126_v24 = vsel %vm1777_vm5, %v2106_v55, %v2118_v46  ;;  %v2295_v55 = vld [vmem:[%s6831_s13 + $0x20] sm:$0xff] }
 0x7f1   : > { %v2130_v45 = vmul.f32 %v2126_v24, %v5585_v30  ;;  %v2301_v24 = vld [vmem:[%s6831_s13 + $0x50] sm:$0xff] }
 0x7f3   : > { %v4389_v16 = vpack.c.bf16 %v2130_v45, %v2129_v25  ;;  %v2234_v18 = vpop.permute.xlu1 %2233  ;;  %v2244_v19 = vpop.permute.xlu0 %2243  ;;  %v2300_v45 = vld [vmem:[%s6831_s13 + $0x48] sm:$0xff] }
 0x7f4   : > { %v2253_v15 = vsel %vm6761_vm10, %v2232_v51, %v2244_v19  ;;  %v2524_v19 = vld [vmem:[%s6834_s25 + $0x10] sm:$0xff] }
 0x7f5   : > { %4390 = vmatpush3.bf16.msra.mxu1 %v4389_v16  ;;  %v2257_v32 = vmul.f32 %v2253_v15, %v5625_v57  ;;  %v2523_v16 = vld [vmem:[%s6834_s25 + $0x8] sm:$0xff]  ;;  %v2526_v15 = vld [vmem:[%s6834_s25 + $0x20] sm:$0xff] }
 0x7f6   : > { %4392 = vmatprep.subr.bf16.mxu1 %v4391_v48  ;;  %v2525_v48 = vld [vmem:[%s6834_s25 + $0x18] sm:$0xff] }
 0x7f7   : > { %v2246_v0 = vpop.permute.xlu1 %2245  ;;  %v2136_v33 = vpop.permute.xlu0 %2135  ;;  %v4411_v63 = vpack.c.bf16 %v2525_v48, %v2524_v19 }
 0x7f8   : > { %v2254_v39 = vsel %vm6761_vm10, %v2234_v18, %v2246_v0  ;;  %v4407_v18 = vpack.c.bf16 %v2523_v16, %v2522_v60 }
 0x7f9   : > { %v2258_v21 = vmul.f32 %v2254_v39, %v5625_v57  ;;  %4394 = vmatpush3.bf16.msra.mxu1 %v4393_v49  ;;  %v2527_v49 = vld [vmem:[%s6834_s25 + $0x28] sm:$0xff]  ;;  %v2529_v39 = vld [vmem:[%s6834_s25 + $0x38] sm:$0xff] }
 0x7fa   : > { %v4415_v0 = vpack.c.bf16 %v2527_v49, %v2526_v15  ;;  %v2929_v15 = vld [vmem:[%s6650_s14 + $0x8] sm:$0xff] }
 0x7fb   : > { %v2138_v8 = vpop.permute.xlu1 %2137  ;;  %v2148_v47 = vpop.permute.xlu0 %2147  ;;  %v4395_v22 = vpack.c.bf16 %v2258_v21, %v2257_v32 }
 0x7fc   : > { %v2157_v1 = vsel %vm879_vm1, %v2136_v33, %v2148_v47  ;;  %v2528_v33 = vld [vmem:[%s6834_s25 + $0x30] sm:$0xff]  ;;  %s6843_s25 = smov 5  }
 0x7fd   : > { %4396 = vmatprep.subr.bf16.mxu1 %v4395_v22  ;;  %v2161_v7 = vmul.f32 %v2157_v1, %v5594_v26  ;;  %v4419_v32 = vpack.c.bf16 %v2529_v39, %v2528_v33 }
 0x7ff   : > { %v2150_v27 = vpop.permute.xlu1 %2149  ;;  %v2272_v23 = vpop.permute.xlu0 %2271 }
 0x800   : > { %v2158_v37 = vsel %vm879_vm1, %v2138_v8, %v2150_v27  ;;  %v2283_v31 = vsel %vm6759_vm12, %v5807_v6, %v2272_v23 }
 0x801   : > { %v2162_v34 = vmul.f32 %v2158_v37, %v5594_v26  ;;  %v2287_v41 = vmul.f32 %v5635_v62, %v2283_v31 }
 0x803   : > { %v4397_v54 = vpack.c.bf16 %v2162_v34, %v2161_v7  ;;  %v2274_v59 = vpop.permute.xlu1 %2273  ;;  %v2264_v11 = vpop.permute.xlu0 %2263 }
 0x804   : > { %v2284_v10 = vsel %vm6759_vm12, %v5809_v53, %v2274_v59  ;;  %v2294_v53 = vld [vmem:[%s6831_s13 + $0x18] sm:$0xff] }
 0x805   : > { %v2288_v35 = vmul.f32 %v5635_v62, %v2284_v10  ;;  %4398 = vmatpush3.bf16.msra.mxu1 %v4397_v54 }
 0x806   : > { %4408 = vmatprep.subr.bf16.mxu1 %v4407_v18 }
 0x807   : > { %v2266_v6 = vpop.permute.xlu1 %2265  ;;  %v2276_v5 = vpop.permute.xlu0 %2275  ;;  %v4399_v20 = vpack.c.bf16 %v2288_v35, %v2287_v41 }
 0x808   : > { %2405 = vmatmul.mubr.f32.vlgmr.msra.gmra.mrb[8].mxu1 %v2291_v44  ;;  %v2285_v28 = vsel %vm6759_vm12, %v2264_v11, %v2276_v5 }
 0x809   : > { %4400 = vmatprep.subr.bf16.mxu0 %v4399_v20  ;;  %2409 = vmatprep.mubr.f32.mxu1 %v2295_v55  ;;  %v2289_v51 = vmul.f32 %v5635_v62, %v2285_v28 }
 0x80a   : > { %4402 = vmatpush3.bf16.msra.mxu0 %v4399_v20  ;;  %4410 = vmatpush3.bf16.msra.mxu1 %v4407_v18 }
 0x80b   : > { %v2278_v29 = vpop.permute.xlu1 %2277  ;;  %4412 = vmatprep.subr.bf16.mxu1 %v4411_v63 }
 0x80c   : > { %v2286_v46 = vsel %vm6759_vm12, %v2266_v6, %v2278_v29  ;;  %2410 = vmatmul.mubr.f32.gmra.mrb[10].mxu1 %v2294_v53  ;;  %vm2878_vm12 = vcmask 97280  }
 0x80d   : > { %v2290_v36 = vmul.f32 %v5635_v62, %v2286_v46  ;;  %2414 = vmatprep.mubr.f32.mxu1 %v2298_v42  ;;  %v2296_v62 = vld [vmem:[%s6831_s13 + $0x28] sm:$0xff]  ;;  %s6844_s13 = smov 116  }
 0x80e   : > { %4414 = vmatpush3.bf16.msra.mxu1 %v4411_v63 }
 0x80f   : > { %v4403_v25 = vpack.c.bf16 %v2290_v36, %v2289_v51  ;;  %4416 = vmatprep.subr.bf16.mxu1 %v4415_v0 }
 0x810   : > { %2415 = vmatmul.mubr.f32.gmra.mrb[12].mxu1 %v2297_v50 }
 0x811   : > { %4404 = vmatprep.subr.bf16.mxu0 %v4403_v25  ;;  %2419 = vmatprep.mubr.f32.mxu1 %v2301_v24 }
 0x812   : > { %4406 = vmatpush3.bf16.msra.mxu0 %v4403_v25  ;;  %4418 = vmatpush3.bf16.msra.mxu1 %v4415_v0 }
 0x813   : > { %4420 = vmatprep.subr.bf16.mxu1 %v4419_v32 }
 0x814   : > { %2420 = vmatmul.mubr.f32.gmra.mrb[14].mxu1 %v2300_v45 }
 0x815   : > { %4180 = vmatmul.mubr.msk.f32.vlgmr.msra.gmra.mrb[14].mxu0 %vm2327_vm11, %v2296_v62 }
 0x816   : > { %4182 = vmatprep.mubr.msk.f32.mxu0 %vm2327_vm11, %v2299_v61  ;;  %4422 = vmatpush3.bf16.msra.mxu1 %v4419_v32 }
 0x818   : > { %v2310_v34 = vpop.permute.xlu0 %2309 }
 0x819   : > { %4183 = vmatmul.mubr.msk.f32.gmra.mrb[16].mxu0 %vm2327_vm11, %v2302_v38 }
 0x81a   : > { %3016 = vmatprep.mubr.f32.mxu0 %v2929_v15 }
 0x81c   : > { %v2315_v37 = vpop.permute.xlu1 %2314  ;;  %v2320_v20 = vpop.permute.xlu0 %2319 }
 0x820   : > { %v2325_v6 = vpop.permute.xlu1 %2324 }
 0x8db   : > { %v4081_v21 = vpop.f32.mrb[8].mxu1 }
 0x8dc   : > { %v4082_v8 = vpop.f32.mrb[9].mxu1 }
 0x8dd   : > { %v4083_v47 = vadd.f32 %v4082_v8, %v4081_v21  ;;  %v2930_v21 = vld [vmem:[%s6650_s14 + $0x10] sm:$0xff] }
 0x8df   : > { %v4084_v22 = vpop.f32.mrb[10].mxu1  ;;  %v2407_v41 = vadd.f32 %v4083_v47, %v2310_v34 }
 0x8e0   : > { %v4085_v1 = vpop.f32.mrb[11].mxu1 }
 0x8e1   : > { %v4086_v27 = vadd.f32 %v4085_v1, %v4084_v22 }
 0x8e3   : > { %v4087_v23 = vpop.f32.mrb[12].mxu1  ;;  %v2412_v59 = vadd.f32 %v4086_v27, %v2315_v37 }
 0x8e4   : > { %v4088_v7 = vpop.f32.mrb[13].mxu1 }
 0x8e5   : > { %v4089_v31 = vadd.f32 %v4088_v7, %v4087_v23  ;;  %v2935_v7 = vld [vmem:[%s6841_s22 + $0x8] sm:$0xff] }
 0x8e7   : > { %v4090_v54 = vpop.f32.mrb[14].mxu1  ;;  %v2417_v46 = vadd.f32 %v4089_v31, %v2320_v20  ;;  %v2934_v31 = vld [vmem:[%s6841_s22] sm:$0xff]  ;;  %s6842_s22 = smov 117  }
 0x8e8   : > { %v4091_v11 = vpop.f32.mrb[15].mxu1  ;;  %v4181_v10 = vpop.f32.mrb[14].mxu0 }
 0x8e9   : > { %v4092_v35 = vadd.f32 %v4091_v11, %v4090_v54  ;;  %v2497_v44 = vadd.f32 %v4181_v10, %v2412_v59  ;;  %v2491_v55 = vpop.f32.mrb[15].mxu0 }
 0x8ea   : > { %v2492_v5 = vadd.f32 %v2491_v55, %v2407_v41 }
 0x8eb   : > { %v2515_v53 = vmul.f32 -0.2, %v2497_v44  ;;  %v2422_v28 = vadd.f32 %v4092_v35, %v2325_v6  ;;  %vm2511_vm3 = vcmp.ge.f32.partialorder %v2497_v44, 0.0 }
 0x8ec   : > { %vm2510_vm4 = vcmp.ge.f32.partialorder %v2492_v5, 0.0  ;;  %v2514_v42 = vmul.f32 -0.2, %v2492_v5  ;;  %v4184_v29 = vpop.f32.mrb[16].mxu0 }
 0x8ed   : > { %v2507_v51 = vadd.f32 %v4184_v29, %v2422_v28  ;;  %v2501_v36 = vpop.f32.mrb[17].mxu0  ;;  %v2519_v25 = vsel %vm2511_vm3, %v2497_v44, %v2515_v53  ;;  %vm2915_vm3 = vcmask 89088  }
 0x8ee   : > { %v2502_v50 = vadd.f32 %v2501_v36, %v2417_v46  ;;  %v2518_v24 = vsel %vm2510_vm4, %v2492_v5, %v2514_v42  ;;  %vm2695_vm4 = vcmask 31744  }
 0x8ef   : > { %v2517_v45 = vmul.f32 -0.2, %v2507_v51  ;;  %4201 = vmatprep.mubr.msk.f32.mxu1 %vm6758_vm14, %v2518_v24  ;;  %vm2513_vm9 = vcmp.ge.f32.partialorder %v2507_v51, 0.0 }
 0x8f0   : > { %vm2512_vm7 = vcmp.ge.f32.partialorder %v2502_v50, 0.0  ;;  %v2516_v62 = vmul.f32 -0.2, %v2502_v50  ;;  %4202 = vmatmul.mubr.msk.f32.vlgmr.msra.gmra.mrb[16].mxu1 %vm6758_vm14, %v2519_v25 }
 0x8f1   : > { %v2521_v38 = vsel %vm2513_vm9, %v2507_v51, %v2517_v45  ;;  %vm2841_vm9 = vcmask 105472  }
 0x8f2   : > { %v2520_v61 = vsel %vm2512_vm7, %v2502_v50, %v2516_v62  ;;  %vm2658_vm7 = vcmask 39936  }
 0x8f3   : > { %4204 = vmatprep.mubr.msk.f32.mxu1 %vm6758_vm14, %v2520_v61 }
 0x8f4   : > { %4205 = vmatmul.mubr.msk.f32.gmra.mrb[18].mxu1 %vm6758_vm14, %v2521_v38  ;;  %vm2732_vm14 = vcmask 23552  }
 0x8f5   : > { %4215 = vmatprep.mubr.msk.f32.mxu1 %vm2327_vm11, %v2930_v21 }
 0x9c3   : > { %v4203_v60 = vpop.f32.mrb[16].mxu1 }
 0x9c4   : > { %2636 = vrot.lane.b32.xlu1 %v4203_v60, %s6742_s19  ;;  %v2609_v16 = vpop.f32.mrb[17].mxu1 }
 0x9c5   : > { %2634 = vrot.lane.b32.xlu0 %v2609_v16, %s6742_s19  ;;  %v4423_v18 = vpack.c.bf16 %v4203_v60, %v2609_v16 }
 0x9c7   : > { %v5944_v19 = vpop.f32.mrb[18].mxu1  ;;  %4424 = vmatprep.subr.bf16.mxu0 %v4423_v18 }
 0x9c8   : > { %2648 = vrot.lane.b32.xlu1 %v4203_v60, %s6740_s20  ;;  %v5947_v48 = vpop.f32.mrb[19].mxu1 }
 0x9c9   : > { %2646 = vrot.lane.b32.xlu0 %v2609_v16, %s6740_s20  ;;  %v4427_v63 = vpack.c.bf16 %v5944_v19, %v5947_v48 }
 0x9cc   : > { %2783 = vrot.lane.b32.xlu1 %v4203_v60, %s6802_s30 }
 0x9cd   : > { %2781 = vrot.lane.b32.xlu0 %v2609_v16, %s6802_s30 }
 0x9d0   : > { %2795 = vrot.lane.b32.xlu1 %v4203_v60, %s6805_s9 }
 0x9d1   : > { %2793 = vrot.lane.b32.xlu0 %v2609_v16, %s6805_s9 }
 0x9d4   : > { %2673 = vrot.lane.b32.xlu1 %v4203_v60, %s6744_s17 }
 0x9d5   : > { %2671 = vrot.lane.b32.xlu0 %v2609_v16, %s6744_s17 }
 0x9d8   : > { %2685 = vrot.lane.b32.xlu1 %v4203_v60, %s6748_s21 }
 0x9d9   : > { %2683 = vrot.lane.b32.xlu0 %v2609_v16, %s6748_s21 }
 0x9dc   : > { %2819 = vrot.lane.b32.xlu1 %v4203_v60, %s6734_s3 }
 0x9dd   : > { %2817 = vrot.lane.b32.xlu0 %v2609_v16, %s6734_s3  ;;  %s6756_s3 = smov 12  }
 0x9e0   : > { %2831 = vrot.lane.b32.xlu1 %v4203_v60, %s6746_s24 }
 0x9e1   : > { %2829 = vrot.lane.b32.xlu0 %v2609_v16, %s6746_s24 }
 0x9e4   : > { %2710 = vrot.lane.b32.xlu1 %v4203_v60, %s6736_s12 }
 0x9e5   : > { %2708 = vrot.lane.b32.xlu0 %v2609_v16, %s6736_s12  ;;  %s6752_s12 = smov 123  }
 0x9e8   : > { %2722 = vrot.lane.b32.xlu1 %v4203_v60, %s6738_s16 }
 0x9e9   : > { %2720 = vrot.lane.b32.xlu0 %v2609_v16, %s6738_s16  ;;  %s6750_s16 = smov 11  }
 0x9ec   : > { %2856 = vrot.lane.b32.xlu1 %v4203_v60, %s6754_s29 }
 0x9ed   : > { %2854 = vrot.lane.b32.xlu0 %v2609_v16, %s6754_s29 }
 0x9f0   : > { %2868 = vrot.lane.b32.xlu1 %v4203_v60, %s6756_s3 }
 0x9f1   : > { %2866 = vrot.lane.b32.xlu0 %v2609_v16, %s6756_s3 }
 0x9f4   : > { %2747 = vrot.lane.b32.xlu1 %v4203_v60, %s6807_s7 }
 0x9f5   : > { %2745 = vrot.lane.b32.xlu0 %v2609_v16, %s6807_s7 }
 0x9f8   : > { %2759 = vrot.lane.b32.xlu1 %v4203_v60, %s6806_s10 }
 0x9f9   : > { %2757 = vrot.lane.b32.xlu0 %v2609_v16, %s6806_s10 }
 0x9fc   : > { %2893 = vrot.lane.b32.xlu1 %v4203_v60, %s6752_s12 }
 0x9fd   : > { %2891 = vrot.lane.b32.xlu0 %v2609_v16, %s6752_s12  ;;  %s6839_s12 = smov 123  }
 0xa00   : > { %2905 = vrot.lane.b32.xlu1 %v4203_v60, %s6750_s16 }
 0xa01   : > { %2903 = vrot.lane.b32.xlu0 %v2609_v16, %s6750_s16  ;;  %s6840_s16 = smov 11  }
 0xa04   : > { %2640 = vrot.lane.b32.xlu1 %v5944_v19, %s6742_s19 }
 0xa05   : > { %2638 = vrot.lane.b32.xlu0 %v5947_v48, %s6742_s19  ;;  %s6836_s19 = smov 115  }
 0xa08   : > { %2652 = vrot.lane.b32.xlu1 %v5944_v19, %s6740_s20 }
 0xa09   : > { %2650 = vrot.lane.b32.xlu0 %v5947_v48, %s6740_s20  ;;  %s6835_s20 = smov 125  }
 0xa0c   : > { %2787 = vrot.lane.b32.xlu1 %v5944_v19, %s6802_s30 }
 0xa0d   : > { %2785 = vrot.lane.b32.xlu0 %v5947_v48, %s6802_s30 }
 0xa10   : > { %2799 = vrot.lane.b32.xlu1 %v5944_v19, %s6805_s9 }
 0xa11   : > { %2797 = vrot.lane.b32.xlu0 %v5947_v48, %s6805_s9 }
 0xa14   : > { %2677 = vrot.lane.b32.xlu1 %v5944_v19, %s6744_s17 }
 0xa15   : > { %2675 = vrot.lane.b32.xlu0 %v5947_v48, %s6744_s17  ;;  %s6837_s17 = smov 3  }
 0xa18   : > { %2689 = vrot.lane.b32.xlu1 %v5944_v19, %s6748_s21 }
 0xa19   : > { %2687 = vrot.lane.b32.xlu0 %v5947_v48, %s6748_s21  ;;  %s6859_s21 = sld [smem:[#allocation17_spill]] }
 0xa1c   : > { %2823 = vrot.lane.b32.xlu1 %v5944_v19, %s6835_s20 }
 0xa1d   : > { %2821 = vrot.lane.b32.xlu0 %v5947_v48, %s6835_s20 }
 0xa20   : > { %2835 = vrot.lane.b32.xlu1 %v5944_v19, %s6746_s24 }
 0xa21   : > { %2833 = vrot.lane.b32.xlu0 %v5947_v48, %s6746_s24 }
 0xa24   : > { %2714 = vrot.lane.b32.xlu1 %v5944_v19, %s6836_s19 }
 0xa25   : > { %2712 = vrot.lane.b32.xlu0 %v5947_v48, %s6836_s19 }
 0xa28   : > { %2726 = vrot.lane.b32.xlu1 %v5944_v19, %s6837_s17 }
 0xa29   : > { %2724 = vrot.lane.b32.xlu0 %v5947_v48, %s6837_s17 }
 0xa2c   : > { %2860 = vrot.lane.b32.xlu1 %v5944_v19, %s6754_s29 }
 0xa2d   : > { %2858 = vrot.lane.b32.xlu0 %v5947_v48, %s6754_s29  ;;  %s6838_s29 = sld [smem:[#allocation18_spill]] }
 0xa30   : > { %2872 = vrot.lane.b32.xlu1 %v5944_v19, %s6756_s3 }
 0xa31   : > { %2870 = vrot.lane.b32.xlu0 %v5947_v48, %s6756_s3  ;;  %s6845_s3 = smov 4  }
 0xa33   : > { %v6038_v49 = vld [vmem:[%s6838_s29] sm:$0xff]  ;;  %v6108_v61 = vld [vmem:[%s6838_s29 + $0x8] ss:$0 sm:$0xff] }
 0xa34   : > { %2751 = vrot.lane.b32.xlu1 %v5944_v19, %s6807_s7  ;;  %v6044_v39 = vrot.slane %v6038_v49, %v4982_v17  ;;  %v6116_v15 = vrot.slane %v6038_v49, %v4980_v14 }
 0xa35   : > { %2749 = vrot.lane.b32.xlu0 %v5947_v48, %s6807_s7 }
 0xa36   : > { %v2637_v0 = vpop.permute.xlu1 %2636 }
 0xa37   : > { %v2635_v33 = vpop.permute.xlu0 %2634 }
 0xa38   : > { %2763 = vrot.lane.b32.xlu1 %v5944_v19, %s6806_s10 }
 0xa39   : > { %2761 = vrot.lane.b32.xlu0 %v5947_v48, %s6806_s10 }
 0xa3a   : > { %v2649_v32 = vpop.permute.xlu1 %2648 }
 0xa3b   : > { %v2660_v8 = vsel %vm2658_vm7, %v2637_v0, %v2649_v32  ;;  %v2647_v47 = vpop.permute.xlu0 %2646 }
 0xa3c   : > { %v2668_v22 = vmul.f32 %v6044_v39, %v2660_v8  ;;  %v2659_v1 = vsel %vm2658_vm7, %v2635_v33, %v2647_v47  ;;  %2897 = vrot.lane.b32.xlu1 %v5944_v19, %s6839_s12 }
 0xa3d   : > { %v2667_v17 = vmul.f32 %v6044_v39, %v2659_v1  ;;  %2895 = vrot.lane.b32.xlu0 %v5947_v48, %s6839_s12  ;;  %v6124_v1 = vrot.slane %v6038_v49, %v4978_v13 }
 0xa3e   : > { %v2784_v27 = vpop.permute.xlu1 %2783 }
 0xa3f   : > { %v4425_v23 = vpack.c.bf16 %v2668_v22, %v2667_v17  ;;  %v2782_v37 = vpop.permute.xlu0 %2781 }
 0xa40   : > { %2909 = vrot.lane.b32.xlu1 %v5944_v19, %s6840_s16 }
 0xa41   : > { %4426 = vmatpush3.bf16.msra.mxu0 %v4425_v23  ;;  %2907 = vrot.lane.b32.xlu0 %v5947_v48, %s6840_s16 }
 0xa42   : > { %v2796_v34 = vpop.permute.xlu1 %2795  ;;  %4428 = vmatprep.subr.bf16.mxu0 %v4427_v63 }
 0xa43   : > { %v2794_v54 = vpop.permute.xlu0 %2793  ;;  %v2806_v32 = vsel %vm859_vm0, %v2784_v27, %v2796_v34 }
 0xa44   : > { %2943 = vperm.xlu1 %4628, %v2935_v7   ;;  %v2805_v21 = vsel %vm859_vm0, %v2782_v37, %v2794_v54  ;;  %v2814_v47 = vmul.f32 %v6116_v15, %v2806_v32 }
 0xa45   : > { %2938 = vperm.xlu0 %4627, %v2934_v31   ;;  %v2813_v22 = vmul.f32 %v6116_v15, %v2805_v21 }
 0xa46   : > { %v2674_v59 = vpop.permute.xlu1 %2673 }
 0xa47   : > { %v2672_v11 = vpop.permute.xlu0 %2671 }
 0xa4a   : > { %v2686_v10 = vpop.permute.xlu1 %2685 }
 0xa4b   : > { %v2684_v41 = vpop.permute.xlu0 %2683  ;;  %v2697_v23 = vsel %vm2695_vm4, %v2674_v59, %v2686_v10 }
 0xa4c   : > { %v2696_v27 = vsel %vm2695_vm4, %v2672_v11, %v2684_v41  ;;  %v2705_v54 = vmul.f32 %v6124_v1, %v2697_v23 }
 0xa4e   : > { %v6073_v35 = vpop.permute.xlu1 %2819 }
 0xa4f   : > { %v6075_v44 = vpop.permute.xlu0 %2817 }
 0xa52   : > { %v6077_v55 = vpop.permute.xlu1 %2831 }
 0xa53   : > { %v6079_v6 = vpop.permute.xlu0 %2829 }
 0xa54   : > { %v2842_v32 = vsel %vm2841_vm9, %v6075_v44, %v6079_v6 }
 0xa56   : > { %v6081_v5 = vpop.permute.xlu1 %2710 }
 0xa57   : > { %v6083_v20 = vpop.permute.xlu0 %2708 }
 0xa5a   : > { %v6085_v53 = vpop.permute.xlu1 %2722 }
 0xa5b   : > { %v6087_v28 = vpop.permute.xlu0 %2720 }
 0xa5c   : > { %v2733_v44 = vsel %vm2732_vm14, %v6083_v20, %v6087_v28 }
 0xa5e   : > { %v6089_v42 = vpop.permute.xlu1 %2856 }
 0xa5f   : > { %v6091_v29 = vpop.permute.xlu0 %2854 }
 0xa62   : > { %v6093_v46 = vpop.permute.xlu1 %2868 }
 0xa63   : > { %v6095_v51 = vpop.permute.xlu0 %2866 }
 0xa66   : > { %v6097_v36 = vpop.permute.xlu1 %2747 }
 0xa67   : > { %v6099_v50 = vpop.permute.xlu0 %2745 }
 0xa6a   : > { %v6101_v24 = vpop.permute.xlu1 %2759 }
 0xa6b   : > { %v6103_v25 = vpop.permute.xlu0 %2757 }
 0xa6e   : > { %v2894_v45 = vpop.permute.xlu1 %2893 }
 0xa6f   : > { %v2892_v62 = vpop.permute.xlu0 %2891 }
 0xa72   : > { %v2906_v38 = vpop.permute.xlu1 %2905 }
 0xa73   : > { %v2917_v60 = vsel %vm2915_vm3, %v2894_v45, %v2906_v38  ;;  %v2904_v16 = vpop.permute.xlu0 %2903  ;;  %v2704_v45 = vmul.f32 %v6124_v1, %v2696_v27  ;;  %v4431_v38 = vpack.c.bf16 %v2814_v47, %v2813_v22 }
 0xa74   : > { %v2925_v18 = vmul.f32 %v6108_v61, %v2917_v60  ;;  %v2916_v19 = vsel %vm2915_vm3, %v2892_v62, %v2904_v16 }
 0xa75   : > { %v2924_v48 = vmul.f32 %v6108_v61, %v2916_v19  ;;  %v4433_v59 = vpack.c.bf16 %v2705_v54, %v2704_v45 }
 0xa76   : > { %v2641_v63 = vpop.permute.xlu1 %2640 }
 0xa77   : > { %v2639_v0 = vpop.permute.xlu0 %2638  ;;  %v4455_v33 = vpack.c.bf16 %v2925_v18, %v2924_v48  ;;  %v6140_v48 = vrot.slane %v6038_v49, %v5034_v40  ;;  %v6152_v40 = vrot.slane %v6038_v49, %v4964_v9 }
 0xa79   : > { %4456 = vmatprep.subr.bf16.mxu1 %v4455_v33  ;;  %v2850_v47 = vmul.f32 %v6140_v48, %v2842_v32  ;;  %v2741_v27 = vmul.f32 %v6152_v40, %v2733_v44 }
 0xa7a   : > { %4458 = vmatpush3.bf16.msra.mxu1 %v4455_v33  ;;  %v2653_v8 = vpop.permute.xlu1 %2652  ;;  %v2843_v33 = vsel %vm2841_vm9, %v6073_v35, %v6077_v55  ;;  %v2734_v35 = vsel %vm2732_vm14, %v6081_v5, %v6085_v53 }
 0xa7b   : > { %v2662_v14 = vsel %vm2658_vm7, %v2641_v63, %v2653_v8  ;;  %v2651_v17 = vpop.permute.xlu0 %2650  ;;  %v2851_v8 = vmul.f32 %v6140_v48, %v2843_v33  ;;  %v2742_v9 = vmul.f32 %v6152_v40, %v2734_v35 }
 0xa7c   : > { %v2670_v37 = vmul.f32 %v6044_v39, %v2662_v14  ;;  %v2661_v7 = vsel %vm2658_vm7, %v2639_v0, %v2651_v17 }
 0xa7d   : > { %v2669_v34 = vmul.f32 %v6044_v39, %v2661_v7  ;;  %v4441_v53 = vpack.c.bf16 %v2742_v9, %v2741_v27 }
 0xa7e   : > { %v2788_v31 = vpop.permute.xlu1 %2787 }
 0xa7f   : > { %v4429_v13 = vpack.c.bf16 %v2670_v37, %v2669_v34  ;;  %v2786_v62 = vpop.permute.xlu0 %2785  ;;  %v4439_v34 = vpack.c.bf16 %v2851_v8, %v2850_v47 }
 0xa81   : > { %4430 = vmatpush3.bf16.msra.mxu0 %v4429_v13 }
 0xa82   : > { %v2800_v60 = vpop.permute.xlu1 %2799  ;;  %4432 = vmatprep.subr.bf16.mxu0 %v4431_v38 }
 0xa83   : > { %v2808_v11 = vsel %vm859_vm0, %v2788_v31, %v2800_v60  ;;  %v2798_v10 = vpop.permute.xlu0 %2797 }
 0xa84   : > { %v2816_v41 = vmul.f32 %v6116_v15, %v2808_v11  ;;  %v2807_v16 = vsel %vm859_vm0, %v2786_v62, %v2798_v10  ;;  %v6172_v62 = vrot.slane %v6038_v49, %v5052_v56  ;;  %v2879_v11 = vsel %vm2878_vm12, %v6091_v29, %v6095_v51 }
 0xa85   : > { %v2815_v18 = vmul.f32 %v6116_v15, %v2807_v16  ;;  %4434 = vmatpush3.bf16.msra.mxu0 %v4433_v59  ;;  %v2880_v59 = vsel %vm2878_vm12, %v6089_v42, %v6093_v46  ;;  %v6184_v56 = vrot.slane %v6038_v49, %v4976_v12  ;;  %v2770_v42 = vsel %vm879_vm1, %v6097_v36, %v6101_v24 }
 0xa86   : > { %v2678_v19 = vpop.permute.xlu1 %2677  ;;  %v2887_v16 = vmul.f32 %v6172_v62, %v2879_v11  ;;  %v2769_v29 = vsel %vm879_vm1, %v6099_v50, %v6103_v25 }
 0xa87   : > { %v2676_v63 = vpop.permute.xlu0 %2675  ;;  %v4435_v0 = vpack.c.bf16 %v2816_v41, %v2815_v18  ;;  %v2888_v41 = vmul.f32 %v6172_v62, %v2880_v59  ;;  %v2778_v12 = vmul.f32 %v6184_v56, %v2770_v42  ;;  %v2777_v49 = vmul.f32 %v6184_v56, %v2769_v29  ;;  %v2933_v59 = vld [vmem:[%s6650_s14 + $0x28] sm:$0xff] }
 0xa89   : > { %4436 = vmatprep.subr.bf16.mxu0 %v4435_v0  ;;  %v4449_v24 = vpack.c.bf16 %v2778_v12, %v2777_v49 }
 0xa8a   : > { %v2690_v21 = vpop.permute.xlu1 %2689 }
 0xa8b   : > { %v2699_v22 = vsel %vm2695_vm4, %v2678_v19, %v2690_v21  ;;  %v2688_v14 = vpop.permute.xlu0 %2687  ;;  %v4447_v21 = vpack.c.bf16 %v2888_v41, %v2887_v16 }
 0xa8c   : > { %v2707_v55 = vmul.f32 %v6124_v1, %v2699_v22  ;;  %v2698_v6 = vsel %vm2695_vm4, %v2676_v63, %v2688_v14 }
 0xa8d   : > { %v2706_v17 = vmul.f32 %v6124_v1, %v2698_v6 }
 0xa8e   : > { %v2824_v23 = vpop.permute.xlu1 %2823 }
 0xa8f   : > { %v4437_v37 = vpack.c.bf16 %v2707_v55, %v2706_v17  ;;  %v2822_v7 = vpop.permute.xlu0 %2821 }
 0xa91   : > { %4438 = vmatpush3.bf16.msra.mxu0 %v4437_v37 }
 0xa92   : > { %v2836_v5 = vpop.permute.xlu1 %2835  ;;  %4440 = vmatprep.subr.bf16.mxu0 %v4439_v34 }
 0xa93   : > { %v2845_v20 = vsel %vm2841_vm9, %v2824_v23, %v2836_v5  ;;  %v2834_v28 = vpop.permute.xlu0 %2833  ;;  %v2928_v5 = vld [vmem:[%s6650_s14] sm:$0xff] }
 0xa94   : > { %v2853_v31 = vmul.f32 %v6140_v48, %v2845_v20  ;;  %v2844_v54 = vsel %vm2841_vm9, %v2822_v7, %v2834_v28  ;;  %v2932_v20 = vld [vmem:[%s6650_s14 + $0x20] sm:$0xff] }
 0xa95   : > { %v2852_v45 = vmul.f32 %v6140_v48, %v2844_v54  ;;  %4442 = vmatpush3.bf16.msra.mxu0 %v4441_v53 }
 0xa96   : > { %v2715_v13 = vpop.permute.xlu1 %2714 }
 0xa97   : > { %v2713_v38 = vpop.permute.xlu0 %2712  ;;  %v4443_v60 = vpack.c.bf16 %v2853_v31, %v2852_v45 }
 0xa99   : > { %4444 = vmatprep.subr.bf16.mxu0 %v4443_v60 }
 0xa9a   : > { %v2727_v10 = vpop.permute.xlu1 %2726 }
 0xa9b   : > { %v2736_v18 = vsel %vm2732_vm14, %v2715_v13, %v2727_v10  ;;  %v2725_v19 = vpop.permute.xlu0 %2724 }
 0xa9c   : > { %v2744_v46 = vmul.f32 %v6152_v40, %v2736_v18  ;;  %v2735_v51 = vsel %vm2732_vm14, %v2713_v38, %v2725_v19  ;;  %v2931_v38 = vld [vmem:[%s6650_s14 + $0x18] sm:$0xff] }
 0xa9d   : > { %v2743_v63 = vmul.f32 %v6152_v40, %v2735_v51 }
 0xa9e   : > { %v2861_v0 = vpop.permute.xlu1 %2860 }
 0xa9f   : > { %v4445_v33 = vpack.c.bf16 %v2744_v46, %v2743_v63  ;;  %v2859_v32 = vpop.permute.xlu0 %2858 }
 0xaa1   : > { %4446 = vmatpush3.bf16.msra.mxu0 %v4445_v33 }
 0xaa2   : > { %v2873_v36 = vpop.permute.xlu1 %2872  ;;  %4448 = vmatprep.subr.bf16.mxu0 %v4447_v21 }
 0xaa3   : > { %v2882_v50 = vsel %vm2878_vm12, %v2861_v0, %v2873_v36  ;;  %v2871_v25 = vpop.permute.xlu0 %2870 }
 0xaa4   : > { %v2890_v8 = vmul.f32 %v6172_v62, %v2882_v50  ;;  %v2881_v47 = vsel %vm2878_vm12, %v2859_v32, %v2871_v25  ;;  %v3239_v50 = vld [vmem:[%s6651_s15 + $0x8] sm:$0xff] }
 0xaa5   : > { %v2889_v22 = vmul.f32 %v6172_v62, %v2881_v47  ;;  %4450 = vmatpush3.bf16.msra.mxu0 %v4449_v24  ;;  %v3243_v25 = vld [vmem:[%s6659_s23 + $0x8] sm:$0xff] }
 0xaa6   : > { %v2752_v14 = vpop.permute.xlu1 %2751 }
 0xaa7   : > { %v2750_v35 = vpop.permute.xlu0 %2749  ;;  %v4451_v44 = vpack.c.bf16 %v2890_v8, %v2889_v22  ;;  %v3242_v8 = vld [vmem:[%s6659_s23] sm:$0xff] }
 0xaa9   : > { %4452 = vmatprep.subr.bf16.mxu0 %v4451_v44 }
 0xaaa   : > { %v2764_v55 = vpop.permute.xlu1 %2763 }
 0xaab   : > { %v2772_v6 = vsel %vm879_vm1, %v2752_v14, %v2764_v55  ;;  %v2762_v17 = vpop.permute.xlu0 %2761 }
 0xaac   : > { %v2780_v23 = vmul.f32 %v6184_v56, %v2772_v6  ;;  %v2771_v9 = vsel %vm879_vm1, %v2750_v35, %v2762_v17 }
 0xaad   : > { %v2779_v27 = vmul.f32 %v6184_v56, %v2771_v9 }
 0xaae   : > { %v2898_v37 = vpop.permute.xlu1 %2897 }
 0xaaf   : > { %v4453_v7 = vpack.c.bf16 %v2780_v23, %v2779_v27  ;;  %v2896_v34 = vpop.permute.xlu0 %2895 }
 0xab1   : > { %4454 = vmatpush3.bf16.msra.mxu0 %v4453_v7 }
 0xab2   : > { %v2910_v53 = vpop.permute.xlu1 %2909 }
 0xab3   : > { %v2919_v28 = vsel %vm2915_vm3, %v2898_v37, %v2910_v53  ;;  %v2908_v31 = vpop.permute.xlu0 %2907 }
 0xab4   : > { %v2927_v54 = vmul.f32 %v6108_v61, %v2919_v28  ;;  %v2918_v45 = vsel %vm2915_vm3, %v2896_v34, %v2908_v31  ;;  %3017 = vmatmul.mubr.f32.vlgmr.msra.gmra.mrb[18].mxu0 %v2928_v5 }
 0xab5   : > { %v2926_v13 = vmul.f32 %v6108_v61, %v2918_v45  ;;  %3021 = vmatprep.mubr.f32.mxu0 %v2932_v20 }
 0xab7   : > { %v4459_v60 = vpack.c.bf16 %v2927_v54, %v2926_v13 }
 0xab8   : > { %3022 = vmatmul.mubr.f32.gmra.mrb[20].mxu0 %v2931_v38 }
 0xab9   : > { %4460 = vmatprep.subr.bf16.mxu1 %v4459_v60 }
 0xaba   : > { %4462 = vmatpush3.bf16.msra.mxu1 %v4459_v60 }
 0xabb   : > { %4463 = vmatprep.subr.bf16.mxu1 %v4707_v43 }
 0xabd   : > { %4216 = vmatmul.mubr.msk.f32.vlgmr.msra.gmra.mrb[20].mxu1 %vm2327_vm11, %v2933_v59 }
 0xabe   : > { %3997 = vmatprep.mubr.msk.f32.mxu1 %vm839_vm2, %v3239_v50 }
 0xac3   : > { %v2944_v42 = vpop.permute.xlu1 %2943 }
 0xac4   : > { %v2939_v29 = vpop.permute.xlu0 %2938 }
 0xb87   : > { %v4145_v11 = vpop.f32.mrb[18].mxu0 }
 0xb88   : > { %v4146_v10 = vpop.f32.mrb[19].mxu0 }
 0xb89   : > { %v4147_v41 = vadd.f32 %v4146_v10, %v4145_v11 }
 0xb8b   : > { %v4148_v16 = vpop.f32.mrb[20].mxu0  ;;  %v3019_v63 = vadd.f32 %v4147_v41, %v2939_v29 }
 0xb8c   : > { %v4149_v18 = vpop.f32.mrb[21].mxu0 }
 0xb8d   : > { %v4150_v19 = vadd.f32 %v4149_v18, %v4148_v16 }
 0xb8f   : > { %v3024_v46 = vadd.f32 %v4150_v19, %v2944_v42 }
 0xb90   : > { %v4217_v51 = vpop.f32.mrb[20].mxu1 }
 0xb91   : > { %v3099_v0 = vadd.f32 %v4217_v51, %v3024_v46  ;;  %v3093_v12 = vpop.f32.mrb[21].mxu1 }
 0xb92   : > { %v3094_v49 = vadd.f32 %v3093_v12, %v3019_v63 }
 0xb93   : > { %vm3103_vm10 = vcmp.ge.f32.partialorder %v3099_v0, 0.0  ;;  %v3105_v33 = vmul.f32 -0.2, %v3099_v0 }
 0xb94   : > { %vm3102_vm8 = vcmp.ge.f32.partialorder %v3094_v49, 0.0  ;;  %v3104_v32 = vmul.f32 -0.2, %v3094_v49 }
 0xb95   : > { %v6224_v21 = vsel %vm3103_vm10, %v3099_v0, %v3105_v33 }
 0xb96   : > { %v6226_v36 = vsel %vm3102_vm8, %v3094_v49, %v3104_v32  ;;  %3112 = vrot.lane.b32.xlu1 %v6224_v21, %s6842_s22 }
 0xb97   : > { %3110 = vrot.lane.b32.xlu0 %v6226_v36, %s6842_s22  ;;  %v4476_v24 = vpack.c.bf16 %v6224_v21, %v6226_v36 }
 0xb9a   : > { %3118 = vrot.lane.b32.xlu1 %v6224_v21, %s6843_s25 }
 0xb9b   : > { %3116 = vrot.lane.b32.xlu0 %v6226_v36, %s6843_s25 }
 0xb9e   : > { %3128 = vrot.lane.b32.xlu1 %v6224_v21, %s6844_s13 }
 0xb9f   : > { %3126 = vrot.lane.b32.xlu0 %v6226_v36, %s6844_s13  ;;  %s6852_s13 = smov 55  }
 0xba2   : > { %3134 = vrot.lane.b32.xlu1 %v6224_v21, %s6845_s3 }
 0xba3   : > { %3132 = vrot.lane.b32.xlu0 %v6226_v36, %s6845_s3 }
 0xba6   : > { %3144 = vrot.lane.b32.xlu1 %v6224_v21, %s6836_s19 }
 0xba7   : > { %3142 = vrot.lane.b32.xlu0 %v6226_v36, %s6836_s19  ;;  %s6847_s19 = smov 124  }
 0xbaa   : > { %3150 = vrot.lane.b32.xlu1 %v6224_v21, %s6837_s17 }
 0xbab   : > { %3148 = vrot.lane.b32.xlu0 %v6226_v36, %s6837_s17  ;;  %s6848_s17 = smov 12  }
 0xbae   : > { %3160 = vrot.lane.b32.xlu1 %v6224_v21, %s6807_s7 }
 0xbaf   : > { %3158 = vrot.lane.b32.xlu0 %v6226_v36, %s6807_s7  ;;  %s6846_s7 = smov 13  }
 0xbb2   : > { %3166 = vrot.lane.b32.xlu1 %v6224_v21, %s6806_s10 }
 0xbb3   : > { %3164 = vrot.lane.b32.xlu0 %v6226_v36, %s6806_s10 }
 0xbb6   : > { %3176 = vrot.lane.b32.xlu1 %v6224_v21, %s6802_s30 }
 0xbb7   : > { %3174 = vrot.lane.b32.xlu0 %v6226_v36, %s6802_s30 }
 0xbba   : > { %3182 = vrot.lane.b32.xlu1 %v6224_v21, %s6805_s9 }
 0xbbb   : > { %3180 = vrot.lane.b32.xlu0 %v6226_v36, %s6805_s9 }
 0xbbe   : > { %3192 = vrot.lane.b32.xlu1 %v6224_v21, %s6835_s20 }
 0xbbf   : > { %3190 = vrot.lane.b32.xlu0 %v6226_v36, %s6835_s20  ;;  %s6849_s20 = sld [smem:[#allocation21_spill]] }
 0xbc2   : > { %3198 = vrot.lane.b32.xlu1 %v6224_v21, %s6846_s7 }
 0xbc3   : > { %3196 = vrot.lane.b32.xlu0 %v6226_v36, %s6846_s7  ;;  %s6866_s7 = sld [smem:[#allocation29_spill]] }
 0xbc6   : > { %3208 = vrot.lane.b32.xlu1 %v6224_v21, %s6847_s19 }
 0xbc7   : > { %3206 = vrot.lane.b32.xlu0 %v6226_v36, %s6847_s19  ;;  %s6853_s19 = sld [smem:[#allocation35_spill]] }
 0xbca   : > { %3214 = vrot.lane.b32.xlu1 %v6224_v21, %s6848_s17 }
 0xbcb   : > { %3212 = vrot.lane.b32.xlu0 %v6226_v36, %s6848_s17 }
 0xbce   : > { %3224 = vrot.lane.b32.xlu1 %v6224_v21, %s6839_s12 }
 0xbcf   : > { %3222 = vrot.lane.b32.xlu0 %v6226_v36, %s6839_s12  ;;  %s6850_s12 = sld [smem:[#allocation28_spill]] }
 0xbd2   : > { %3230 = vrot.lane.b32.xlu1 %v6224_v21, %s6840_s16 }
 0xbd3   : > { %3228 = vrot.lane.b32.xlu0 %v6226_v36, %s6840_s16  ;;  %s6851_s16 = smov 119  }
 0xbd6   : > { %3251 = vperm.xlu1 %4628, %v3243_v25  }
 0xbd7   : > { %3246 = vperm.xlu0 %4627, %v3242_v8  }
 0xc08   : > { %v3113_v47 = vpop.permute.xlu1 %3112 }
 0xc09   : > { %v3111_v22 = vpop.permute.xlu0 %3110 }
 0xc0c   : > { %v3119_v14 = vpop.permute.xlu1 %3118 }
 0xc0d   : > { %v3123_v35 = vsel %vm2658_vm7, %v3113_v47, %v3119_v14  ;;  %v3117_v44 = vpop.permute.xlu0 %3116 }
 0xc0e   : > { %v3125_v55 = vmul.f32 %v3123_v35, %v6044_v39  ;;  %v3122_v6 = vsel %vm2658_vm7, %v3111_v22, %v3117_v44 }
 0xc0f   : > { %v3124_v17 = vmul.f32 %v3122_v6, %v6044_v39 }
 0xc10   : > { %v3129_v23 = vpop.permute.xlu1 %3128 }
 0xc11   : > { %v4464_v9 = vpack.c.bf16 %v3125_v55, %v3124_v17  ;;  %v3127_v27 = vpop.permute.xlu0 %3126 }
 0xc13   : > { %4465 = vmatpush1.bf16.msra.mxu1 %v4464_v9 }
 0xc14   : > { %v3135_v37 = vpop.permute.xlu1 %3134  ;;  %4466 = vmatprep.subr.bf16.mxu1 %v4707_v43 }
 0xc15   : > { %v3139_v7 = vsel %vm2695_vm4, %v3129_v23, %v3135_v37  ;;  %v3133_v34 = vpop.permute.xlu0 %3132 }
 0xc16   : > { %v3141_v5 = vmul.f32 %v3139_v7, %v6124_v1  ;;  %v3138_v53 = vsel %vm2695_vm4, %v3127_v27, %v3133_v34  ;;  %vm4734_vm4 = vmmov 0  }
 0xc17   : > { %v3140_v20 = vmul.f32 %v3138_v53, %v6124_v1 }
 0xc18   : > { %v3145_v28 = vpop.permute.xlu1 %3144 }
 0xc19   : > { %v4467_v31 = vpack.c.bf16 %v3141_v5, %v3140_v20  ;;  %v3143_v54 = vpop.permute.xlu0 %3142 }
 0xc1b   : > { %4468 = vmatpush1.bf16.msra.mxu1 %v4467_v31 }
 0xc1c   : > { %v3151_v39 = vpop.permute.xlu1 %3150  ;;  %4469 = vmatprep.subr.bf16.mxu1 %v4707_v43 }
 0xc1d   : > { %v3155_v45 = vsel %vm2732_vm14, %v3145_v28, %v3151_v39  ;;  %v3149_v13 = vpop.permute.xlu0 %3148  ;;  %v3240_v39 = vld [vmem:[%s6651_s15 + $0x10] sm:$0xff] }
 0xc1e   : > { %v3157_v38 = vmul.f32 %v3155_v45, %v6152_v40  ;;  %v3154_v60 = vsel %vm2732_vm14, %v3143_v54, %v3149_v13  ;;  %v3241_v54 = vld [vmem:[%s6651_s15 + $0x18] sm:$0xff]  ;;  %v3342_v45 = vld [vmem:[%s6849_s20 + $0x8] sm:$0xff]  ;;  %vm6858_vm14 = vcmask 449536  }
 0xc1f   : > { %v3156_v59 = vmul.f32 %v3154_v60, %v6152_v40  ;;  %vm6860_vm7 = vmmov %vm6858_vm14 }
 0xc20   : > { %v3161_v11 = vpop.permute.xlu1 %3160 }
 0xc21   : > { %v4470_v10 = vpack.c.bf16 %v3157_v38, %v3156_v59  ;;  %v3159_v41 = vpop.permute.xlu0 %3158 }
 0xc23   : > { %4471 = vmatpush1.bf16.msra.mxu1 %v4470_v10 }
 0xc24   : > { %v3167_v1 = vpop.permute.xlu1 %3166  ;;  %4472 = vmatprep.subr.bf16.mxu1 %v4707_v43 }
 0xc25   : > { %v3171_v16 = vsel %vm879_vm1, %v3161_v11, %v3167_v1  ;;  %v3165_v18 = vpop.permute.xlu0 %3164 }
 0xc26   : > { %v3173_v19 = vmul.f32 %v3171_v16, %v6184_v56  ;;  %v3170_v42 = vsel %vm879_vm1, %v3159_v41, %v3165_v18 }
 0xc27   : > { %v3172_v29 = vmul.f32 %v3170_v42, %v6184_v56 }
 0xc28   : > { %v3177_v46 = vpop.permute.xlu1 %3176 }
 0xc29   : > { %v4473_v51 = vpack.c.bf16 %v3173_v19, %v3172_v29  ;;  %v3175_v63 = vpop.permute.xlu0 %3174 }
 0xc2b   : > { %4474 = vmatpush1.bf16.msra.mxu1 %v4473_v51 }
 0xc2c   : > { %v3183_v40 = vpop.permute.xlu1 %3182  ;;  %4475 = vmatprep.subr.bf16.mxu1 %v4707_v43 }
 0xc2d   : > { %v3187_v0 = vsel %vm859_vm0, %v3177_v46, %v3183_v40  ;;  %v3181_v12 = vpop.permute.xlu0 %3180  ;;  %v3555_v40 = vld [vmem:[%s6850_s12 + $0x8] sm:$0xff] }
 0xc2e   : > { %v3189_v49 = vmul.f32 %v3187_v0, %v6116_v15  ;;  %v3186_v33 = vsel %vm859_vm0, %v3175_v63, %v3181_v12  ;;  %v3556_v0 = vld [vmem:[%s6853_s19] sm:$0xff] }
 0xc2f   : > { %v3188_v32 = vmul.f32 %v3186_v33, %v6116_v15  ;;  %4477 = vmatpush1.bf16.msra.mxu1 %v4476_v24 }
 0xc30   : > { %v3193_v56 = vpop.permute.xlu1 %3192  ;;  %4478 = vmatprep.subr.bf16.mxu1 %v4707_v43 }
 0xc31   : > { %v4479_v50 = vpack.c.bf16 %v3189_v49, %v3188_v32  ;;  %v3191_v25 = vpop.permute.xlu0 %3190 }
 0xc33   : > { %4480 = vmatpush1.bf16.msra.mxu1 %v4479_v50 }
 0xc34   : > { %v3199_v8 = vpop.permute.xlu1 %3198  ;;  %4481 = vmatprep.subr.bf16.mxu1 %v4707_v43 }
 0xc35   : > { %v3203_v47 = vsel %vm2841_vm9, %v3193_v56, %v3199_v8  ;;  %v3197_v22 = vpop.permute.xlu0 %3196 }
 0xc36   : > { %v3205_v14 = vmul.f32 %v3203_v47, %v6140_v48  ;;  %v3202_v15 = vsel %vm2841_vm9, %v3191_v25, %v3197_v22  ;;  %vm6870_vm9 = vcmask 523264  }
 0xc37   : > { %v3204_v35 = vmul.f32 %v3202_v15, %v6140_v48 }
 0xc38   : > { %v3209_v21 = vpop.permute.xlu1 %3208 }
 0xc39   : > { %v4482_v36 = vpack.c.bf16 %v3205_v14, %v3204_v35  ;;  %v3207_v24 = vpop.permute.xlu0 %3206 }
 0xc3b   : > { %4483 = vmatpush1.bf16.msra.mxu1 %v4482_v36 }
 0xc3c   : > { %v3215_v44 = vpop.permute.xlu1 %3214  ;;  %4484 = vmatprep.subr.bf16.mxu1 %v4707_v43 }
 0xc3d   : > { %v3219_v55 = vsel %vm2878_vm12, %v3209_v21, %v3215_v44  ;;  %v3213_v6 = vpop.permute.xlu0 %3212 }
 0xc3e   : > { %v3221_v17 = vmul.f32 %v3219_v55, %v6172_v62  ;;  %v3218_v23 = vsel %vm2878_vm12, %v3207_v24, %v3213_v6  ;;  %vm6856_vm12 = vcmask 457728  }
 0xc3f   : > { %v3220_v9 = vmul.f32 %v3218_v23, %v6172_v62  ;;  %v3238_v62 = vld [vmem:[%s6651_s15] sm:$0xff]  ;;  %vm6857_vm11 = vmmov %vm6856_vm12 }
 0xc40   : > { %v3225_v27 = vpop.permute.xlu1 %3224 }
 0xc41   : > { %v4485_v37 = vpack.c.bf16 %v3221_v17, %v3220_v9  ;;  %v3223_v7 = vpop.permute.xlu0 %3222 }
 0xc43   : > { %4486 = vmatpush1.bf16.msra.mxu1 %v4485_v37 }
 0xc44   : > { %v3231_v48 = vpop.permute.xlu1 %3230  ;;  %4487 = vmatprep.subr.bf16.mxu1 %v4707_v43 }
 0xc45   : > { %v3235_v34 = vsel %vm2915_vm3, %v3225_v27, %v3231_v48  ;;  %v3229_v5 = vpop.permute.xlu0 %3228 }
 0xc46   : > { %v3237_v53 = vmul.f32 %v6108_v61, %v3235_v34  ;;  %v3234_v20 = vsel %vm2915_vm3, %v3223_v7, %v3229_v5 }
 0xc47   : > { %v3236_v28 = vmul.f32 %v6108_v61, %v3234_v20  ;;  %v3341_v61 = vld [vmem:[%s6849_s20] sm:$0xff] }
 0xc48   : > { %v4490_v13 = vpack.c.bf16 %v3342_v45, %v3341_v61 }
 0xc49   : > { %v4488_v31 = vpack.c.bf16 %v3237_v53, %v3236_v28 }
 0xc4a   : > { %4491 = vmatprep.subr.bf16.mxu0 %v4490_v13 }
 0xc4b   : > { %4489 = vmatpush1.bf16.msra.mxu1 %v4488_v31  ;;  %4493 = vmatpush3.bf16.msra.mxu0 %v4490_v13 }
 0xc4c   : > { %4521 = vmatprep.subr.bf16.mxu1 %v4707_v43  ;;  %4494 = vmatprep.subr.bf16.mxu0 %v4707_v43 }
 0xc4e   : > { %3325 = vmatmul.mubr.f32.vlgmr.msra.gmra.mrb[22].mxu1 %v3238_v62 }
 0xc4f   : > { %3998 = vmatprep.mubr.msk.f32.mxu1 %vm839_vm2, %v3241_v54 }
 0xc52   : > { %3330 = vmatmul.mubr.f32.gmra.mrb[24].mxu1 %v3240_v39 }
 0xc53   : > { %4243 = vmatprep.mubr.msk.f32.mxu1 %vm4734_vm4, %v4702_v2 }
 0xc55   : > { %v3252_v41 = vpop.permute.xlu1 %3251 }
 0xc56   : > { %v3247_v38 = vpop.permute.xlu0 %3246 }
 0xd21   : > { %v3326_v60 = vpop.f32.mrb[22].mxu1 }
 0xd22   : > { %v3327_v59 = vadd.f32 %v3326_v60, %v3247_v38  ;;  %v3328_v11 = vpop.f32.mrb[23].mxu1 }
 0xd24   : > { %vm3335_vm0 = vcmp.ge.f32.partialorder %v3327_v59, 0.0  ;;  %v3337_v10 = vmul.f32 -0.2, %v3327_v59 }
 0xd25   : > { %v3331_v1 = vpop.f32.mrb[24].mxu1 }
 0xd26   : > { %v3332_v16 = vadd.f32 %v3331_v1, %v3252_v41  ;;  %v3339_v18 = vsel %vm3335_vm0, %v3327_v59, %v3337_v10  ;;  %v3333_v19 = vpop.f32.mrb[25].mxu1 }
 0xd27   : > { %4222 = vmatprep.mubr.msk.f32.mxu0 %vm839_vm2, %v3339_v18 }
 0xd28   : > { %vm3336_vm8 = vcmp.ge.f32.partialorder %v3332_v16, 0.0  ;;  %v3338_v42 = vmul.f32 -0.2, %v3332_v16 }
 0xd2a   : > { %v3340_v29 = vsel %vm3336_vm8, %v3332_v16, %v3338_v42 }
 0xd2b   : > { %4223 = vmatmul.mubr.msk.f32.vlgmr.msra.gmra.mrb[22].mxu0 %vm839_vm2, %v3340_v29 }
 0xd2c   : > { %4001 = vmatprep.mubr.msk.f32.mxu0 %vm839_vm2, %v3555_v40  ;;  %vm6854_vm2 = vcmask 465920  }
 0xd2d   : > { %vm6855_vm10 = vmmov %vm6854_vm2 }
 0xdfe   : > { %v6367_v46 = vpop.f32.mrb[22].mxu0 }
 0xdff   : > { %3428 = vrot.lane.b32.xlu1 %v6367_v46, %s6830_s18  ;;  %v6371_v51 = vpop.f32.mrb[23].mxu0 }
 0xe00   : > { %3426 = vrot.lane.b32.xlu0 %v6371_v51, %s6830_s18  ;;  %v4507_v63 = vpack.c.bf16 %v6367_v46, %v6371_v51 }
 0xe03   : > { %3434 = vrot.lane.b32.xlu1 %v6367_v46, %s6818_s0 }
 0xe04   : > { %3432 = vrot.lane.b32.xlu0 %v6371_v51, %s6818_s0 }
 0xe07   : > { %3444 = vrot.lane.b32.xlu1 %v6367_v46, %s6820_s5 }
 0xe08   : > { %3442 = vrot.lane.b32.xlu0 %v6371_v51, %s6820_s5 }
 0xe0b   : > { %3450 = vrot.lane.b32.xlu1 %v6367_v46, %s6821_s6 }
 0xe0c   : > { %3448 = vrot.lane.b32.xlu0 %v6371_v51, %s6821_s6 }
 0xe0f   : > { %3460 = vrot.lane.b32.xlu1 %v6367_v46, %s6824_s27 }
 0xe10   : > { %3458 = vrot.lane.b32.xlu0 %v6371_v51, %s6824_s27 }
 0xe13   : > { %3466 = vrot.lane.b32.xlu1 %v6367_v46, %s6825_s8 }
 0xe14   : > { %3464 = vrot.lane.b32.xlu0 %v6371_v51, %s6825_s8 }
 0xe17   : > { %3476 = vrot.lane.b32.xlu1 %v6367_v46, %s6828_s11 }
 0xe18   : > { %3474 = vrot.lane.b32.xlu0 %v6371_v51, %s6828_s11 }
 0xe1b   : > { %3482 = vrot.lane.b32.xlu1 %v6367_v46, %s6806_s10 }
 0xe1c   : > { %3480 = vrot.lane.b32.xlu0 %v6371_v51, %s6806_s10 }
 0xe1f   : > { %3492 = vrot.lane.b32.xlu1 %v6367_v46, %s6802_s30 }
 0xe20   : > { %3490 = vrot.lane.b32.xlu0 %v6371_v51, %s6802_s30 }
 0xe23   : > { %3498 = vrot.lane.b32.xlu1 %v6367_v46, %s6819_s1 }
 0xe24   : > { %3496 = vrot.lane.b32.xlu0 %v6371_v51, %s6819_s1 }
 0xe27   : > { %3508 = vrot.lane.b32.xlu1 %v6367_v46, %s6822_s28 }
 0xe28   : > { %3506 = vrot.lane.b32.xlu0 %v6371_v51, %s6822_s28 }
 0xe2b   : > { %3514 = vrot.lane.b32.xlu1 %v6367_v46, %s6823_s26 }
 0xe2c   : > { %3512 = vrot.lane.b32.xlu0 %v6371_v51, %s6823_s26 }
 0xe2f   : > { %3524 = vrot.lane.b32.xlu1 %v6367_v46, %s6826_s4 }
 0xe30   : > { %3522 = vrot.lane.b32.xlu0 %v6371_v51, %s6826_s4 }
 0xe33   : > { %3530 = vrot.lane.b32.xlu1 %v6367_v46, %s6827_s2 }
 0xe34   : > { %3528 = vrot.lane.b32.xlu0 %v6371_v51, %s6827_s2 }
 0xe37   : > { %3540 = vrot.lane.b32.xlu1 %v6367_v46, %s6851_s16 }
 0xe38   : > { %3538 = vrot.lane.b32.xlu0 %v6371_v51, %s6851_s16 }
 0xe3b   : > { %3546 = vrot.lane.b32.xlu1 %v6367_v46, %s6852_s13 }
 0xe3c   : > { %3544 = vrot.lane.b32.xlu0 %v6371_v51, %s6852_s13 }
 0xe40   : > { %3559 = vperm.xlu0 %4627, %v3556_v0  }
 0xe71   : > { %v3429_v12 = vpop.permute.xlu1 %3428 }
 0xe72   : > { %v3427_v49 = vpop.permute.xlu0 %3426 }
 0xe75   : > { %v3435_v33 = vpop.permute.xlu1 %3434 }
 0xe76   : > { %v3439_v32 = vsel %vm1735_vm13, %v3429_v12, %v3435_v33  ;;  %v3433_v56 = vpop.permute.xlu0 %3432 }
 0xe77   : > { %v3441_v50 = vmul.f32 %v3439_v32, %v5568_v4  ;;  %v3438_v25 = vsel %vm1735_vm13, %v3427_v49, %v3433_v56 }
 0xe78   : > { %v3440_v8 = vmul.f32 %v3438_v25, %v5568_v4 }
 0xe79   : > { %v3445_v47 = vpop.permute.xlu1 %3444 }
 0xe7a   : > { %v4495_v22 = vpack.c.bf16 %v3441_v50, %v3440_v8  ;;  %v3443_v14 = vpop.permute.xlu0 %3442 }
 0xe7c   : > { %4496 = vmatpush1.bf16.msra.mxu0 %v4495_v22 }
 0xe7d   : > { %v3451_v15 = vpop.permute.xlu1 %3450  ;;  %4497 = vmatprep.subr.bf16.mxu0 %v4707_v43 }
 0xe7e   : > { %v3455_v35 = vsel %vm1756_vm15, %v3445_v47, %v3451_v15  ;;  %v3449_v21 = vpop.permute.xlu0 %3448 }
 0xe7f   : > { %v3457_v36 = vmul.f32 %v3455_v35, %v5576_v58  ;;  %v3454_v24 = vsel %vm1756_vm15, %v3443_v14, %v3449_v21  ;;  %v6487_v21 = vld [vmem:[%s6859_s21 + $0x8] ss:$0 sm:$0xff] }
 0xe80   : > { %v3456_v44 = vmul.f32 %v3454_v24, %v5576_v58 }
 0xe81   : > { %v3461_v55 = vpop.permute.xlu1 %3460 }
 0xe82   : > { %v4498_v6 = vpack.c.bf16 %v3457_v36, %v3456_v44  ;;  %v3459_v17 = vpop.permute.xlu0 %3458 }
 0xe84   : > { %4499 = vmatpush1.bf16.msra.mxu0 %v4498_v6  ;;  %v3554_v6 = vld [vmem:[%s6850_s12] sm:$0xff] }
 0xe85   : > { %v3467_v23 = vpop.permute.xlu1 %3466  ;;  %4500 = vmatprep.subr.bf16.mxu0 %v4707_v43 }
 0xe86   : > { %v3471_v9 = vsel %vm1777_vm5, %v3461_v55, %v3467_v23  ;;  %v3465_v27 = vpop.permute.xlu0 %3464 }
 0xe87   : > { %v3473_v37 = vmul.f32 %v3471_v9, %v5585_v30  ;;  %v3470_v7 = vsel %vm1777_vm5, %v3459_v17, %v3465_v27 }
 0xe88   : > { %v3472_v48 = vmul.f32 %v3470_v7, %v5585_v30 }
 0xe89   : > { %v3477_v34 = vpop.permute.xlu1 %3476 }
 0xe8a   : > { %v4501_v5 = vpack.c.bf16 %v3473_v37, %v3472_v48  ;;  %v3475_v53 = vpop.permute.xlu0 %3474 }
 0xe8c   : > { %4502 = vmatpush1.bf16.msra.mxu0 %v4501_v5 }
 0xe8d   : > { %v3483_v20 = vpop.permute.xlu1 %3482  ;;  %4503 = vmatprep.subr.bf16.mxu0 %v4707_v43 }
 0xe8e   : > { %v3487_v28 = vsel %vm879_vm1, %v3477_v34, %v3483_v20  ;;  %v3481_v31 = vpop.permute.xlu0 %3480 }
 0xe8f   : > { %v3489_v62 = vmul.f32 %v3487_v28, %v5594_v26  ;;  %v3486_v54 = vsel %vm879_vm1, %v3475_v53, %v3481_v31 }
 0xe90   : > { %v3488_v39 = vmul.f32 %v3486_v54, %v5594_v26 }
 0xe91   : > { %v3493_v61 = vpop.permute.xlu1 %3492 }
 0xe92   : > { %v4504_v45 = vpack.c.bf16 %v3489_v62, %v3488_v39  ;;  %v3491_v13 = vpop.permute.xlu0 %3490 }
 0xe94   : > { %4505 = vmatpush1.bf16.msra.mxu0 %v4504_v45 }
 0xe95   : > { %v3499_v38 = vpop.permute.xlu1 %3498  ;;  %4506 = vmatprep.subr.bf16.mxu0 %v4707_v43 }
 0xe96   : > { %v3503_v60 = vsel %vm1818_vm6, %v3493_v61, %v3499_v38  ;;  %v3497_v59 = vpop.permute.xlu0 %3496 }
 0xe97   : > { %v3505_v11 = vmul.f32 %v3503_v60, %v5603_v52  ;;  %v3502_v10 = vsel %vm1818_vm6, %v3491_v13, %v3497_v59 }
 0xe98   : > { %v3504_v41 = vmul.f32 %v3502_v10, %v5603_v52  ;;  %4508 = vmatpush1.bf16.msra.mxu0 %v4507_v63 }
 0xe99   : > { %v3509_v1 = vpop.permute.xlu1 %3508  ;;  %4509 = vmatprep.subr.bf16.mxu0 %v4707_v43 }
 0xe9a   : > { %v4510_v16 = vpack.c.bf16 %v3505_v11, %v3504_v41  ;;  %v3507_v18 = vpop.permute.xlu0 %3506 }
 0xe9c   : > { %4511 = vmatpush1.bf16.msra.mxu0 %v4510_v16 }
 0xe9d   : > { %v3515_v19 = vpop.permute.xlu1 %3514  ;;  %4512 = vmatprep.subr.bf16.mxu0 %v4707_v43 }
 0xe9e   : > { %v3519_v42 = vsel %vm6854_vm2, %v3509_v1, %v3515_v19  ;;  %v3513_v29 = vpop.permute.xlu0 %3512 }
 0xe9f   : > { %v3521_v40 = vmul.f32 %v3519_v42, %v5616_v3  ;;  %v3518_v0 = vsel %vm6855_vm10, %v3507_v18, %v3513_v29 }
 0xea0   : > { %v3520_v12 = vmul.f32 %v3518_v0, %v5616_v3 }
 0xea1   : > { %v3525_v46 = vpop.permute.xlu1 %3524 }
 0xea2   : > { %v4513_v51 = vpack.c.bf16 %v3521_v40, %v3520_v12  ;;  %v3523_v63 = vpop.permute.xlu0 %3522 }
 0xea4   : > { %4514 = vmatpush1.bf16.msra.mxu0 %v4513_v51 }
 0xea5   : > { %v3531_v49 = vpop.permute.xlu1 %3530  ;;  %4515 = vmatprep.subr.bf16.mxu0 %v4707_v43 }
 0xea6   : > { %v3535_v33 = vsel %vm6856_vm12, %v3525_v46, %v3531_v49  ;;  %v3529_v32 = vpop.permute.xlu0 %3528 }
 0xea7   : > { %v3537_v56 = vmul.f32 %v3535_v33, %v5625_v57  ;;  %v3534_v50 = vsel %vm6857_vm11, %v3523_v63, %v3529_v32 }
 0xea8   : > { %v3536_v25 = vmul.f32 %v3534_v50, %v5625_v57 }
 0xea9   : > { %v3541_v8 = vpop.permute.xlu1 %3540 }
 0xeaa   : > { %v4516_v47 = vpack.c.bf16 %v3537_v56, %v3536_v25  ;;  %v3539_v22 = vpop.permute.xlu0 %3538  ;;  %v3703_v25 = vld [vmem:[%s6866_s7] sm:$0xff] }
 0xeac   : > { %4517 = vmatpush1.bf16.msra.mxu0 %v4516_v47 }
 0xead   : > { %v3547_v14 = vpop.permute.xlu1 %3546  ;;  %4518 = vmatprep.subr.bf16.mxu0 %v4707_v43 }
 0xeae   : > { %v3551_v15 = vsel %vm6858_vm14, %v3541_v8, %v3547_v14  ;;  %v3545_v35 = vpop.permute.xlu0 %3544 }
 0xeaf   : > { %v3553_v36 = vmul.f32 %v6487_v21, %v3551_v15  ;;  %v3550_v24 = vsel %vm6860_vm7, %v3539_v22, %v3545_v35 }
 0xeb0   : > { %v3552_v44 = vmul.f32 %v6487_v21, %v3550_v24 }
 0xeb2   : > { %v4519_v55 = vpack.c.bf16 %v3553_v36, %v3552_v44 }
 0xeb4   : > { %4520 = vmatpush1.bf16.msra.mxu0 %v4519_v55 }
 0xeb7   : > { %3630 = vmatmul.mubr.f32.vlgmr.msra.gmra.mrb[24].mxu0 %v3554_v6 }
 0xebf   : > { %v3560_v17 = vpop.permute.xlu0 %3559 }
 0xf8a   : > { %v3631_v23 = vpop.f32.mrb[24].mxu0 }
 0xf8b   : > { %v3632_v9 = vadd.f32 %v3631_v23, %v3560_v17  ;;  %v3633_v27 = vpop.f32.mrb[25].mxu0 }
 0xf8d   : > { %vm3635_vm3 = vcmp.ge.f32.partialorder %v3632_v9, 0.0  ;;  %v3636_v37 = vmul.f32 -0.2, %v3632_v9 }
 0xf8f   : > { %v3637_v7 = vsel %vm3635_vm3, %v3632_v9, %v3636_v37 }
 0xf90   : > { %3642 = vrot.lane.b32.xlu0 %v3637_v7, %s6818_s0  ;;  %3639 = vrot.lane.b32.xlu1 %v3637_v7, %s6830_s18 }
 0xf94   : > { %3650 = vrot.lane.b32.xlu0 %v3637_v7, %s6821_s6  ;;  %3647 = vrot.lane.b32.xlu1 %v3637_v7, %s6820_s5 }
 0xf98   : > { %3658 = vrot.lane.b32.xlu0 %v3637_v7, %s6825_s8  ;;  %3655 = vrot.lane.b32.xlu1 %v3637_v7, %s6824_s27 }
 0xf9c   : > { %3666 = vrot.lane.b32.xlu0 %v3637_v7, %s6806_s10  ;;  %3663 = vrot.lane.b32.xlu1 %v3637_v7, %s6828_s11  ;;  %s6861_s10 = sld [smem:[#allocation36_spill]]  ;;  %s6872_s11 = sld [smem:[#allocation37_spill]] }
 0xfa0   : > { %3674 = vrot.lane.b32.xlu0 %v3637_v7, %s6819_s1  ;;  %3671 = vrot.lane.b32.xlu1 %v3637_v7, %s6802_s30 }
 0xfa2   : > { %v3704_v48 = vld [vmem:[%s6861_s10] sm:$0xff] }
 0xfa4   : > { %3682 = vrot.lane.b32.xlu0 %v3637_v7, %s6823_s26  ;;  %3679 = vrot.lane.b32.xlu1 %v3637_v7, %s6822_s28  ;;  %s6868_s26 = sld [smem:[#allocation6_spill]] }
 0xfa8   : > { %3690 = vrot.lane.b32.xlu0 %v3637_v7, %s6827_s2  ;;  %3687 = vrot.lane.b32.xlu1 %v3637_v7, %s6826_s4  ;;  %s6864_s4 = sld [smem:[#allocation22_spill]]  ;;  %s4735_s2 = smov [#allocation2]  }
 0xfa9   : > { %s4636_s0 = sshll.u32 %s4735_s2, 4  ;;  %s4637_s0 = int_to_ptr.vmem [resolvable:$false] %s4636_s0 }
 0xfaa   : > { %s795_s7 = sand.u32 1, %s6868_s26   ;;  %s4638_s1 = scalar_lea.vmem %s4637_s0, 512 }
 0xfab   : > { %s3968_s19 = sshll.u32 %s795_s7, 4  ;;  %s3879_s10 = scalar_lea.sflag [#allocation3], %s795_s7 }
 0xfac   : > { %3698 = vrot.lane.b32.xlu0 %v3637_v7, %s6852_s13  ;;  %3695 = vrot.lane.b32.xlu1 %v3637_v7, %s6851_s16  ;;  %s6869_s13 = sld [smem:[#allocation9_spill]]  ;;  %s797_s17 = scalar_lea.vmem [#allocation2], %s3968_s19 }
 0xfad   : > { %s3893_s9 = sshll.u32 %s797_s17, 4  ;;  %s6591_s9 = int_to_ptr.vmem [resolvable:$true] %s3893_s9 }
 0xfae   : > { %v3787_v63 = vld [vmem:[%s6864_s4 + $0x8] sm:$0xff]  ;;  %v3789_v49 = vld [vmem:[%s6864_s4 + $0x18] sm:$0xff]  ;;  %v3786_v33 = vld [vmem:[%s6864_s4] sm:$0xff]  ;;  %s4632_s30 = scalar_lea.vmem %s6591_s9, 256  ;;  %p4639_p0 = scmp.lt.s32.totalorder %s6591_s9, %s4637_s0 }
 0xfaf   : > { %v3793_v32 = vld [vmem:[%s6864_s4 + $0x38] sm:$0xff]  ;;  %v4533_v56 = vpack.c.bf16 %v3789_v49, %v3787_v63  ;;  %v3790_v22 = vld [vmem:[%s6864_s4 + $0x20] sm:$0xff]  ;;  %v3792_v14 = vld [vmem:[%s6864_s4 + $0x30] sm:$0xff]  ;;  %p4633_p11 = scmp.ne.s32.totalorder %s6591_s9, %s4632_s30  ;;  %p4640_p1 = scmp.lt.s32.totalorder %s4638_s1, %s4632_s30 }
 0xfb0   : > { %3707 = vperm.xlu1 %4628, %v3704_v48   ;;  %v3795_v15 = vld [vmem:[%s6864_s4 + $0x48] sm:$0xff]  ;;  %v3797_v35 = vld [vmem:[%s6864_s4 + $0x58] sm:$0xff]  ;;  %v3794_v24 = vld [vmem:[%s6864_s4 + $0x40] sm:$0xff] }
 0xfb1   : > { %v4541_v36 = vpack.c.bf16 %v3797_v35, %v3795_v15  ;;  %v3796_v44 = vld [vmem:[%s6864_s4 + $0x50] sm:$0xff]  ;;  %v3799_v6 = vld [vmem:[%s6864_s4 + $0x68] sm:$0xff]  ;;  %v3798_v23 = vld [vmem:[%s6864_s4 + $0x60] sm:$0xff]  ;;  %p4634_p12 = pnand %p4633_p11, %p4909_p5  ;;  %p4641_p2 = por %p4640_p1, %p4639_p0 }
 0xfb2   : > { %v4543_v55 = vpack.c.bf16 %v3796_v44, %v3794_v24  ;;  %v3800_v9 = vld [vmem:[%s6864_s4 + $0x70] sm:$0xff]  ;;  %s4010_s21 = sshll.u32 %s6869_s13, 8 }
 0xfb3   : > { %v4547_v27 = vpack.c.bf16 %v3800_v9, %v3798_v23  ;;  %s6596_s18 = scalar_lea.hbm %s6872_s11, %s4010_s21  ;;  %p4635_p13 = pneg %p4634_p12 }
 0xfb5   : > { %p4642_p3 = pnand %p4641_p2, %p4635_p13 }
0x1002   : > { %v3643_v34 = vpop.permute.xlu0 %3642  ;;  %v3640_v5 = vpop.permute.xlu1 %3639 }
0x1003   : > { %v3645_v53 = vsel %vm1735_vm13, %v3640_v5, %v3643_v34  ;;  %vm6862_vm13 = vmmov %vm6854_vm2 }
0x1004   : > { %v3646_v62 = vmul.f32 %v3645_v53, %v5568_v4 }
0x1006   : > { %v3651_v20 = vpop.permute.xlu0 %3650  ;;  %v3648_v28 = vpop.permute.xlu1 %3647 }
0x1007   : > { %v3653_v31 = vsel %vm1756_vm15, %v3648_v28, %v3651_v20  ;;  %vm6865_vm15 = vmmov %vm6860_vm7 }
0x1008   : > { %v3654_v54 = vmul.f32 %v3653_v31, %v5576_v58 }
0x100a   : > { %v4522_v39 = vpack.c.bf16 %v3654_v54, %v3646_v62  ;;  %v3659_v61 = vpop.permute.xlu0 %3658  ;;  %v3656_v45 = vpop.permute.xlu1 %3655 }
0x100b   : > { %v3661_v13 = vsel %vm1777_vm5, %v3656_v45, %v3659_v61  ;;  %vm6867_vm5 = vcmask 588800  }
0x100c   : > { %4523 = vmatpush3.bf16.msra.mxu1 %v4522_v39  ;;  %v3662_v11 = vmul.f32 %v3661_v13, %v5585_v30 }
0x100d   : > { %4524 = vmatprep.subr.bf16.mxu1 %v4707_v43 }
0x100e   : > { %v3667_v38 = vpop.permute.xlu0 %3666  ;;  %v3664_v60 = vpop.permute.xlu1 %3663 }
0x100f   : > { %v3669_v59 = vsel %vm879_vm1, %v3664_v60, %v3667_v38  ;;  %vm6863_vm1 = vmmov %vm6857_vm11 }
0x1010   : > { %v3670_v10 = vmul.f32 %v3669_v59, %v5594_v26 }
0x1012   : > { %v4525_v41 = vpack.c.bf16 %v3670_v10, %v3662_v11  ;;  %v3675_v4 = vpop.permute.xlu0 %3674  ;;  %v3672_v1 = vpop.permute.xlu1 %3671 }
0x1013   : > { %v3677_v58 = vsel %vm1818_vm6, %v3672_v1, %v3675_v4 }
0x1014   : > { %v3678_v16 = vmul.f32 %v3677_v58, %v5603_v52  ;;  %4526 = vmatpush3.bf16.msra.mxu1 %v4525_v41 }
0x1015   : > { %4527 = vmatprep.subr.bf16.mxu1 %v4707_v43 }
0x1016   : > { %v4528_v18 = vpack.c.bf16 %v3678_v16, %v3637_v7  ;;  %v3683_v19 = vpop.permute.xlu0 %3682  ;;  %v3680_v42 = vpop.permute.xlu1 %3679 }
0x1017   : > { %v3685_v29 = vsel %vm6862_vm13, %v3680_v42, %v3683_v19 }
0x1018   : > { %4529 = vmatpush3.bf16.msra.mxu1 %v4528_v18  ;;  %v3686_v0 = vmul.f32 %v3685_v29, %v5616_v3  ;;  %v3788_v3 = vld [vmem:[%s6864_s4 + $0x10] sm:$0xff] }
0x1019   : > { %4530 = vmatprep.subr.bf16.mxu1 %v4707_v43  ;;  %v4535_v8 = vpack.c.bf16 %v3788_v3, %v3786_v33 }
0x101a   : > { %v3691_v30 = vpop.permute.xlu0 %3690  ;;  %v3688_v26 = vpop.permute.xlu1 %3687 }
0x101b   : > { %v3693_v40 = vsel %vm6863_vm1, %v3688_v26, %v3691_v30 }
0x101c   : > { %v3694_v12 = vmul.f32 %v3693_v40, %v5625_v57  ;;  %v3791_v57 = vld [vmem:[%s6864_s4 + $0x28] sm:$0xff] }
0x101d   : > { %v4537_v47 = vpack.c.bf16 %v3793_v32, %v3791_v57 }
0x101e   : > { %v4531_v52 = vpack.c.bf16 %v3694_v12, %v3686_v0  ;;  %v3699_v46 = vpop.permute.xlu0 %3698  ;;  %v3696_v51 = vpop.permute.xlu1 %3695 }
0x101f   : > { %v3701_v43 = vsel %vm6865_vm15, %v3696_v51, %v3699_v46 }
0x1020   : > { %4532 = vmatpush3.bf16.msra.mxu1 %v4531_v52  ;;  %v3702_v50 = vmul.f32 %v6487_v21, %v3701_v43  ;;  %v4539_v21 = vpack.c.bf16 %v3792_v14, %v3790_v22 }
0x1021   : > { %4241 = vmatprep.subr.mxu1 %v4702_v2 }
0x1024   : > { %4242 = vmatpush3.msra.mxu1 %v3702_v50 }
0x1025   : > { %4244 = vmatmul.mubr.msk.f32.vlgmr.msra.gmra.mrb[26].mxu1 %vm6867_vm5, %v3703_v25  ;;  %4534 = vmatprep.subr.bf16.mxu1 %v4533_v56 }
0x1026   : > { %4536 = vmatpush1.bf16.msra.mxu1 %v4535_v8  ;;  %3869 = vmatprep.mubr.f32.mxu1 %v4702_v2  ;;  %v3801_v2 = vld [vmem:[%s6864_s4 + $0x78] sm:$0xff] }
0x1027   : > { %4538 = vmatprep.subr.bf16.mxu1 %v4537_v47  ;;  %v4545_v17 = vpack.c.bf16 %v3801_v2, %v3799_v6 }
0x102a   : > { %4540 = vmatpush1.bf16.msra.mxu1 %v4539_v21 }
0x102b   : > { %4542 = vmatprep.subr.bf16.mxu1 %v4541_v36 }
0x102e   : > { %4544 = vmatpush1.bf16.msra.mxu1 %v4543_v55 }
0x102f   : > { %4546 = vmatprep.subr.bf16.mxu1 %v4545_v17  ;;  %v3708_v37 = vpop.permute.xlu1 %3707 }
0x1032   : > { %4548 = vmatpush1.bf16.msra.mxu1 %v4547_v27 }
0x10f8   : > { %v3779_v7 = vpop.f32.mrb[26].mxu1 }
0x10f9   : > { %v3780_v48 = vadd.f32 %v3779_v7, %v3708_v37  ;;  %v4245_v34 = vpop.f32.mrb[27].mxu1 }
0x10fb   : > { %vm3783_vm6 = vcmp.ge.f32.partialorder %v3780_v48, 0.0  ;;  %v3784_v5 = vmul.f32 -0.2, %v3780_v48 }
0x10fd   : > { %v3785_v53 = vsel %vm3783_vm6, %v3780_v48, %v3784_v5 }
0x10fe   : > { %4003 = vmatmul.mubr.msk.f32.vlgmr.msra.gmra.mrb[28].mxu1 %vm6870_vm9, %v3785_v53 }
0x11d1   : > { %v3871_v20 = vpop.f32.mrb[28].mxu1 }
0x11d2   : > { %3876 = vst [vmem:[%s797_s17] sm:$0xff] %v3871_v20  ;;  %v3873_v28 = vpop.f32.mrb[29].mxu1 }
0x11d3   : > { %3877 = vst [vmem:[%s797_s17 + $0x8] sm:$0xff] %v3873_v28 }
0x11d4   : > { %4645 = shalt.err (!%p4642_p3)
}
0x11d5   : > { %s4646_s5 = scalar_lea.hbm %s6596_s18, 256  ;;  %s4650_s26 = scalar_lea.hbm %s6872_s11, 512 }
0x11d6   : > { %p4647_p4 = scmp.ne.s32.totalorder %s6596_s18, %s4646_s5  ;;  %p4651_p9 = scmp.lt.u32.totalorder %s6596_s18, %s6872_s11 }
0x11d7   : > { %p4652_p10 = scmp.lt.u32.totalorder %s4650_s26, %s4646_s5  ;;  %p4654_p12 = scmp.lt.u32.totalorder %s4646_s5, %s6596_s18 }
0x11d8   : > { %p4648_p7 = pnand %p4647_p4, %p4909_p5 }
0x11d9   : > { %p4653_p11 = por %p4652_p10, %p4651_p9 }
0x11da   : > { %p4649_p8 = pneg %p4648_p7 }
0x11db   : > { %p4655_p13 = por %p4654_p12, %p4653_p11 }
0x11dd   : > { %p4656_p0 = pnand %p4655_p13, %p4649_p8 }
0x11df   : > { %4659 = shalt.err (!%p4656_p0)
}
0x11e0   : > { %4549 = dma.vmem_to_hbm [thread:$0]  (%p4909_p5), %s6591_s9, 256, %s6596_s18, %s3879_s10  }
0x11e1 PF: > { %s6873_s25 = sld [smem:[#allocation8_spill]]  ;;  %s6874_s16 = sld [smem:[#allocation5_spill]] }
0x11e7   : > { %p4555_p1 = scmp.ge.s32.totalorder %s6873_s25, 2  ;;  %s3905_s7 = sand.u32 1, %s6874_s16  }
0x11e8   : > { %s3906_s19 = scalar_lea.sflag [#allocation3], %s3905_s7 }
0x11e9   : > { %p4552_p2 = pnand %p4555_p1, %p4913_p6 }
0x11eb   : > { %4677 = dma.done.wait (!%p4552_p2), %s3906_s19, 256  }
0x11ec   : > { %4679 = vsyncadd (!%p4552_p2), %s3906_s19, 4294967040  ;;  %s6876_s28 = sld [smem:[#allocation10_spill]]  ;;  %s6877_s27 = sld [smem:[#allocation6_spill]] }
0x11ed   : > { %s6878_s3 = sld [smem:[#allocation7_spill]]  ;;  %s6879_s7 = sld [smem:[#allocation11_spill]] }
0x11f2   : > { %p36_p3 = scmp.ge.s32.totalorder %s6876_s28, 4  }
0x11f4   :  { %38 = sbr.rel (!%p36_p3) target bundleno = 28 (0x1c), region = 162 }
0x11fb   :  { %3911 = vsyncpa [#allocation3], 1 }
0x11fc   :  { %3913 = vsyncpa [#allocation3 + $0x1], 1 }

</bundles_post_ra>
